<compile_context>
chip_gen: v6e
topology: v6e:2x2x1
jax: 0.10.0
libtpu: 0.0.40
codegen_flags: <defaults>
</compile_context>

<pallas_src>
import numpy as np
import jax
import jax.numpy as jnp
from jax.experimental import pallas as pl
from jax.experimental.pallas import tpu as pltpu

K = 5            # ConvTranspose2d kernel size
PAD = K - 1      # spatial growth per layer (stride=1, padding=0)
N_LAYERS = 4


def _round_up(x, m):
    return ((x + m - 1) // m) * m


# ---------------------------------------------------------------------------
# Wrapper + fused kernel: 4 x ConvTranspose2d(1, 1, 5, stride=1)
# ---------------------------------------------------------------------------
def deconv_layers_forward(x, weights, biases):
    """x: (B, 1, S, S) NCHW; weights: (4, 1, 1, 5, 5) PyTorch layout; biases: (4,)."""
    B, C, S, _ = x.shape
    assert C == 1
    s_final = S + N_LAYERS * PAD            # 32 for S=16
    WB = s_final + PAD                      # per-image block width (36): holds the largest
                                            # padded input (28+8) and the final output (4+32)
    HB = _round_up(s_final + PAD, 8)        # slab height, sublane-aligned (40)
    W = _round_up(B * WB, 128)              # lane-packed width, vreg-lane aligned (128)
    SCR_H = HB + 8                          # scratch rows: PAD always-zero rows on top fit here

    # --- wrapper-side layout plumbing (cheap XLA reshapes, no compute) -----
    xs = x[:, 0].astype(jnp.float32)                                     # (B, S, S)
    z0 = jnp.pad(xs, ((0, 0), (PAD, HB - PAD - S), (PAD, WB - PAD - S)))  # (B, HB, WB)
    z0 = jnp.transpose(z0, (1, 0, 2)).reshape(HB, B * WB)
    z0 = jnp.pad(z0, ((0, 0), (0, W - B * WB)))                          # (HB, W)

    w_flat = weights[:, 0, 0].reshape(N_LAYERS * K * K).astype(jnp.float32)
    b_vec = biases.astype(jnp.float32)

    # --- fused kernel -------------------------------------------------------
    def kernel(z_ref, w_ref, b_ref, out_ref, pad_ref):
        # z_ref   : (HB, W)     f32 VMEM  lane-packed, zero-margined input slab
        # w_ref   : (4*25,)     f32 SMEM  taps (PyTorch order, unflipped)
        # b_ref   : (4,)        f32 SMEM  biases
        # out_ref : (HB, W)     f32 VMEM  final slab; image bb's output lives at
        #                                 [PAD:PAD+32, bb*WB+PAD : bb*WB+PAD+32]
        # pad_ref : (SCR_H, W)  f32 VMEM  scratch; rows [0, PAD) stay zero forever
        pad_ref[...] = jnp.zeros_like(pad_ref)      # zero once (top margin must be zero)

        row_io = jax.lax.broadcasted_iota(jnp.int32, (HB, W), 0)
        col_io = jax.lax.broadcasted_iota(jnp.int32, (HB, W), 1)

        z = z_ref[...]
        s_in = S
        for l in range(N_LAYERS):
            s_out = s_in + PAD
            # current slab -> scratch rows [PAD, PAD+HB); rows [0, PAD) remain zero
            pad_ref[PAD:PAD + HB, :] = z

            # out[PAD+m, PAD+n] = sum_{p,q} w[p,q] * z[PAD+m-p, PAD+n-q]
            #   row shift p : sublane-offset VMEM load (5 per layer)
            #   col shift q : pltpu.roll lane rotation (XLU, co-issues with VALU)
            # Roll wrap-around and margin reads only ever touch provably-zero
            # regions (own/neighbour 4-wide margins, right lane padding), so the
            # result slab has the layer output at offset PAD and zeros elsewhere.
            acc_rows = []
            for p in range(K):
                zp = pad_ref[PAD - p:PAD - p + HB, :]       # z shifted down by p rows
                a = None
                for q in range(K):
                    w = w_ref[l * K * K + p * K + q]        # SMEM scalar tap
                    zpq = zp if q == 0 else pltpu.roll(zp, q, axis=1)
                    t = w * zpq
                    a = t if a is None else a + t
                acc_rows.append(a)                          # 5 independent chains (ILP)
            acc = ((acc_rows[0] + acc_rows[1]) + (acc_rows[2] + acc_rows[3])) + acc_rows[4]

            # Masked bias add: bias only inside the new data region, so every
            # margin stays exactly zero for the next layer (no re-zeroing).
            in_rows = (row_io >= PAD) & (row_io < PAD + s_out)
            in_cols = None
            for bb in range(B):
                lo = bb * WB + PAD
                cb = (col_io >= lo) & (col_io < lo + s_out)
                in_cols = cb if in_cols is None else (in_cols | cb)
            z = acc + jnp.where(in_rows & in_cols, b_ref[l], 0.0)
            s_in = s_out

        out_ref[...] = z        # single lane-dense slab store; unpacking is wrapper-side

    full2d = lambda shape: pl.BlockSpec(shape, lambda i: (0, 0))
    out_slab = pl.pallas_call(
        kernel,
        grid=(1,),
        in_specs=[
            full2d((HB, W)),
            pl.BlockSpec(memory_space=pltpu.MemorySpace.SMEM),   # taps
            pl.BlockSpec(memory_space=pltpu.MemorySpace.SMEM),   # biases
        ],
        out_specs=full2d((HB, W)),
        out_shape=jax.ShapeDtypeStruct((HB, W), jnp.float32),
        scratch_shapes=[pltpu.VMEM((SCR_H, W), jnp.float32)],
    )(z0, w_flat, b_vec)

    # --- un-pack to NCHW (wrapper-side layout plumbing) ---------------------
    out = out_slab[:, :B * WB].reshape(HB, B, WB).transpose(1, 0, 2)   # (B, HB, WB)
    out = out[:, PAD:PAD + s_final, PAD:PAD + s_final]                 # (B, 32, 32)
    return out[:, None]                                                # (B, 1, 32, 32)


# ---------------------------------------------------------------------------
# Deterministic parameter init (mirrors nn.ConvTranspose2d shapes)
# ---------------------------------------------------------------------------
def init_params(key):
    ks = jax.random.split(key, 2 * N_LAYERS)
    bound = 1.0 / float(np.sqrt(K * K))
    ws, bs = [], []
    for l in range(N_LAYERS):
        ws.append(jax.random.uniform(ks[2 * l], (1, 1, K, K), jnp.float32,
                                     -bound, bound))
        bs.append(jax.random.uniform(ks[2 * l + 1], (1,), jnp.float32,
                                     -bound, bound))
    return jnp.stack(ws), jnp.concatenate(bs)   # (4,1,1,5,5), (4,)


# ---------------------------------------------------------------------------
# Plain-JAX reference (independent code path, for verification)
# ---------------------------------------------------------------------------
def reference(x, weights, biases):
    y = x
    for l in range(N_LAYERS):
        wf = weights[l, :, :, ::-1, ::-1]       # (1,1,5,5), spatially flipped
        y = jax.lax.conv_general_dilated(
            y, wf, window_strides=(1, 1),
            padding=[(PAD, PAD), (PAD, PAD)],
            dimension_numbers=("NCHW", "OIHW", "NCHW"))
        y = y + biases[l]
    return y


if __name__ == "__main__":
    B, S = 2, 16

    key = jax.random.PRNGKey(0)
    kp, kx = jax.random.split(key)
    weights, biases = init_params(kp)
    x = jax.random.normal(kx, (B, 1, S, S), jnp.float32)

    out = deconv_layers_forward(x, weights, biases)
    jax.block_until_ready(out)

    ref = reference(x, weights, biases)
    np.testing.assert_allclose(np.asarray(out), np.asarray(ref),
                               rtol=1e-5, atol=1e-4)

    print("KERNEL_OK")
</pallas_src>

<mosaic_0001>
module attributes {stable_mosaic.version = 11 : i64} {
  func.func @kernel(%arg0: i32, %arg1: memref<40x128xf32, #tpu.memory_space<vmem>>, %arg2: memref<100xf32, #tpu.memory_space<smem>>, %arg3: memref<4xf32, #tpu.memory_space<smem>>, %arg4: memref<40x128xf32, #tpu.memory_space<vmem>>, %arg5: memref<48x128xf32, #tpu.memory_space<vmem>>) attributes {dimension_semantics = [#tpu.dimension_semantics<arbitrary>], iteration_bounds = array<i64: 1>, scalar_prefetch = 0 : i64, scratch_operands = 1 : i64, tpu.core_type = #tpu.core_type<tc>, window_params = [{pipeline_mode = #tpu.pipeline_mode<synchronous>, transform_indices = @transform_0, window_bounds = array<i64: 40, 128>}, {transform_indices = @transform_1, window_bounds = array<i64: 100>}, {transform_indices = @transform_2, window_bounds = array<i64: 4>}, {pipeline_mode = #tpu.pipeline_mode<synchronous>, transform_indices = @transform_3, window_bounds = array<i64: 40, 128>}]} {
    %cst = arith.constant 0.000000e+00 : f32
    %0 = vector.broadcast %cst : f32 to vector<48x128xf32>
    %c0 = arith.constant 0 : index
    %c0_0 = arith.constant 0 : index
    %1 = vector.load %arg5[%c0, %c0_0] : memref<48x128xf32, #tpu.memory_space<vmem>>, vector<48x128xf32>
    tpu.vector_store %arg5[%c0, %c0_0], %0 {strides = array<i32>} : memref<48x128xf32, #tpu.memory_space<vmem>>, vector<48x128xf32>,
    %2 = tpu.iota {dimensions = array<i32: 0>} : vector<40x128xi32>
    %3 = tpu.iota {dimensions = array<i32: 1>} : vector<40x128xi32>
    %c0_1 = arith.constant 0 : index
    %c0_2 = arith.constant 0 : index
    %4 = vector.load %arg1[%c0_1, %c0_2] : memref<40x128xf32, #tpu.memory_space<vmem>>, vector<40x128xf32>
    %c4 = arith.constant 4 : index
    %c0_3 = arith.constant 0 : index
    %5 = vector.load %arg5[%c4, %c0_3] : memref<48x128xf32, #tpu.memory_space<vmem>>, vector<40x128xf32>
    tpu.vector_store %arg5[%c4, %c0_3], %4 {strides = array<i32>} : memref<48x128xf32, #tpu.memory_space<vmem>>, vector<40x128xf32>,
    %c4_4 = arith.constant 4 : index
    %c0_5 = arith.constant 0 : index
    %6 = vector.load %arg5[%c4_4, %c0_5] : memref<48x128xf32, #tpu.memory_space<vmem>>, vector<40x128xf32>
    %c0_6 = arith.constant 0 : index
    %7 = memref.load %arg2[%c0_6] : memref<100xf32, #tpu.memory_space<smem>>
    %8 = vector.broadcast %7 : f32 to vector<40x128xf32>
    %9 = arith.mulf %8, %6 : vector<40x128xf32>
    %c1 = arith.constant 1 : index
    %10 = memref.load %arg2[%c1] : memref<100xf32, #tpu.memory_space<smem>>
    %c1_i32 = arith.constant 1 : i32
    %11 = tpu.dynamic_rotate %6 by %c1_i32 dim 1 : vector<40x128xf32>, i32 -> vector<40x128xf32>
    %12 = vector.broadcast %10 : f32 to vector<40x128xf32>
    %13 = arith.mulf %12, %11 : vector<40x128xf32>
    %14 = arith.addf %9, %13 : vector<40x128xf32>
    %c2 = arith.constant 2 : index
    %15 = memref.load %arg2[%c2] : memref<100xf32, #tpu.memory_space<smem>>
    %c2_i32 = arith.constant 2 : i32
    %16 = tpu.dynamic_rotate %6 by %c2_i32 dim 1 : vector<40x128xf32>, i32 -> vector<40x128xf32>
    %17 = vector.broadcast %15 : f32 to vector<40x128xf32>
    %18 = arith.mulf %17, %16 : vector<40x128xf32>
    %19 = arith.addf %14, %18 : vector<40x128xf32>
    %c3 = arith.constant 3 : index
    %20 = memref.load %arg2[%c3] : memref<100xf32, #tpu.memory_space<smem>>
    %c3_i32 = arith.constant 3 : i32
    %21 = tpu.dynamic_rotate %6 by %c3_i32 dim 1 : vector<40x128xf32>, i32 -> vector<40x128xf32>
    %22 = vector.broadcast %20 : f32 to vector<40x128xf32>
    %23 = arith.mulf %22, %21 : vector<40x128xf32>
    %24 = arith.addf %19, %23 : vector<40x128xf32>
    %c4_7 = arith.constant 4 : index
    %25 = memref.load %arg2[%c4_7] : memref<100xf32, #tpu.memory_space<smem>>
    %c4_i32 = arith.constant 4 : i32
    %26 = tpu.dynamic_rotate %6 by %c4_i32 dim 1 : vector<40x128xf32>, i32 -> vector<40x128xf32>
    %27 = vector.broadcast %25 : f32 to vector<40x128xf32>
    %28 = arith.mulf %27, %26 : vector<40x128xf32>
    %29 = arith.addf %24, %28 : vector<40x128xf32>
    %c3_8 = arith.constant 3 : index
    %c0_9 = arith.constant 0 : index
    %30 = vector.load %arg5[%c3_8, %c0_9] : memref<48x128xf32, #tpu.memory_space<vmem>>, vector<40x128xf32>
    %c5 = arith.constant 5 : index
    %31 = memref.load %arg2[%c5] : memref<100xf32, #tpu.memory_space<smem>>
    %32 = vector.broadcast %31 : f32 to vector<40x128xf32>
    %33 = arith.mulf %32, %30 : vector<40x128xf32>
    %c6 = arith.constant 6 : index
    %34 = memref.load %arg2[%c6] : memref<100xf32, #tpu.memory_space<smem>>
    %c1_i32_10 = arith.constant 1 : i32
    %35 = tpu.dynamic_rotate %30 by %c1_i32_10 dim 1 : vector<40x128xf32>, i32 -> vector<40x128xf32>
    %36 = vector.broadcast %34 : f32 to vector<40x128xf32>
    %37 = arith.mulf %36, %35 : vector<40x128xf32>
    %38 = arith.addf %33, %37 : vector<40x128xf32>
    %c7 = arith.constant 7 : index
    %39 = memref.load %arg2[%c7] : memref<100xf32, #tpu.memory_space<smem>>
    %c2_i32_11 = arith.constant 2 : i32
    %40 = tpu.dynamic_rotate %30 by %c2_i32_11 dim 1 : vector<40x128xf32>, i32 -> vector<40x128xf32>
    %41 = vector.broadcast %39 : f32 to vector<40x128xf32>
    %42 = arith.mulf %41, %40 : vector<40x128xf32>
    %43 = arith.addf %38, %42 : vector<40x128xf32>
    %c8 = arith.constant 8 : index
    %44 = memref.load %arg2[%c8] : memref<100xf32, #tpu.memory_space<smem>>
    %c3_i32_12 = arith.constant 3 : i32
    %45 = tpu.dynamic_rotate %30 by %c3_i32_12 dim 1 : vector<40x128xf32>, i32 -> vector<40x128xf32>
    %46 = vector.broadcast %44 : f32 to vector<40x128xf32>
    %47 = arith.mulf %46, %45 : vector<40x128xf32>
    %48 = arith.addf %43, %47 : vector<40x128xf32>
    %c9 = arith.constant 9 : index
    %49 = memref.load %arg2[%c9] : memref<100xf32, #tpu.memory_space<smem>>
    %c4_i32_13 = arith.constant 4 : i32
    %50 = tpu.dynamic_rotate %30 by %c4_i32_13 dim 1 : vector<40x128xf32>, i32 -> vector<40x128xf32>
    %51 = vector.broadcast %49 : f32 to vector<40x128xf32>
    %52 = arith.mulf %51, %50 : vector<40x128xf32>
    %53 = arith.addf %48, %52 : vector<40x128xf32>
    %c2_14 = arith.constant 2 : index
    %c0_15 = arith.constant 0 : index
    %54 = vector.load %arg5[%c2_14, %c0_15] : memref<48x128xf32, #tpu.memory_space<vmem>>, vector<40x128xf32>
    %c10 = arith.constant 10 : index
    %55 = memref.load %arg2[%c10] : memref<100xf32, #tpu.memory_space<smem>>
    %56 = vector.broadcast %55 : f32 to vector<40x128xf32>
    %57 = arith.mulf %56, %54 : vector<40x128xf32>
    %c11 = arith.constant 11 : index
    %58 = memref.load %arg2[%c11] : memref<100xf32, #tpu.memory_space<smem>>
    %c1_i32_16 = arith.constant 1 : i32
    %59 = tpu.dynamic_rotate %54 by %c1_i32_16 dim 1 : vector<40x128xf32>, i32 -> vector<40x128xf32>
    %60 = vector.broadcast %58 : f32 to vector<40x128xf32>
    %61 = arith.mulf %60, %59 : vector<40x128xf32>
    %62 = arith.addf %57, %61 : vector<40x128xf32>
    %c12 = arith.constant 12 : index
    %63 = memref.load %arg2[%c12] : memref<100xf32, #tpu.memory_space<smem>>
    %c2_i32_17 = arith.constant 2 : i32
    %64 = tpu.dynamic_rotate %54 by %c2_i32_17 dim 1 : vector<40x128xf32>, i32 -> vector<40x128xf32>
    %65 = vector.broadcast %63 : f32 to vector<40x128xf32>
    %66 = arith.mulf %65, %64 : vector<40x128xf32>
    %67 = arith.addf %62, %66 : vector<40x128xf32>
    %c13 = arith.constant 13 : index
    %68 = memref.load %arg2[%c13] : memref<100xf32, #tpu.memory_space<smem>>
    %c3_i32_18 = arith.constant 3 : i32
    %69 = tpu.dynamic_rotate %54 by %c3_i32_18 dim 1 : vector<40x128xf32>, i32 -> vector<40x128xf32>
    %70 = vector.broadcast %68 : f32 to vector<40x128xf32>
    %71 = arith.mulf %70, %69 : vector<40x128xf32>
    %72 = arith.addf %67, %71 : vector<40x128xf32>
    %c14 = arith.constant 14 : index
    %73 = memref.load %arg2[%c14] : memref<100xf32, #tpu.memory_space<smem>>
    %c4_i32_19 = arith.constant 4 : i32
    %74 = tpu.dynamic_rotate %54 by %c4_i32_19 dim 1 : vector<40x128xf32>, i32 -> vector<40x128xf32>
    %75 = vector.broadcast %73 : f32 to vector<40x128xf32>
    %76 = arith.mulf %75, %74 : vector<40x128xf32>
    %77 = arith.addf %72, %76 : vector<40x128xf32>
    %c1_20 = arith.constant 1 : index
    %c0_21 = arith.constant 0 : index
    %78 = vector.load %arg5[%c1_20, %c0_21] : memref<48x128xf32, #tpu.memory_space<vmem>>, vector<40x128xf32>
    %c15 = arith.constant 15 : index
    %79 = memref.load %arg2[%c15] : memref<100xf32, #tpu.memory_space<smem>>
    %80 = vector.broadcast %79 : f32 to vector<40x128xf32>
    %81 = arith.mulf %80, %78 : vector<40x128xf32>
    %c16 = arith.constant 16 : index
    %82 = memref.load %arg2[%c16] : memref<100xf32, #tpu.memory_space<smem>>
    %c1_i32_22 = arith.constant 1 : i32
    %83 = tpu.dynamic_rotate %78 by %c1_i32_22 dim 1 : vector<40x128xf32>, i32 -> vector<40x128xf32>
    %84 = vector.broadcast %82 : f32 to vector<40x128xf32>
    %85 = arith.mulf %84, %83 : vector<40x128xf32>
    %86 = arith.addf %81, %85 : vector<40x128xf32>
    %c17 = arith.constant 17 : index
    %87 = memref.load %arg2[%c17] : memref<100xf32, #tpu.memory_space<smem>>
    %c2_i32_23 = arith.constant 2 : i32
    %88 = tpu.dynamic_rotate %78 by %c2_i32_23 dim 1 : vector<40x128xf32>, i32 -> vector<40x128xf32>
    %89 = vector.broadcast %87 : f32 to vector<40x128xf32>
    %90 = arith.mulf %89, %88 : vector<40x128xf32>
    %91 = arith.addf %86, %90 : vector<40x128xf32>
    %c18 = arith.constant 18 : index
    %92 = memref.load %arg2[%c18] : memref<100xf32, #tpu.memory_space<smem>>
    %c3_i32_24 = arith.constant 3 : i32
    %93 = tpu.dynamic_rotate %78 by %c3_i32_24 dim 1 : vector<40x128xf32>, i32 -> vector<40x128xf32>
    %94 = vector.broadcast %92 : f32 to vector<40x128xf32>
    %95 = arith.mulf %94, %93 : vector<40x128xf32>
    %96 = arith.addf %91, %95 : vector<40x128xf32>
    %c19 = arith.constant 19 : index
    %97 = memref.load %arg2[%c19] : memref<100xf32, #tpu.memory_space<smem>>
    %c4_i32_25 = arith.constant 4 : i32
    %98 = tpu.dynamic_rotate %78 by %c4_i32_25 dim 1 : vector<40x128xf32>, i32 -> vector<40x128xf32>
    %99 = vector.broadcast %97 : f32 to vector<40x128xf32>
    %100 = arith.mulf %99, %98 : vector<40x128xf32>
    %101 = arith.addf %96, %100 : vector<40x128xf32>
    %c0_26 = arith.constant 0 : index
    %c0_27 = arith.constant 0 : index
    %102 = vector.load %arg5[%c0_26, %c0_27] : memref<48x128xf32, #tpu.memory_space<vmem>>, vector<40x128xf32>
    %c20 = arith.constant 20 : index
    %103 = memref.load %arg2[%c20] : memref<100xf32, #tpu.memory_space<smem>>
    %104 = vector.broadcast %103 : f32 to vector<40x128xf32>
    %105 = arith.mulf %104, %102 : vector<40x128xf32>
    %c21 = arith.constant 21 : index
    %106 = memref.load %arg2[%c21] : memref<100xf32, #tpu.memory_space<smem>>
    %c1_i32_28 = arith.constant 1 : i32
    %107 = tpu.dynamic_rotate %102 by %c1_i32_28 dim 1 : vector<40x128xf32>, i32 -> vector<40x128xf32>
    %108 = vector.broadcast %106 : f32 to vector<40x128xf32>
    %109 = arith.mulf %108, %107 : vector<40x128xf32>
    %110 = arith.addf %105, %109 : vector<40x128xf32>
    %c22 = arith.constant 22 : index
    %111 = memref.load %arg2[%c22] : memref<100xf32, #tpu.memory_space<smem>>
    %c2_i32_29 = arith.constant 2 : i32
    %112 = tpu.dynamic_rotate %102 by %c2_i32_29 dim 1 : vector<40x128xf32>, i32 -> vector<40x128xf32>
    %113 = vector.broadcast %111 : f32 to vector<40x128xf32>
    %114 = arith.mulf %113, %112 : vector<40x128xf32>
    %115 = arith.addf %110, %114 : vector<40x128xf32>
    %c23 = arith.constant 23 : index
    %116 = memref.load %arg2[%c23] : memref<100xf32, #tpu.memory_space<smem>>
    %c3_i32_30 = arith.constant 3 : i32
    %117 = tpu.dynamic_rotate %102 by %c3_i32_30 dim 1 : vector<40x128xf32>, i32 -> vector<40x128xf32>
    %118 = vector.broadcast %116 : f32 to vector<40x128xf32>
    %119 = arith.mulf %118, %117 : vector<40x128xf32>
    %120 = arith.addf %115, %119 : vector<40x128xf32>
    %c24 = arith.constant 24 : index
    %121 = memref.load %arg2[%c24] : memref<100xf32, #tpu.memory_space<smem>>
    %c4_i32_31 = arith.constant 4 : i32
    %122 = tpu.dynamic_rotate %102 by %c4_i32_31 dim 1 : vector<40x128xf32>, i32 -> vector<40x128xf32>
    %123 = vector.broadcast %121 : f32 to vector<40x128xf32>
    %124 = arith.mulf %123, %122 : vector<40x128xf32>
    %125 = arith.addf %120, %124 : vector<40x128xf32>
    %126 = arith.addf %29, %53 : vector<40x128xf32>
    %127 = arith.addf %77, %101 : vector<40x128xf32>
    %128 = arith.addf %126, %127 : vector<40x128xf32>
    %129 = arith.addf %128, %125 : vector<40x128xf32>
    %c4_i32_32 = arith.constant 4 : i32
    %130 = vector.broadcast %c4_i32_32 : i32 to vector<40x128xi32>
    %131 = arith.cmpi sge, %2, %130 : vector<40x128xi32>
    %c24_i32 = arith.constant 24 : i32
    %132 = vector.broadcast %c24_i32 : i32 to vector<40x128xi32>
    %133 = arith.cmpi slt, %2, %132 : vector<40x128xi32>
    %134 = arith.andi %131, %133 : vector<40x128xi1>
    %c4_i32_33 = arith.constant 4 : i32
    %135 = vector.broadcast %c4_i32_33 : i32 to vector<40x128xi32>
    %136 = arith.cmpi sge, %3, %135 : vector<40x128xi32>
    %c24_i32_34 = arith.constant 24 : i32
    %137 = vector.broadcast %c24_i32_34 : i32 to vector<40x128xi32>
    %138 = arith.cmpi slt, %3, %137 : vector<40x128xi32>
    %139 = arith.andi %136, %138 : vector<40x128xi1>
    %c40_i32 = arith.constant 40 : i32
    %140 = vector.broadcast %c40_i32 : i32 to vector<40x128xi32>
    %141 = arith.cmpi sge, %3, %140 : vector<40x128xi32>
    %c60_i32 = arith.constant 60 : i32
    %142 = vector.broadcast %c60_i32 : i32 to vector<40x128xi32>
    %143 = arith.cmpi slt, %3, %142 : vector<40x128xi32>
    %144 = arith.andi %141, %143 : vector<40x128xi1>
    %145 = arith.ori %139, %144 : vector<40x128xi1>
    %146 = arith.andi %134, %145 : vector<40x128xi1>
    %c0_35 = arith.constant 0 : index
    %147 = memref.load %arg3[%c0_35] : memref<4xf32, #tpu.memory_space<smem>>
    %cst_36 = arith.constant 0.000000e+00 : f32
    %148 = vector.broadcast %147 : f32 to vector<40x128xf32>
    %149 = vector.broadcast %cst_36 : f32 to vector<40x128xf32>
    %150 = arith.select %146, %148, %149 : vector<40x128xi1>, vector<40x128xf32>
    %151 = arith.addf %129, %150 : vector<40x128xf32>
    %c4_37 = arith.constant 4 : index
    %c0_38 = arith.constant 0 : index
    %152 = vector.load %arg5[%c4_37, %c0_38] : memref<48x128xf32, #tpu.memory_space<vmem>>, vector<40x128xf32>
    tpu.vector_store %arg5[%c4_37, %c0_38], %151 {strides = array<i32>} : memref<48x128xf32, #tpu.memory_space<vmem>>, vector<40x128xf32>,
    %c4_39 = arith.constant 4 : index
    %c0_40 = arith.constant 0 : index
    %153 = vector.load %arg5[%c4_39, %c0_40] : memref<48x128xf32, #tpu.memory_space<vmem>>, vector<40x128xf32>
    %c25 = arith.constant 25 : index
    %154 = memref.load %arg2[%c25] : memref<100xf32, #tpu.memory_space<smem>>
    %155 = vector.broadcast %154 : f32 to vector<40x128xf32>
    %156 = arith.mulf %155, %153 : vector<40x128xf32>
    %c26 = arith.constant 26 : index
    %157 = memref.load %arg2[%c26] : memref<100xf32, #tpu.memory_space<smem>>
    %c1_i32_41 = arith.constant 1 : i32
    %158 = tpu.dynamic_rotate %153 by %c1_i32_41 dim 1 : vector<40x128xf32>, i32 -> vector<40x128xf32>
    %159 = vector.broadcast %157 : f32 to vector<40x128xf32>
    %160 = arith.mulf %159, %158 : vector<40x128xf32>
    %161 = arith.addf %156, %160 : vector<40x128xf32>
    %c27 = arith.constant 27 : index
    %162 = memref.load %arg2[%c27] : memref<100xf32, #tpu.memory_space<smem>>
    %c2_i32_42 = arith.constant 2 : i32
    %163 = tpu.dynamic_rotate %153 by %c2_i32_42 dim 1 : vector<40x128xf32>, i32 -> vector<40x128xf32>
    %164 = vector.broadcast %162 : f32 to vector<40x128xf32>
    %165 = arith.mulf %164, %163 : vector<40x128xf32>
    %166 = arith.addf %161, %165 : vector<40x128xf32>
    %c28 = arith.constant 28 : index
    %167 = memref.load %arg2[%c28] : memref<100xf32, #tpu.memory_space<smem>>
    %c3_i32_43 = arith.constant 3 : i32
    %168 = tpu.dynamic_rotate %153 by %c3_i32_43 dim 1 : vector<40x128xf32>, i32 -> vector<40x128xf32>
    %169 = vector.broadcast %167 : f32 to vector<40x128xf32>
    %170 = arith.mulf %169, %168 : vector<40x128xf32>
    %171 = arith.addf %166, %170 : vector<40x128xf32>
    %c29 = arith.constant 29 : index
    %172 = memref.load %arg2[%c29] : memref<100xf32, #tpu.memory_space<smem>>
    %c4_i32_44 = arith.constant 4 : i32
    %173 = tpu.dynamic_rotate %153 by %c4_i32_44 dim 1 : vector<40x128xf32>, i32 -> vector<40x128xf32>
    %174 = vector.broadcast %172 : f32 to vector<40x128xf32>
    %175 = arith.mulf %174, %173 : vector<40x128xf32>
    %176 = arith.addf %171, %175 : vector<40x128xf32>
    %c3_45 = arith.constant 3 : index
    %c0_46 = arith.constant 0 : index
    %177 = vector.load %arg5[%c3_45, %c0_46] : memref<48x128xf32, #tpu.memory_space<vmem>>, vector<40x128xf32>
    %c30 = arith.constant 30 : index
    %178 = memref.load %arg2[%c30] : memref<100xf32, #tpu.memory_space<smem>>
    %179 = vector.broadcast %178 : f32 to vector<40x128xf32>
    %180 = arith.mulf %179, %177 : vector<40x128xf32>
    %c31 = arith.constant 31 : index
    %181 = memref.load %arg2[%c31] : memref<100xf32, #tpu.memory_space<smem>>
    %c1_i32_47 = arith.constant 1 : i32
    %182 = tpu.dynamic_rotate %177 by %c1_i32_47 dim 1 : vector<40x128xf32>, i32 -> vector<40x128xf32>
    %183 = vector.broadcast %181 : f32 to vector<40x128xf32>
    %184 = arith.mulf %183, %182 : vector<40x128xf32>
    %185 = arith.addf %180, %184 : vector<40x128xf32>
    %c32 = arith.constant 32 : index
    %186 = memref.load %arg2[%c32] : memref<100xf32, #tpu.memory_space<smem>>
    %c2_i32_48 = arith.constant 2 : i32
    %187 = tpu.dynamic_rotate %177 by %c2_i32_48 dim 1 : vector<40x128xf32>, i32 -> vector<40x128xf32>
    %188 = vector.broadcast %186 : f32 to vector<40x128xf32>
    %189 = arith.mulf %188, %187 : vector<40x128xf32>
    %190 = arith.addf %185, %189 : vector<40x128xf32>
    %c33 = arith.constant 33 : index
    %191 = memref.load %arg2[%c33] : memref<100xf32, #tpu.memory_space<smem>>
    %c3_i32_49 = arith.constant 3 : i32
    %192 = tpu.dynamic_rotate %177 by %c3_i32_49 dim 1 : vector<40x128xf32>, i32 -> vector<40x128xf32>
    %193 = vector.broadcast %191 : f32 to vector<40x128xf32>
    %194 = arith.mulf %193, %192 : vector<40x128xf32>
    %195 = arith.addf %190, %194 : vector<40x128xf32>
    %c34 = arith.constant 34 : index
    %196 = memref.load %arg2[%c34] : memref<100xf32, #tpu.memory_space<smem>>
    %c4_i32_50 = arith.constant 4 : i32
    %197 = tpu.dynamic_rotate %177 by %c4_i32_50 dim 1 : vector<40x128xf32>, i32 -> vector<40x128xf32>
    %198 = vector.broadcast %196 : f32 to vector<40x128xf32>
    %199 = arith.mulf %198, %197 : vector<40x128xf32>
    %200 = arith.addf %195, %199 : vector<40x128xf32>
    %c2_51 = arith.constant 2 : index
    %c0_52 = arith.constant 0 : index
    %201 = vector.load %arg5[%c2_51, %c0_52] : memref<48x128xf32, #tpu.memory_space<vmem>>, vector<40x128xf32>
    %c35 = arith.constant 35 : index
    %202 = memref.load %arg2[%c35] : memref<100xf32, #tpu.memory_space<smem>>
    %203 = vector.broadcast %202 : f32 to vector<40x128xf32>
    %204 = arith.mulf %203, %201 : vector<40x128xf32>
    %c36 = arith.constant 36 : index
    %205 = memref.load %arg2[%c36] : memref<100xf32, #tpu.memory_space<smem>>
    %c1_i32_53 = arith.constant 1 : i32
    %206 = tpu.dynamic_rotate %201 by %c1_i32_53 dim 1 : vector<40x128xf32>, i32 -> vector<40x128xf32>
    %207 = vector.broadcast %205 : f32 to vector<40x128xf32>
    %208 = arith.mulf %207, %206 : vector<40x128xf32>
    %209 = arith.addf %204, %208 : vector<40x128xf32>
    %c37 = arith.constant 37 : index
    %210 = memref.load %arg2[%c37] : memref<100xf32, #tpu.memory_space<smem>>
    %c2_i32_54 = arith.constant 2 : i32
    %211 = tpu.dynamic_rotate %201 by %c2_i32_54 dim 1 : vector<40x128xf32>, i32 -> vector<40x128xf32>
    %212 = vector.broadcast %210 : f32 to vector<40x128xf32>
    %213 = arith.mulf %212, %211 : vector<40x128xf32>
    %214 = arith.addf %209, %213 : vector<40x128xf32>
    %c38 = arith.constant 38 : index
    %215 = memref.load %arg2[%c38] : memref<100xf32, #tpu.memory_space<smem>>
    %c3_i32_55 = arith.constant 3 : i32
    %216 = tpu.dynamic_rotate %201 by %c3_i32_55 dim 1 : vector<40x128xf32>, i32 -> vector<40x128xf32>
    %217 = vector.broadcast %215 : f32 to vector<40x128xf32>
    %218 = arith.mulf %217, %216 : vector<40x128xf32>
    %219 = arith.addf %214, %218 : vector<40x128xf32>
    %c39 = arith.constant 39 : index
    %220 = memref.load %arg2[%c39] : memref<100xf32, #tpu.memory_space<smem>>
    %c4_i32_56 = arith.constant 4 : i32
    %221 = tpu.dynamic_rotate %201 by %c4_i32_56 dim 1 : vector<40x128xf32>, i32 -> vector<40x128xf32>
    %222 = vector.broadcast %220 : f32 to vector<40x128xf32>
    %223 = arith.mulf %222, %221 : vector<40x128xf32>
    %224 = arith.addf %219, %223 : vector<40x128xf32>
    %c1_57 = arith.constant 1 : index
    %c0_58 = arith.constant 0 : index
    %225 = vector.load %arg5[%c1_57, %c0_58] : memref<48x128xf32, #tpu.memory_space<vmem>>, vector<40x128xf32>
    %c40 = arith.constant 40 : index
    %226 = memref.load %arg2[%c40] : memref<100xf32, #tpu.memory_space<smem>>
    %227 = vector.broadcast %226 : f32 to vector<40x128xf32>
    %228 = arith.mulf %227, %225 : vector<40x128xf32>
    %c41 = arith.constant 41 : index
    %229 = memref.load %arg2[%c41] : memref<100xf32, #tpu.memory_space<smem>>
    %c1_i32_59 = arith.constant 1 : i32
    %230 = tpu.dynamic_rotate %225 by %c1_i32_59 dim 1 : vector<40x128xf32>, i32 -> vector<40x128xf32>
    %231 = vector.broadcast %229 : f32 to vector<40x128xf32>
    %232 = arith.mulf %231, %230 : vector<40x128xf32>
    %233 = arith.addf %228, %232 : vector<40x128xf32>
    %c42 = arith.constant 42 : index
    %234 = memref.load %arg2[%c42] : memref<100xf32, #tpu.memory_space<smem>>
    %c2_i32_60 = arith.constant 2 : i32
    %235 = tpu.dynamic_rotate %225 by %c2_i32_60 dim 1 : vector<40x128xf32>, i32 -> vector<40x128xf32>
    %236 = vector.broadcast %234 : f32 to vector<40x128xf32>
    %237 = arith.mulf %236, %235 : vector<40x128xf32>
    %238 = arith.addf %233, %237 : vector<40x128xf32>
    %c43 = arith.constant 43 : index
    %239 = memref.load %arg2[%c43] : memref<100xf32, #tpu.memory_space<smem>>
    %c3_i32_61 = arith.constant 3 : i32
    %240 = tpu.dynamic_rotate %225 by %c3_i32_61 dim 1 : vector<40x128xf32>, i32 -> vector<40x128xf32>
    %241 = vector.broadcast %239 : f32 to vector<40x128xf32>
    %242 = arith.mulf %241, %240 : vector<40x128xf32>
    %243 = arith.addf %238, %242 : vector<40x128xf32>
    %c44 = arith.constant 44 : index
    %244 = memref.load %arg2[%c44] : memref<100xf32, #tpu.memory_space<smem>>
    %c4_i32_62 = arith.constant 4 : i32
    %245 = tpu.dynamic_rotate %225 by %c4_i32_62 dim 1 : vector<40x128xf32>, i32 -> vector<40x128xf32>
    %246 = vector.broadcast %244 : f32 to vector<40x128xf32>
    %247 = arith.mulf %246, %245 : vector<40x128xf32>
    %248 = arith.addf %243, %247 : vector<40x128xf32>
    %c0_63 = arith.constant 0 : index
    %c0_64 = arith.constant 0 : index
    %249 = vector.load %arg5[%c0_63, %c0_64] : memref<48x128xf32, #tpu.memory_space<vmem>>, vector<40x128xf32>
    %c45 = arith.constant 45 : index
    %250 = memref.load %arg2[%c45] : memref<100xf32, #tpu.memory_space<smem>>
    %251 = vector.broadcast %250 : f32 to vector<40x128xf32>
    %252 = arith.mulf %251, %249 : vector<40x128xf32>
    %c46 = arith.constant 46 : index
    %253 = memref.load %arg2[%c46] : memref<100xf32, #tpu.memory_space<smem>>
    %c1_i32_65 = arith.constant 1 : i32
    %254 = tpu.dynamic_rotate %249 by %c1_i32_65 dim 1 : vector<40x128xf32>, i32 -> vector<40x128xf32>
    %255 = vector.broadcast %253 : f32 to vector<40x128xf32>
    %256 = arith.mulf %255, %254 : vector<40x128xf32>
    %257 = arith.addf %252, %256 : vector<40x128xf32>
    %c47 = arith.constant 47 : index
    %258 = memref.load %arg2[%c47] : memref<100xf32, #tpu.memory_space<smem>>
    %c2_i32_66 = arith.constant 2 : i32
    %259 = tpu.dynamic_rotate %249 by %c2_i32_66 dim 1 : vector<40x128xf32>, i32 -> vector<40x128xf32>
    %260 = vector.broadcast %258 : f32 to vector<40x128xf32>
    %261 = arith.mulf %260, %259 : vector<40x128xf32>
    %262 = arith.addf %257, %261 : vector<40x128xf32>
    %c48 = arith.constant 48 : index
    %263 = memref.load %arg2[%c48] : memref<100xf32, #tpu.memory_space<smem>>
    %c3_i32_67 = arith.constant 3 : i32
    %264 = tpu.dynamic_rotate %249 by %c3_i32_67 dim 1 : vector<40x128xf32>, i32 -> vector<40x128xf32>
    %265 = vector.broadcast %263 : f32 to vector<40x128xf32>
    %266 = arith.mulf %265, %264 : vector<40x128xf32>
    %267 = arith.addf %262, %266 : vector<40x128xf32>
    %c49 = arith.constant 49 : index
    %268 = memref.load %arg2[%c49] : memref<100xf32, #tpu.memory_space<smem>>
    %c4_i32_68 = arith.constant 4 : i32
    %269 = tpu.dynamic_rotate %249 by %c4_i32_68 dim 1 : vector<40x128xf32>, i32 -> vector<40x128xf32>
    %270 = vector.broadcast %268 : f32 to vector<40x128xf32>
    %271 = arith.mulf %270, %269 : vector<40x128xf32>
    %272 = arith.addf %267, %271 : vector<40x128xf32>
    %273 = arith.addf %176, %200 : vector<40x128xf32>
    %274 = arith.addf %224, %248 : vector<40x128xf32>
    %275 = arith.addf %273, %274 : vector<40x128xf32>
    %276 = arith.addf %275, %272 : vector<40x128xf32>
    %c4_i32_69 = arith.constant 4 : i32
    %277 = vector.broadcast %c4_i32_69 : i32 to vector<40x128xi32>
    %278 = arith.cmpi sge, %2, %277 : vector<40x128xi32>
    %c28_i32 = arith.constant 28 : i32
    %279 = vector.broadcast %c28_i32 : i32 to vector<40x128xi32>
    %280 = arith.cmpi slt, %2, %279 : vector<40x128xi32>
    %281 = arith.andi %278, %280 : vector<40x128xi1>
    %c4_i32_70 = arith.constant 4 : i32
    %282 = vector.broadcast %c4_i32_70 : i32 to vector<40x128xi32>
    %283 = arith.cmpi sge, %3, %282 : vector<40x128xi32>
    %c28_i32_71 = arith.constant 28 : i32
    %284 = vector.broadcast %c28_i32_71 : i32 to vector<40x128xi32>
    %285 = arith.cmpi slt, %3, %284 : vector<40x128xi32>
    %286 = arith.andi %283, %285 : vector<40x128xi1>
    %c40_i32_72 = arith.constant 40 : i32
    %287 = vector.broadcast %c40_i32_72 : i32 to vector<40x128xi32>
    %288 = arith.cmpi sge, %3, %287 : vector<40x128xi32>
    %c64_i32 = arith.constant 64 : i32
    %289 = vector.broadcast %c64_i32 : i32 to vector<40x128xi32>
    %290 = arith.cmpi slt, %3, %289 : vector<40x128xi32>
    %291 = arith.andi %288, %290 : vector<40x128xi1>
    %292 = arith.ori %286, %291 : vector<40x128xi1>
    %293 = arith.andi %281, %292 : vector<40x128xi1>
    %c1_73 = arith.constant 1 : index
    %294 = memref.load %arg3[%c1_73] : memref<4xf32, #tpu.memory_space<smem>>
    %cst_74 = arith.constant 0.000000e+00 : f32
    %295 = vector.broadcast %294 : f32 to vector<40x128xf32>
    %296 = vector.broadcast %cst_74 : f32 to vector<40x128xf32>
    %297 = arith.select %293, %295, %296 : vector<40x128xi1>, vector<40x128xf32>
    %298 = arith.addf %276, %297 : vector<40x128xf32>
    %c4_75 = arith.constant 4 : index
    %c0_76 = arith.constant 0 : index
    %299 = vector.load %arg5[%c4_75, %c0_76] : memref<48x128xf32, #tpu.memory_space<vmem>>, vector<40x128xf32>
    tpu.vector_store %arg5[%c4_75, %c0_76], %298 {strides = array<i32>} : memref<48x128xf32, #tpu.memory_space<vmem>>, vector<40x128xf32>,
    %c4_77 = arith.constant 4 : index
    %c0_78 = arith.constant 0 : index
    %300 = vector.load %arg5[%c4_77, %c0_78] : memref<48x128xf32, #tpu.memory_space<vmem>>, vector<40x128xf32>
    %c50 = arith.constant 50 : index
    %301 = memref.load %arg2[%c50] : memref<100xf32, #tpu.memory_space<smem>>
    %302 = vector.broadcast %301 : f32 to vector<40x128xf32>
    %303 = arith.mulf %302, %300 : vector<40x128xf32>
    %c51 = arith.constant 51 : index
    %304 = memref.load %arg2[%c51] : memref<100xf32, #tpu.memory_space<smem>>
    %c1_i32_79 = arith.constant 1 : i32
    %305 = tpu.dynamic_rotate %300 by %c1_i32_79 dim 1 : vector<40x128xf32>, i32 -> vector<40x128xf32>
    %306 = vector.broadcast %304 : f32 to vector<40x128xf32>
    %307 = arith.mulf %306, %305 : vector<40x128xf32>
    %308 = arith.addf %303, %307 : vector<40x128xf32>
    %c52 = arith.constant 52 : index
    %309 = memref.load %arg2[%c52] : memref<100xf32, #tpu.memory_space<smem>>
    %c2_i32_80 = arith.constant 2 : i32
    %310 = tpu.dynamic_rotate %300 by %c2_i32_80 dim 1 : vector<40x128xf32>, i32 -> vector<40x128xf32>
    %311 = vector.broadcast %309 : f32 to vector<40x128xf32>
    %312 = arith.mulf %311, %310 : vector<40x128xf32>
    %313 = arith.addf %308, %312 : vector<40x128xf32>
    %c53 = arith.constant 53 : index
    %314 = memref.load %arg2[%c53] : memref<100xf32, #tpu.memory_space<smem>>
    %c3_i32_81 = arith.constant 3 : i32
    %315 = tpu.dynamic_rotate %300 by %c3_i32_81 dim 1 : vector<40x128xf32>, i32 -> vector<40x128xf32>
    %316 = vector.broadcast %314 : f32 to vector<40x128xf32>
    %317 = arith.mulf %316, %315 : vector<40x128xf32>
    %318 = arith.addf %313, %317 : vector<40x128xf32>
    %c54 = arith.constant 54 : index
    %319 = memref.load %arg2[%c54] : memref<100xf32, #tpu.memory_space<smem>>
    %c4_i32_82 = arith.constant 4 : i32
    %320 = tpu.dynamic_rotate %300 by %c4_i32_82 dim 1 : vector<40x128xf32>, i32 -> vector<40x128xf32>
    %321 = vector.broadcast %319 : f32 to vector<40x128xf32>
    %322 = arith.mulf %321, %320 : vector<40x128xf32>
    %323 = arith.addf %318, %322 : vector<40x128xf32>
    %c3_83 = arith.constant 3 : index
    %c0_84 = arith.constant 0 : index
    %324 = vector.load %arg5[%c3_83, %c0_84] : memref<48x128xf32, #tpu.memory_space<vmem>>, vector<40x128xf32>
    %c55 = arith.constant 55 : index
    %325 = memref.load %arg2[%c55] : memref<100xf32, #tpu.memory_space<smem>>
    %326 = vector.broadcast %325 : f32 to vector<40x128xf32>
    %327 = arith.mulf %326, %324 : vector<40x128xf32>
    %c56 = arith.constant 56 : index
    %328 = memref.load %arg2[%c56] : memref<100xf32, #tpu.memory_space<smem>>
    %c1_i32_85 = arith.constant 1 : i32
    %329 = tpu.dynamic_rotate %324 by %c1_i32_85 dim 1 : vector<40x128xf32>, i32 -> vector<40x128xf32>
    %330 = vector.broadcast %328 : f32 to vector<40x128xf32>
    %331 = arith.mulf %330, %329 : vector<40x128xf32>
    %332 = arith.addf %327, %331 : vector<40x128xf32>
    %c57 = arith.constant 57 : index
    %333 = memref.load %arg2[%c57] : memref<100xf32, #tpu.memory_space<smem>>
    %c2_i32_86 = arith.constant 2 : i32
    %334 = tpu.dynamic_rotate %324 by %c2_i32_86 dim 1 : vector<40x128xf32>, i32 -> vector<40x128xf32>
    %335 = vector.broadcast %333 : f32 to vector<40x128xf32>
    %336 = arith.mulf %335, %334 : vector<40x128xf32>
    %337 = arith.addf %332, %336 : vector<40x128xf32>
    %c58 = arith.constant 58 : index
    %338 = memref.load %arg2[%c58] : memref<100xf32, #tpu.memory_space<smem>>
    %c3_i32_87 = arith.constant 3 : i32
    %339 = tpu.dynamic_rotate %324 by %c3_i32_87 dim 1 : vector<40x128xf32>, i32 -> vector<40x128xf32>
    %340 = vector.broadcast %338 : f32 to vector<40x128xf32>
    %341 = arith.mulf %340, %339 : vector<40x128xf32>
    %342 = arith.addf %337, %341 : vector<40x128xf32>
    %c59 = arith.constant 59 : index
    %343 = memref.load %arg2[%c59] : memref<100xf32, #tpu.memory_space<smem>>
    %c4_i32_88 = arith.constant 4 : i32
    %344 = tpu.dynamic_rotate %324 by %c4_i32_88 dim 1 : vector<40x128xf32>, i32 -> vector<40x128xf32>
    %345 = vector.broadcast %343 : f32 to vector<40x128xf32>
    %346 = arith.mulf %345, %344 : vector<40x128xf32>
    %347 = arith.addf %342, %346 : vector<40x128xf32>
    %c2_89 = arith.constant 2 : index
    %c0_90 = arith.constant 0 : index
    %348 = vector.load %arg5[%c2_89, %c0_90] : memref<48x128xf32, #tpu.memory_space<vmem>>, vector<40x128xf32>
    %c60 = arith.constant 60 : index
    %349 = memref.load %arg2[%c60] : memref<100xf32, #tpu.memory_space<smem>>
    %350 = vector.broadcast %349 : f32 to vector<40x128xf32>
    %351 = arith.mulf %350, %348 : vector<40x128xf32>
    %c61 = arith.constant 61 : index
    %352 = memref.load %arg2[%c61] : memref<100xf32, #tpu.memory_space<smem>>
    %c1_i32_91 = arith.constant 1 : i32
    %353 = tpu.dynamic_rotate %348 by %c1_i32_91 dim 1 : vector<40x128xf32>, i32 -> vector<40x128xf32>
    %354 = vector.broadcast %352 : f32 to vector<40x128xf32>
    %355 = arith.mulf %354, %353 : vector<40x128xf32>
    %356 = arith.addf %351, %355 : vector<40x128xf32>
    %c62 = arith.constant 62 : index
    %357 = memref.load %arg2[%c62] : memref<100xf32, #tpu.memory_space<smem>>
    %c2_i32_92 = arith.constant 2 : i32
    %358 = tpu.dynamic_rotate %348 by %c2_i32_92 dim 1 : vector<40x128xf32>, i32 -> vector<40x128xf32>
    %359 = vector.broadcast %357 : f32 to vector<40x128xf32>
    %360 = arith.mulf %359, %358 : vector<40x128xf32>
    %361 = arith.addf %356, %360 : vector<40x128xf32>
    %c63 = arith.constant 63 : index
    %362 = memref.load %arg2[%c63] : memref<100xf32, #tpu.memory_space<smem>>
    %c3_i32_93 = arith.constant 3 : i32
    %363 = tpu.dynamic_rotate %348 by %c3_i32_93 dim 1 : vector<40x128xf32>, i32 -> vector<40x128xf32>
    %364 = vector.broadcast %362 : f32 to vector<40x128xf32>
    %365 = arith.mulf %364, %363 : vector<40x128xf32>
    %366 = arith.addf %361, %365 : vector<40x128xf32>
    %c64 = arith.constant 64 : index
    %367 = memref.load %arg2[%c64] : memref<100xf32, #tpu.memory_space<smem>>
    %c4_i32_94 = arith.constant 4 : i32
    %368 = tpu.dynamic_rotate %348 by %c4_i32_94 dim 1 : vector<40x128xf32>, i32 -> vector<40x128xf32>
    %369 = vector.broadcast %367 : f32 to vector<40x128xf32>
    %370 = arith.mulf %369, %368 : vector<40x128xf32>
    %371 = arith.addf %366, %370 : vector<40x128xf32>
    %c1_95 = arith.constant 1 : index
    %c0_96 = arith.constant 0 : index
    %372 = vector.load %arg5[%c1_95, %c0_96] : memref<48x128xf32, #tpu.memory_space<vmem>>, vector<40x128xf32>
    %c65 = arith.constant 65 : index
    %373 = memref.load %arg2[%c65] : memref<100xf32, #tpu.memory_space<smem>>
    %374 = vector.broadcast %373 : f32 to vector<40x128xf32>
    %375 = arith.mulf %374, %372 : vector<40x128xf32>
    %c66 = arith.constant 66 : index
    %376 = memref.load %arg2[%c66] : memref<100xf32, #tpu.memory_space<smem>>
    %c1_i32_97 = arith.constant 1 : i32
    %377 = tpu.dynamic_rotate %372 by %c1_i32_97 dim 1 : vector<40x128xf32>, i32 -> vector<40x128xf32>
    %378 = vector.broadcast %376 : f32 to vector<40x128xf32>
    %379 = arith.mulf %378, %377 : vector<40x128xf32>
    %380 = arith.addf %375, %379 : vector<40x128xf32>
    %c67 = arith.constant 67 : index
    %381 = memref.load %arg2[%c67] : memref<100xf32, #tpu.memory_space<smem>>
    %c2_i32_98 = arith.constant 2 : i32
    %382 = tpu.dynamic_rotate %372 by %c2_i32_98 dim 1 : vector<40x128xf32>, i32 -> vector<40x128xf32>
    %383 = vector.broadcast %381 : f32 to vector<40x128xf32>
    %384 = arith.mulf %383, %382 : vector<40x128xf32>
    %385 = arith.addf %380, %384 : vector<40x128xf32>
    %c68 = arith.constant 68 : index
    %386 = memref.load %arg2[%c68] : memref<100xf32, #tpu.memory_space<smem>>
    %c3_i32_99 = arith.constant 3 : i32
    %387 = tpu.dynamic_rotate %372 by %c3_i32_99 dim 1 : vector<40x128xf32>, i32 -> vector<40x128xf32>
    %388 = vector.broadcast %386 : f32 to vector<40x128xf32>
    %389 = arith.mulf %388, %387 : vector<40x128xf32>
    %390 = arith.addf %385, %389 : vector<40x128xf32>
    %c69 = arith.constant 69 : index
    %391 = memref.load %arg2[%c69] : memref<100xf32, #tpu.memory_space<smem>>
    %c4_i32_100 = arith.constant 4 : i32
    %392 = tpu.dynamic_rotate %372 by %c4_i32_100 dim 1 : vector<40x128xf32>, i32 -> vector<40x128xf32>
    %393 = vector.broadcast %391 : f32 to vector<40x128xf32>
    %394 = arith.mulf %393, %392 : vector<40x128xf32>
    %395 = arith.addf %390, %394 : vector<40x128xf32>
    %c0_101 = arith.constant 0 : index
    %c0_102 = arith.constant 0 : index
    %396 = vector.load %arg5[%c0_101, %c0_102] : memref<48x128xf32, #tpu.memory_space<vmem>>, vector<40x128xf32>
    %c70 = arith.constant 70 : index
    %397 = memref.load %arg2[%c70] : memref<100xf32, #tpu.memory_space<smem>>
    %398 = vector.broadcast %397 : f32 to vector<40x128xf32>
    %399 = arith.mulf %398, %396 : vector<40x128xf32>
    %c71 = arith.constant 71 : index
    %400 = memref.load %arg2[%c71] : memref<100xf32, #tpu.memory_space<smem>>
    %c1_i32_103 = arith.constant 1 : i32
    %401 = tpu.dynamic_rotate %396 by %c1_i32_103 dim 1 : vector<40x128xf32>, i32 -> vector<40x128xf32>
    %402 = vector.broadcast %400 : f32 to vector<40x128xf32>
    %403 = arith.mulf %402, %401 : vector<40x128xf32>
    %404 = arith.addf %399, %403 : vector<40x128xf32>
    %c72 = arith.constant 72 : index
    %405 = memref.load %arg2[%c72] : memref<100xf32, #tpu.memory_space<smem>>
    %c2_i32_104 = arith.constant 2 : i32
    %406 = tpu.dynamic_rotate %396 by %c2_i32_104 dim 1 : vector<40x128xf32>, i32 -> vector<40x128xf32>
    %407 = vector.broadcast %405 : f32 to vector<40x128xf32>
    %408 = arith.mulf %407, %406 : vector<40x128xf32>
    %409 = arith.addf %404, %408 : vector<40x128xf32>
    %c73 = arith.constant 73 : index
    %410 = memref.load %arg2[%c73] : memref<100xf32, #tpu.memory_space<smem>>
    %c3_i32_105 = arith.constant 3 : i32
    %411 = tpu.dynamic_rotate %396 by %c3_i32_105 dim 1 : vector<40x128xf32>, i32 -> vector<40x128xf32>
    %412 = vector.broadcast %410 : f32 to vector<40x128xf32>
    %413 = arith.mulf %412, %411 : vector<40x128xf32>
    %414 = arith.addf %409, %413 : vector<40x128xf32>
    %c74 = arith.constant 74 : index
    %415 = memref.load %arg2[%c74] : memref<100xf32, #tpu.memory_space<smem>>
    %c4_i32_106 = arith.constant 4 : i32
    %416 = tpu.dynamic_rotate %396 by %c4_i32_106 dim 1 : vector<40x128xf32>, i32 -> vector<40x128xf32>
    %417 = vector.broadcast %415 : f32 to vector<40x128xf32>
    %418 = arith.mulf %417, %416 : vector<40x128xf32>
    %419 = arith.addf %414, %418 : vector<40x128xf32>
    %420 = arith.addf %323, %347 : vector<40x128xf32>
    %421 = arith.addf %371, %395 : vector<40x128xf32>
    %422 = arith.addf %420, %421 : vector<40x128xf32>
    %423 = arith.addf %422, %419 : vector<40x128xf32>
    %c4_i32_107 = arith.constant 4 : i32
    %424 = vector.broadcast %c4_i32_107 : i32 to vector<40x128xi32>
    %425 = arith.cmpi sge, %2, %424 : vector<40x128xi32>
    %c32_i32 = arith.constant 32 : i32
    %426 = vector.broadcast %c32_i32 : i32 to vector<40x128xi32>
    %427 = arith.cmpi slt, %2, %426 : vector<40x128xi32>
    %428 = arith.andi %425, %427 : vector<40x128xi1>
    %c4_i32_108 = arith.constant 4 : i32
    %429 = vector.broadcast %c4_i32_108 : i32 to vector<40x128xi32>
    %430 = arith.cmpi sge, %3, %429 : vector<40x128xi32>
    %c32_i32_109 = arith.constant 32 : i32
    %431 = vector.broadcast %c32_i32_109 : i32 to vector<40x128xi32>
    %432 = arith.cmpi slt, %3, %431 : vector<40x128xi32>
    %433 = arith.andi %430, %432 : vector<40x128xi1>
    %c40_i32_110 = arith.constant 40 : i32
    %434 = vector.broadcast %c40_i32_110 : i32 to vector<40x128xi32>
    %435 = arith.cmpi sge, %3, %434 : vector<40x128xi32>
    %c68_i32 = arith.constant 68 : i32
    %436 = vector.broadcast %c68_i32 : i32 to vector<40x128xi32>
    %437 = arith.cmpi slt, %3, %436 : vector<40x128xi32>
    %438 = arith.andi %435, %437 : vector<40x128xi1>
    %439 = arith.ori %433, %438 : vector<40x128xi1>
    %440 = arith.andi %428, %439 : vector<40x128xi1>
    %c2_111 = arith.constant 2 : index
    %441 = memref.load %arg3[%c2_111] : memref<4xf32, #tpu.memory_space<smem>>
    %cst_112 = arith.constant 0.000000e+00 : f32
    %442 = vector.broadcast %441 : f32 to vector<40x128xf32>
    %443 = vector.broadcast %cst_112 : f32 to vector<40x128xf32>
    %444 = arith.select %440, %442, %443 : vector<40x128xi1>, vector<40x128xf32>
    %445 = arith.addf %423, %444 : vector<40x128xf32>
    %c4_113 = arith.constant 4 : index
    %c0_114 = arith.constant 0 : index
    %446 = vector.load %arg5[%c4_113, %c0_114] : memref<48x128xf32, #tpu.memory_space<vmem>>, vector<40x128xf32>
    tpu.vector_store %arg5[%c4_113, %c0_114], %445 {strides = array<i32>} : memref<48x128xf32, #tpu.memory_space<vmem>>, vector<40x128xf32>,
    %c4_115 = arith.constant 4 : index
    %c0_116 = arith.constant 0 : index
    %447 = vector.load %arg5[%c4_115, %c0_116] : memref<48x128xf32, #tpu.memory_space<vmem>>, vector<40x128xf32>
    %c75 = arith.constant 75 : index
    %448 = memref.load %arg2[%c75] : memref<100xf32, #tpu.memory_space<smem>>
    %449 = vector.broadcast %448 : f32 to vector<40x128xf32>
    %450 = arith.mulf %449, %447 : vector<40x128xf32>
    %c76 = arith.constant 76 : index
    %451 = memref.load %arg2[%c76] : memref<100xf32, #tpu.memory_space<smem>>
    %c1_i32_117 = arith.constant 1 : i32
    %452 = tpu.dynamic_rotate %447 by %c1_i32_117 dim 1 : vector<40x128xf32>, i32 -> vector<40x128xf32>
    %453 = vector.broadcast %451 : f32 to vector<40x128xf32>
    %454 = arith.mulf %453, %452 : vector<40x128xf32>
    %455 = arith.addf %450, %454 : vector<40x128xf32>
    %c77 = arith.constant 77 : index
    %456 = memref.load %arg2[%c77] : memref<100xf32, #tpu.memory_space<smem>>
    %c2_i32_118 = arith.constant 2 : i32
    %457 = tpu.dynamic_rotate %447 by %c2_i32_118 dim 1 : vector<40x128xf32>, i32 -> vector<40x128xf32>
    %458 = vector.broadcast %456 : f32 to vector<40x128xf32>
    %459 = arith.mulf %458, %457 : vector<40x128xf32>
    %460 = arith.addf %455, %459 : vector<40x128xf32>
    %c78 = arith.constant 78 : index
    %461 = memref.load %arg2[%c78] : memref<100xf32, #tpu.memory_space<smem>>
    %c3_i32_119 = arith.constant 3 : i32
    %462 = tpu.dynamic_rotate %447 by %c3_i32_119 dim 1 : vector<40x128xf32>, i32 -> vector<40x128xf32>
    %463 = vector.broadcast %461 : f32 to vector<40x128xf32>
    %464 = arith.mulf %463, %462 : vector<40x128xf32>
    %465 = arith.addf %460, %464 : vector<40x128xf32>
    %c79 = arith.constant 79 : index
    %466 = memref.load %arg2[%c79] : memref<100xf32, #tpu.memory_space<smem>>
    %c4_i32_120 = arith.constant 4 : i32
    %467 = tpu.dynamic_rotate %447 by %c4_i32_120 dim 1 : vector<40x128xf32>, i32 -> vector<40x128xf32>
    %468 = vector.broadcast %466 : f32 to vector<40x128xf32>
    %469 = arith.mulf %468, %467 : vector<40x128xf32>
    %470 = arith.addf %465, %469 : vector<40x128xf32>
    %c3_121 = arith.constant 3 : index
    %c0_122 = arith.constant 0 : index
    %471 = vector.load %arg5[%c3_121, %c0_122] : memref<48x128xf32, #tpu.memory_space<vmem>>, vector<40x128xf32>
    %c80 = arith.constant 80 : index
    %472 = memref.load %arg2[%c80] : memref<100xf32, #tpu.memory_space<smem>>
    %473 = vector.broadcast %472 : f32 to vector<40x128xf32>
    %474 = arith.mulf %473, %471 : vector<40x128xf32>
    %c81 = arith.constant 81 : index
    %475 = memref.load %arg2[%c81] : memref<100xf32, #tpu.memory_space<smem>>
    %c1_i32_123 = arith.constant 1 : i32
    %476 = tpu.dynamic_rotate %471 by %c1_i32_123 dim 1 : vector<40x128xf32>, i32 -> vector<40x128xf32>
    %477 = vector.broadcast %475 : f32 to vector<40x128xf32>
    %478 = arith.mulf %477, %476 : vector<40x128xf32>
    %479 = arith.addf %474, %478 : vector<40x128xf32>
    %c82 = arith.constant 82 : index
    %480 = memref.load %arg2[%c82] : memref<100xf32, #tpu.memory_space<smem>>
    %c2_i32_124 = arith.constant 2 : i32
    %481 = tpu.dynamic_rotate %471 by %c2_i32_124 dim 1 : vector<40x128xf32>, i32 -> vector<40x128xf32>
    %482 = vector.broadcast %480 : f32 to vector<40x128xf32>
    %483 = arith.mulf %482, %481 : vector<40x128xf32>
    %484 = arith.addf %479, %483 : vector<40x128xf32>
    %c83 = arith.constant 83 : index
    %485 = memref.load %arg2[%c83] : memref<100xf32, #tpu.memory_space<smem>>
    %c3_i32_125 = arith.constant 3 : i32
    %486 = tpu.dynamic_rotate %471 by %c3_i32_125 dim 1 : vector<40x128xf32>, i32 -> vector<40x128xf32>
    %487 = vector.broadcast %485 : f32 to vector<40x128xf32>
    %488 = arith.mulf %487, %486 : vector<40x128xf32>
    %489 = arith.addf %484, %488 : vector<40x128xf32>
    %c84 = arith.constant 84 : index
    %490 = memref.load %arg2[%c84] : memref<100xf32, #tpu.memory_space<smem>>
    %c4_i32_126 = arith.constant 4 : i32
    %491 = tpu.dynamic_rotate %471 by %c4_i32_126 dim 1 : vector<40x128xf32>, i32 -> vector<40x128xf32>
    %492 = vector.broadcast %490 : f32 to vector<40x128xf32>
    %493 = arith.mulf %492, %491 : vector<40x128xf32>
    %494 = arith.addf %489, %493 : vector<40x128xf32>
    %c2_127 = arith.constant 2 : index
    %c0_128 = arith.constant 0 : index
    %495 = vector.load %arg5[%c2_127, %c0_128] : memref<48x128xf32, #tpu.memory_space<vmem>>, vector<40x128xf32>
    %c85 = arith.constant 85 : index
    %496 = memref.load %arg2[%c85] : memref<100xf32, #tpu.memory_space<smem>>
    %497 = vector.broadcast %496 : f32 to vector<40x128xf32>
    %498 = arith.mulf %497, %495 : vector<40x128xf32>
    %c86 = arith.constant 86 : index
    %499 = memref.load %arg2[%c86] : memref<100xf32, #tpu.memory_space<smem>>
    %c1_i32_129 = arith.constant 1 : i32
    %500 = tpu.dynamic_rotate %495 by %c1_i32_129 dim 1 : vector<40x128xf32>, i32 -> vector<40x128xf32>
    %501 = vector.broadcast %499 : f32 to vector<40x128xf32>
    %502 = arith.mulf %501, %500 : vector<40x128xf32>
    %503 = arith.addf %498, %502 : vector<40x128xf32>
    %c87 = arith.constant 87 : index
    %504 = memref.load %arg2[%c87] : memref<100xf32, #tpu.memory_space<smem>>
    %c2_i32_130 = arith.constant 2 : i32
    %505 = tpu.dynamic_rotate %495 by %c2_i32_130 dim 1 : vector<40x128xf32>, i32 -> vector<40x128xf32>
    %506 = vector.broadcast %504 : f32 to vector<40x128xf32>
    %507 = arith.mulf %506, %505 : vector<40x128xf32>
    %508 = arith.addf %503, %507 : vector<40x128xf32>
    %c88 = arith.constant 88 : index
    %509 = memref.load %arg2[%c88] : memref<100xf32, #tpu.memory_space<smem>>
    %c3_i32_131 = arith.constant 3 : i32
    %510 = tpu.dynamic_rotate %495 by %c3_i32_131 dim 1 : vector<40x128xf32>, i32 -> vector<40x128xf32>
    %511 = vector.broadcast %509 : f32 to vector<40x128xf32>
    %512 = arith.mulf %511, %510 : vector<40x128xf32>
    %513 = arith.addf %508, %512 : vector<40x128xf32>
    %c89 = arith.constant 89 : index
    %514 = memref.load %arg2[%c89] : memref<100xf32, #tpu.memory_space<smem>>
    %c4_i32_132 = arith.constant 4 : i32
    %515 = tpu.dynamic_rotate %495 by %c4_i32_132 dim 1 : vector<40x128xf32>, i32 -> vector<40x128xf32>
    %516 = vector.broadcast %514 : f32 to vector<40x128xf32>
    %517 = arith.mulf %516, %515 : vector<40x128xf32>
    %518 = arith.addf %513, %517 : vector<40x128xf32>
    %c1_133 = arith.constant 1 : index
    %c0_134 = arith.constant 0 : index
    %519 = vector.load %arg5[%c1_133, %c0_134] : memref<48x128xf32, #tpu.memory_space<vmem>>, vector<40x128xf32>
    %c90 = arith.constant 90 : index
    %520 = memref.load %arg2[%c90] : memref<100xf32, #tpu.memory_space<smem>>
    %521 = vector.broadcast %520 : f32 to vector<40x128xf32>
    %522 = arith.mulf %521, %519 : vector<40x128xf32>
    %c91 = arith.constant 91 : index
    %523 = memref.load %arg2[%c91] : memref<100xf32, #tpu.memory_space<smem>>
    %c1_i32_135 = arith.constant 1 : i32
    %524 = tpu.dynamic_rotate %519 by %c1_i32_135 dim 1 : vector<40x128xf32>, i32 -> vector<40x128xf32>
    %525 = vector.broadcast %523 : f32 to vector<40x128xf32>
    %526 = arith.mulf %525, %524 : vector<40x128xf32>
    %527 = arith.addf %522, %526 : vector<40x128xf32>
    %c92 = arith.constant 92 : index
    %528 = memref.load %arg2[%c92] : memref<100xf32, #tpu.memory_space<smem>>
    %c2_i32_136 = arith.constant 2 : i32
    %529 = tpu.dynamic_rotate %519 by %c2_i32_136 dim 1 : vector<40x128xf32>, i32 -> vector<40x128xf32>
    %530 = vector.broadcast %528 : f32 to vector<40x128xf32>
    %531 = arith.mulf %530, %529 : vector<40x128xf32>
    %532 = arith.addf %527, %531 : vector<40x128xf32>
    %c93 = arith.constant 93 : index
    %533 = memref.load %arg2[%c93] : memref<100xf32, #tpu.memory_space<smem>>
    %c3_i32_137 = arith.constant 3 : i32
    %534 = tpu.dynamic_rotate %519 by %c3_i32_137 dim 1 : vector<40x128xf32>, i32 -> vector<40x128xf32>
    %535 = vector.broadcast %533 : f32 to vector<40x128xf32>
    %536 = arith.mulf %535, %534 : vector<40x128xf32>
    %537 = arith.addf %532, %536 : vector<40x128xf32>
    %c94 = arith.constant 94 : index
    %538 = memref.load %arg2[%c94] : memref<100xf32, #tpu.memory_space<smem>>
    %c4_i32_138 = arith.constant 4 : i32
    %539 = tpu.dynamic_rotate %519 by %c4_i32_138 dim 1 : vector<40x128xf32>, i32 -> vector<40x128xf32>
    %540 = vector.broadcast %538 : f32 to vector<40x128xf32>
    %541 = arith.mulf %540, %539 : vector<40x128xf32>
    %542 = arith.addf %537, %541 : vector<40x128xf32>
    %c0_139 = arith.constant 0 : index
    %c0_140 = arith.constant 0 : index
    %543 = vector.load %arg5[%c0_139, %c0_140] : memref<48x128xf32, #tpu.memory_space<vmem>>, vector<40x128xf32>
    %c95 = arith.constant 95 : index
    %544 = memref.load %arg2[%c95] : memref<100xf32, #tpu.memory_space<smem>>
    %545 = vector.broadcast %544 : f32 to vector<40x128xf32>
    %546 = arith.mulf %545, %543 : vector<40x128xf32>
    %c96 = arith.constant 96 : index
    %547 = memref.load %arg2[%c96] : memref<100xf32, #tpu.memory_space<smem>>
    %c1_i32_141 = arith.constant 1 : i32
    %548 = tpu.dynamic_rotate %543 by %c1_i32_141 dim 1 : vector<40x128xf32>, i32 -> vector<40x128xf32>
    %549 = vector.broadcast %547 : f32 to vector<40x128xf32>
    %550 = arith.mulf %549, %548 : vector<40x128xf32>
    %551 = arith.addf %546, %550 : vector<40x128xf32>
    %c97 = arith.constant 97 : index
    %552 = memref.load %arg2[%c97] : memref<100xf32, #tpu.memory_space<smem>>
    %c2_i32_142 = arith.constant 2 : i32
    %553 = tpu.dynamic_rotate %543 by %c2_i32_142 dim 1 : vector<40x128xf32>, i32 -> vector<40x128xf32>
    %554 = vector.broadcast %552 : f32 to vector<40x128xf32>
    %555 = arith.mulf %554, %553 : vector<40x128xf32>
    %556 = arith.addf %551, %555 : vector<40x128xf32>
    %c98 = arith.constant 98 : index
    %557 = memref.load %arg2[%c98] : memref<100xf32, #tpu.memory_space<smem>>
    %c3_i32_143 = arith.constant 3 : i32
    %558 = tpu.dynamic_rotate %543 by %c3_i32_143 dim 1 : vector<40x128xf32>, i32 -> vector<40x128xf32>
    %559 = vector.broadcast %557 : f32 to vector<40x128xf32>
    %560 = arith.mulf %559, %558 : vector<40x128xf32>
    %561 = arith.addf %556, %560 : vector<40x128xf32>
    %c99 = arith.constant 99 : index
    %562 = memref.load %arg2[%c99] : memref<100xf32, #tpu.memory_space<smem>>
    %c4_i32_144 = arith.constant 4 : i32
    %563 = tpu.dynamic_rotate %543 by %c4_i32_144 dim 1 : vector<40x128xf32>, i32 -> vector<40x128xf32>
    %564 = vector.broadcast %562 : f32 to vector<40x128xf32>
    %565 = arith.mulf %564, %563 : vector<40x128xf32>
    %566 = arith.addf %561, %565 : vector<40x128xf32>
    %567 = arith.addf %470, %494 : vector<40x128xf32>
    %568 = arith.addf %518, %542 : vector<40x128xf32>
    %569 = arith.addf %567, %568 : vector<40x128xf32>
    %570 = arith.addf %569, %566 : vector<40x128xf32>
    %c4_i32_145 = arith.constant 4 : i32
    %571 = vector.broadcast %c4_i32_145 : i32 to vector<40x128xi32>
    %572 = arith.cmpi sge, %2, %571 : vector<40x128xi32>
    %c36_i32 = arith.constant 36 : i32
    %573 = vector.broadcast %c36_i32 : i32 to vector<40x128xi32>
    %574 = arith.cmpi slt, %2, %573 : vector<40x128xi32>
    %575 = arith.andi %572, %574 : vector<40x128xi1>
    %c4_i32_146 = arith.constant 4 : i32
    %576 = vector.broadcast %c4_i32_146 : i32 to vector<40x128xi32>
    %577 = arith.cmpi sge, %3, %576 : vector<40x128xi32>
    %c36_i32_147 = arith.constant 36 : i32
    %578 = vector.broadcast %c36_i32_147 : i32 to vector<40x128xi32>
    %579 = arith.cmpi slt, %3, %578 : vector<40x128xi32>
    %580 = arith.andi %577, %579 : vector<40x128xi1>
    %c40_i32_148 = arith.constant 40 : i32
    %581 = vector.broadcast %c40_i32_148 : i32 to vector<40x128xi32>
    %582 = arith.cmpi sge, %3, %581 : vector<40x128xi32>
    %c72_i32 = arith.constant 72 : i32
    %583 = vector.broadcast %c72_i32 : i32 to vector<40x128xi32>
    %584 = arith.cmpi slt, %3, %583 : vector<40x128xi32>
    %585 = arith.andi %582, %584 : vector<40x128xi1>
    %586 = arith.ori %580, %585 : vector<40x128xi1>
    %587 = arith.andi %575, %586 : vector<40x128xi1>
    %c3_149 = arith.constant 3 : index
    %588 = memref.load %arg3[%c3_149] : memref<4xf32, #tpu.memory_space<smem>>
    %cst_150 = arith.constant 0.000000e+00 : f32
    %589 = vector.broadcast %588 : f32 to vector<40x128xf32>
    %590 = vector.broadcast %cst_150 : f32 to vector<40x128xf32>
    %591 = arith.select %587, %589, %590 : vector<40x128xi1>, vector<40x128xf32>
    %592 = arith.addf %570, %591 : vector<40x128xf32>
    %c0_151 = arith.constant 0 : index
    %c0_152 = arith.constant 0 : index
    %593 = vector.load %arg4[%c0_151, %c0_152] : memref<40x128xf32, #tpu.memory_space<vmem>>, vector<40x128xf32>
    tpu.vector_store %arg4[%c0_151, %c0_152], %592 {strides = array<i32>} : memref<40x128xf32, #tpu.memory_space<vmem>>, vector<40x128xf32>,
    return
  }
  func.func @transform_0(%arg0: i32) -> (i32, i32) {
    %c0_i32 = arith.constant 0 : i32
    %c0_i32_0 = arith.constant 0 : i32
    %c0_i32_1 = arith.constant 0 : i32
    return %c0_i32, %c0_i32_0 : i32, i32
  }
  func.func @transform_1(%arg0: i32) -> i32 {
    %c0_i32 = arith.constant 0 : i32
    %c0_i32_0 = arith.constant 0 : i32
    return %c0_i32 : i32
  }
  func.func @transform_2(%arg0: i32) -> i32 {
    %c0_i32 = arith.constant 0 : i32
    %c0_i32_0 = arith.constant 0 : i32
    return %c0_i32 : i32
  }
  func.func @transform_3(%arg0: i32) -> (i32, i32) {
    %c0_i32 = arith.constant 0 : i32
    %c0_i32_0 = arith.constant 0 : i32
    %c0_i32_1 = arith.constant 0 : i32
    return %c0_i32, %c0_i32_0 : i32, i32
  }
}

</mosaic_0001>

<bundles_post_ra>
// kernel: tpu_custom_call.1
= control target key start
LH: loop header
LB: loop body
LE: loop exit
PB: predicated region body
PF: predicated region fallthrough
CT: control target
= control target key end

     0   :  { %8 = vsyncpa [#allocation4], 0  ;;  %s5552_s0 = inlined_call_operand.hbm [shape: f32[40,128], index: 0, kind: input, shape index: {}]   ;;  %s5553_s1 = inlined_call_operand.vmem [shape: f32[100], index: 1, kind: input, shape index: {}]   ;;  %s5554_s2 = inlined_call_operand.vmem [shape: f32[4], index: 2, kind: input, shape index: {}]   ;;  %s5555_s3 = inlined_call_operand.hbm [shape: f32[40,128], index: 3, kind: output, shape index: {}]  }
   0x1   :  { %9 = vsyncpa [#allocation6], 0 }
   0x2   :  { %10 = vsyncpa [#allocation9], 0 }
   0x3   :  { %11 = vsyncpa [#allocation5], 0  ;;  %s2517_s12 = smov [#allocation3]   ;;  %s30_s16 = sshll.u32 %s5553_s1, 4  ;;  %s31_s16 = int_to_ptr.vmem [resolvable:$true] %s30_s16 }
   0x4   :  { %s17_s13 = sshll.u32 %s2517_s12, 4  ;;  %s18_s13 = int_to_ptr.vmem [resolvable:$true] %s17_s13 }
   0x5   :  { %s2453_s17 = scalar_lea.vmem %s18_s13, 640  ;;  %p2458_p1 = scmp.lt.s32.totalorder %s18_s13, %s18_s13 }
   0x6   :  { %p2454_p0 = scmp.ne.s32.totalorder %s18_s13, %s2453_s17  ;;  %p2459_p2 = scmp.lt.s32.totalorder %s2453_s17, %s2453_s17 }
   0x8   :  { %p2460_p3 = por %p2459_p2, %p2458_p1 }
   0xa   :  { %p2461_p4 = pnand %p2460_p3, %p2454_p0 }
   0xc   :  { %2464 = shalt.err (!%p2461_p4)
}
   0xd   :  { %s2518_s18 = smov 128   ;;  %s2519_s19 = smov 8  }
   0xe   :  { %23 = dma.hbm_to_vmem [thread:$0]  %s5552_s0, 640, %s18_s13, [#allocation4], %s2518_s18, %s2518_s18, %s2519_s19  }
   0xf   :  { %s2465_s22 = scalar_lea.vmem %s31_s16, 16  ;;  %p2470_p6 = scmp.lt.s32.totalorder %s31_s16, %s31_s16 }
  0x10   :  { %p2466_p5 = scmp.ne.s32.totalorder %s31_s16, %s2465_s22  ;;  %p2471_p7 = scmp.lt.s32.totalorder %s2465_s22, %s2465_s22 }
  0x12   :  { %p2472_p8 = por %p2471_p7, %p2470_p6 }
  0x14   :  { %p2473_p9 = pnand %p2472_p8, %p2466_p5 }
  0x16   :  { %2476 = shalt.err (!%p2473_p9)
}
  0x17   :  { %s2520_s1 = smov [#allocation7]   ;;  %s40_s25 = sshll.u32 %s5554_s2, 4  ;;  %s41_s25 = int_to_ptr.vmem [resolvable:$true] %s40_s25 }
  0x18   :  { %33 = dma.vmem_to_smem %s31_s16, 16, %s2520_s1, [#allocation6]  }
  0x19   :  { %s2477_s26 = scalar_lea.vmem %s41_s25, 16  ;;  %p2482_p11 = scmp.lt.s32.totalorder %s41_s25, %s41_s25 }
  0x1a   :  { %p2478_p10 = scmp.ne.s32.totalorder %s41_s25, %s2477_s26  ;;  %p2483_p12 = scmp.lt.s32.totalorder %s2477_s26, %s2477_s26 }
  0x1c   :  { %p2484_p13 = por %p2483_p12, %p2482_p11 }
  0x1e   :  { %p2485_p0 = pnand %p2484_p13, %p2478_p10 }
  0x20   :  { %2488 = shalt.err (!%p2485_p0)
}
  0x21   :  { %s2521_s0 = smov [#allocation8]  }
  0x22   :  { %43 = dma.vmem_to_smem %s41_s25, 16, %s2521_s0, [#allocation9]  }
  0x23   :  { %2509 = dma.done.wait [#allocation4], 640  }
  0x24   :  { %2510 = vsyncadd [#allocation4], 4294966656 }
  0x25   :  { %2511 = dma.done.wait [#allocation6], 16  }
  0x26   :  { %2512 = vsyncadd [#allocation6], 4294967280 }
  0x27   :  { %2513 = dma.done.wait [#allocation9], 16  }
  0x28   :  { %2514 = vsyncadd [#allocation9], 4294967280 }
  0x29   :  { %53 = sfence }
  0x2a   :  { %v2560_v0 = vld [vmem:[#allocation3 + $0x10] sm:$0xff]  ;;  %v2562_v1 = vld [vmem:[#allocation3] sm:$0xff]  ;;  %v2522_v2 = vmov 0.0   ;;  %s2523_s2 = smov 1   ;;  %v2568_v3 = vld [vmem:[#allocation3 + $0x18] sm:$0xff]  ;;  %s2524_s27 = smov 2  }
  0x2b   :  { %56 = vst [vmem:[#allocation2 + $0x10] sm:$0xff] %v2522_v2  ;;  %57 = vst [vmem:[#allocation2 + $0x18] sm:$0xff] %v2522_v2  ;;  %95 = vrot.lane.b32.xlu1 %v2560_v0, %s2523_s2  ;;  %91 = vrot.lane.b32.xlu0 %v2562_v1, %s2523_s2  ;;  %v2570_v4 = vld [vmem:[#allocation3 + $0x8] sm:$0xff]  ;;  %v2572_v5 = vld [vmem:[#allocation3 + $0x20] sm:$0xff]  ;;  %s2525_s28 = smov 3   ;;  %s2526_s29 = smov 4  }
  0x2c   :  { %54 = vst [vmem:[#allocation2] sm:$0xff] %v2522_v2  ;;  %55 = vst [vmem:[#allocation2 + $0x8] sm:$0xff] %v2522_v2  ;;  %s83_s30 = sld [smem:[#allocation7]] }
  0x2d   :  { %58 = vst [vmem:[#allocation2 + $0x20] sm:$0xff] %v2522_v2  ;;  %59 = vst [vmem:[#allocation2 + $0x28] sm:$0xff] %v2522_v2  ;;  %s2332_s4 = sld [smem:[#allocation7 + $0x1]] }
  0x2e   :  { %75 = vst [vmem:[#allocation2 + $0x14] sm:$0xff] %v2560_v0  ;;  %73 = vst [vmem:[#allocation2 + $0x4] sm:$0xff] %v2562_v1  ;;  %s2333_s5 = sld [smem:[#allocation7 + $0x2]] }
  0x2f   :  { %76 = vst [vmem:[#allocation2 + $0x1c] sm:$0xff] %v2568_v3  ;;  %74 = vst [vmem:[#allocation2 + $0xc] sm:$0xff] %v2570_v4  ;;  %97 = vrot.lane.b32.xlu1 %v2568_v3, %s2523_s2  ;;  %93 = vrot.lane.b32.xlu0 %v2570_v4, %s2523_s2  ;;  %s2334_s6 = sld [smem:[#allocation7 + $0x3]] }
  0x30   :  { %77 = vst [vmem:[#allocation2 + $0x24] sm:$0xff] %v2572_v5  ;;  %s2335_s7 = sld [smem:[#allocation7 + $0x4]] }
  0x31   :  { %s2336_s8 = sld [smem:[#allocation7 + $0x5]] }
  0x32   :  { %s2935_s9 = sld [smem:[#allocation7 + $0x6]] }
  0x33   :  { %113 = vrot.lane.b32.xlu1 %v2562_v1, %s2524_s27  ;;  %99 = vrot.lane.b32.xlu0 %v2572_v5, %s2523_s2  ;;  %s2941_s10 = sld [smem:[#allocation7 + $0x7]] }
  0x34   :  { %s2943_s11 = sld [smem:[#allocation7 + $0x8]] }
  0x35   :  { %v2617_v7 = vld [vmem:[#allocation2 + $0x3] sm:$0xff]  ;;  %s2341_s12 = sld [smem:[#allocation7 + $0xa]] }
  0x36   :  { %v2615_v6 = vld [vmem:[#allocation2 + $0xb] sm:$0xff]  ;;  %v2623_v8 = vld [vmem:[#allocation2 + $0x1b] sm:$0xff]  ;;  %v2625_v9 = vld [vmem:[#allocation2 + $0x13] sm:$0xff]  ;;  %s2945_s13 = sld [smem:[#allocation7 + $0x9]] }
  0x37   :  { %117 = vrot.lane.b32.xlu1 %v2560_v0, %s2524_s27  ;;  %115 = vrot.lane.b32.xlu0 %v2570_v4, %s2524_s27  ;;  %v2631_v10 = vld [vmem:[#allocation2 + $0x23] sm:$0xff]  ;;  %v2673_v13 = vld [vmem:[#allocation2 + $0x1a] sm:$0xff]  ;;  %v2675_v14 = vld [vmem:[#allocation2 + $0x12] sm:$0xff]  ;;  %s2951_s14 = sld [smem:[#allocation7 + $0xb]] }
  0x38   :  { %v2665_v11 = vld [vmem:[#allocation2 + $0xa] sm:$0xff]  ;;  %v2667_v12 = vld [vmem:[#allocation2 + $0x2] sm:$0xff]  ;;  %v2731_v22 = vld [vmem:[#allocation2 + $0x19] sm:$0xff]  ;;  %s2953_s15 = sld [smem:[#allocation7 + $0xc]] }
  0x39   :  { %v2681_v15 = vld [vmem:[#allocation2 + $0x22] sm:$0xff]  ;;  %v2733_v23 = vld [vmem:[#allocation2 + $0x11] sm:$0xff]  ;;  %s2955_s16 = sld [smem:[#allocation7 + $0xf]] }
  0x3a   :  { %v2719_v18 = vld [vmem:[#allocation2 + $0x9] sm:$0xff]  ;;  %v2721_v19 = vld [vmem:[#allocation2 + $0x1] sm:$0xff]  ;;  %v2821_v47 = vld [vmem:[#allocation2 + $0x18] sm:$0xff]  ;;  %s2957_s17 = sld [smem:[#allocation7 + $0xd]] }
  0x3b   :  { %121 = vrot.lane.b32.xlu1 %v2572_v5, %s2524_s27  ;;  %119 = vrot.lane.b32.xlu0 %v2568_v3, %s2524_s27  ;;  %v2743_v26 = vld [vmem:[#allocation2 + $0x21] sm:$0xff]  ;;  %v2823_v48 = vld [vmem:[#allocation2 + $0x10] sm:$0xff]  ;;  %s2964_s20 = sld [smem:[#allocation7 + $0xe]] }
  0x3c   :  { %v2809_v43 = vld [vmem:[#allocation2 + $0x8] sm:$0xff]  ;;  %v2811_v44 = vld [vmem:[#allocation2] sm:$0xff]  ;;  %s2969_s21 = sld [smem:[#allocation7 + $0x10]] }
  0x3d   :  { %v2833_v51 = vld [vmem:[#allocation2 + $0x20] sm:$0xff]  ;;  %s2976_s22 = sld [smem:[#allocation7 + $0x11]] }
  0x3e   :  { %5572 = vst [vmem:[#allocation17_spill] sm:$0xff] %v2833_v51  ;;  %s3040_s1 = sld [smem:[#allocation7 + $0x12]] }
  0x3f   :  { %137 = vrot.lane.b32.xlu1 %v2570_v4, %s2525_s28  ;;  %135 = vrot.lane.b32.xlu0 %v2562_v1, %s2525_s28  ;;  %s3050_s23 = sld [smem:[#allocation7 + $0x14]] }
  0x40   :  { %s3062_s24 = sld [smem:[#allocation7 + $0x13]] }
  0x41   :  { %s3080_s25 = sld [smem:[#allocation7 + $0x15]] }
  0x42   :  { %s3144_s26 = sld [smem:[#allocation7 + $0x16]] }
  0x43   :  { %141 = vrot.lane.b32.xlu1 %v2568_v3, %s2525_s28  ;;  %139 = vrot.lane.b32.xlu0 %v2560_v0, %s2525_s28  ;;  %s3170_s0 = sld [smem:[#allocation8]] }
  0x47   :  { %157 = vrot.lane.b32.xlu1 %v2562_v1, %s2526_s29  ;;  %143 = vrot.lane.b32.xlu0 %v2572_v5, %s2525_s28 }
  0x4b   :  { %161 = vrot.lane.b32.xlu1 %v2560_v0, %s2526_s29  ;;  %159 = vrot.lane.b32.xlu0 %v2570_v4, %s2526_s29 }
  0x4f   :  { %165 = vrot.lane.b32.xlu1 %v2572_v5, %s2526_s29  ;;  %163 = vrot.lane.b32.xlu0 %v2568_v3, %s2526_s29 }
  0x53   :  { %193 = vrot.lane.b32.xlu1 %v2615_v6, %s2523_s2  ;;  %191 = vrot.lane.b32.xlu0 %v2617_v7, %s2523_s2 }
  0x57   :  { %197 = vrot.lane.b32.xlu1 %v2623_v8, %s2523_s2  ;;  %195 = vrot.lane.b32.xlu0 %v2625_v9, %s2523_s2 }
  0x5b   :  { %213 = vrot.lane.b32.xlu1 %v2617_v7, %s2524_s27  ;;  %199 = vrot.lane.b32.xlu0 %v2631_v10, %s2523_s2 }
  0x5f   :  { %217 = vrot.lane.b32.xlu1 %v2625_v9, %s2524_s27  ;;  %215 = vrot.lane.b32.xlu0 %v2615_v6, %s2524_s27 }
  0x63   :  { %221 = vrot.lane.b32.xlu1 %v2631_v10, %s2524_s27  ;;  %219 = vrot.lane.b32.xlu0 %v2623_v8, %s2524_s27 }
  0x67   :  { %237 = vrot.lane.b32.xlu1 %v2615_v6, %s2525_s28  ;;  %235 = vrot.lane.b32.xlu0 %v2617_v7, %s2525_s28 }
  0x6b   :  { %241 = vrot.lane.b32.xlu1 %v2623_v8, %s2525_s28  ;;  %239 = vrot.lane.b32.xlu0 %v2625_v9, %s2525_s28 }
  0x6f   :  { %257 = vrot.lane.b32.xlu1 %v2617_v7, %s2526_s29  ;;  %243 = vrot.lane.b32.xlu0 %v2631_v10, %s2525_s28 }
  0x73   :  { %261 = vrot.lane.b32.xlu1 %v2625_v9, %s2526_s29  ;;  %259 = vrot.lane.b32.xlu0 %v2615_v6, %s2526_s29 }
  0x77   :  { %265 = vrot.lane.b32.xlu1 %v2631_v10, %s2526_s29  ;;  %263 = vrot.lane.b32.xlu0 %v2623_v8, %s2526_s29 }
  0x7b   :  { %293 = vrot.lane.b32.xlu1 %v2665_v11, %s2523_s2  ;;  %291 = vrot.lane.b32.xlu0 %v2667_v12, %s2523_s2 }
  0x7f   :  { %297 = vrot.lane.b32.xlu1 %v2673_v13, %s2523_s2  ;;  %295 = vrot.lane.b32.xlu0 %v2675_v14, %s2523_s2 }
  0x83   :  { %313 = vrot.lane.b32.xlu1 %v2667_v12, %s2524_s27  ;;  %299 = vrot.lane.b32.xlu0 %v2681_v15, %s2523_s2 }
  0x87   :  { %317 = vrot.lane.b32.xlu1 %v2675_v14, %s2524_s27  ;;  %315 = vrot.lane.b32.xlu0 %v2665_v11, %s2524_s27 }
  0x8b   :  { %321 = vrot.lane.b32.xlu1 %v2681_v15, %s2524_s27  ;;  %319 = vrot.lane.b32.xlu0 %v2673_v13, %s2524_s27 }
  0x8f   :  { %337 = vrot.lane.b32.xlu1 %v2665_v11, %s2525_s28  ;;  %335 = vrot.lane.b32.xlu0 %v2667_v12, %s2525_s28 }
  0x93   :  { %341 = vrot.lane.b32.xlu1 %v2673_v13, %s2525_s28  ;;  %339 = vrot.lane.b32.xlu0 %v2675_v14, %s2525_s28 }
  0x97   :  { %357 = vrot.lane.b32.xlu1 %v2667_v12, %s2526_s29  ;;  %343 = vrot.lane.b32.xlu0 %v2681_v15, %s2525_s28 }
  0x9b   :  { %361 = vrot.lane.b32.xlu1 %v2675_v14, %s2526_s29  ;;  %359 = vrot.lane.b32.xlu0 %v2665_v11, %s2526_s29 }
  0x9d   :  { %v2711_v16 = vpop.permute.xlu1 %95  ;;  %v2713_v17 = vpop.permute.xlu0 %91 }
  0x9f   :  { %365 = vrot.lane.b32.xlu1 %v2681_v15, %s2526_s29  ;;  %363 = vrot.lane.b32.xlu0 %v2673_v13, %s2526_s29 }
  0xa1   :  { %v2723_v20 = vpop.permute.xlu1 %97  ;;  %v2725_v21 = vpop.permute.xlu0 %93 }
  0xa3   :  { %393 = vrot.lane.b32.xlu1 %v2719_v18, %s2523_s2  ;;  %391 = vrot.lane.b32.xlu0 %v2721_v19, %s2523_s2 }
  0xa5   :  { %v2735_v24 = vpop.permute.xlu1 %113  ;;  %v2737_v25 = vpop.permute.xlu0 %99 }
  0xa7   :  { %397 = vrot.lane.b32.xlu1 %v2731_v22, %s2523_s2  ;;  %395 = vrot.lane.b32.xlu0 %v2733_v23, %s2523_s2 }
  0xa9   :  { %v2745_v27 = vpop.permute.xlu1 %117  ;;  %v2747_v28 = vpop.permute.xlu0 %115 }
  0xab   :  { %413 = vrot.lane.b32.xlu1 %v2721_v19, %s2524_s27  ;;  %399 = vrot.lane.b32.xlu0 %v2743_v26, %s2523_s2 }
  0xad   :  { %v2753_v29 = vpop.permute.xlu1 %121  ;;  %v2755_v30 = vpop.permute.xlu0 %119 }
  0xaf   :  { %417 = vrot.lane.b32.xlu1 %v2733_v23, %s2524_s27  ;;  %415 = vrot.lane.b32.xlu0 %v2719_v18, %s2524_s27 }
  0xb1   :  { %v2761_v31 = vpop.permute.xlu1 %137  ;;  %v2763_v32 = vpop.permute.xlu0 %135 }
  0xb3   :  { %421 = vrot.lane.b32.xlu1 %v2743_v26, %s2524_s27  ;;  %419 = vrot.lane.b32.xlu0 %v2731_v22, %s2524_s27 }
  0xb5   :  { %v2769_v33 = vpop.permute.xlu1 %141  ;;  %v2771_v34 = vpop.permute.xlu0 %139 }
  0xb7   :  { %437 = vrot.lane.b32.xlu1 %v2719_v18, %s2525_s28  ;;  %435 = vrot.lane.b32.xlu0 %v2721_v19, %s2525_s28 }
  0xb9   :  { %v2777_v35 = vpop.permute.xlu1 %157  ;;  %v2779_v36 = vpop.permute.xlu0 %143 }
  0xbb   :  { %441 = vrot.lane.b32.xlu1 %v2731_v22, %s2525_s28  ;;  %439 = vrot.lane.b32.xlu0 %v2733_v23, %s2525_s28 }
  0xbd   :  { %v2785_v37 = vpop.permute.xlu1 %161  ;;  %v2787_v38 = vpop.permute.xlu0 %159 }
  0xbf   :  { %457 = vrot.lane.b32.xlu1 %v2721_v19, %s2526_s29  ;;  %443 = vrot.lane.b32.xlu0 %v2743_v26, %s2525_s28 }
  0xc1   :  { %v2793_v39 = vpop.permute.xlu1 %165  ;;  %v2795_v40 = vpop.permute.xlu0 %163 }
  0xc3   :  { %461 = vrot.lane.b32.xlu1 %v2733_v23, %s2526_s29  ;;  %459 = vrot.lane.b32.xlu0 %v2719_v18, %s2526_s29 }
  0xc5   :  { %v2801_v41 = vpop.permute.xlu1 %193  ;;  %v2803_v42 = vpop.permute.xlu0 %191 }
  0xc7   :  { %465 = vrot.lane.b32.xlu1 %v2743_v26, %s2526_s29  ;;  %463 = vrot.lane.b32.xlu0 %v2731_v22, %s2526_s29 }
  0xc9   :  { %v2813_v45 = vpop.permute.xlu1 %197  ;;  %v2815_v46 = vpop.permute.xlu0 %195 }
  0xca   :  { %5570 = vst [vmem:[#allocation15_spill] sm:$0xff] %v2813_v45 }
  0xcb   :  { %493 = vrot.lane.b32.xlu1 %v2809_v43, %s2523_s2  ;;  %491 = vrot.lane.b32.xlu0 %v2811_v44, %s2523_s2 }
  0xcd   :  { %v2825_v49 = vpop.permute.xlu1 %213  ;;  %v2827_v50 = vpop.permute.xlu0 %199 }
  0xce   :  { %5571 = vst [vmem:[#allocation16_spill] sm:$0xff] %v2827_v50 }
  0xcf   :  { %497 = vrot.lane.b32.xlu1 %v2821_v47, %s2523_s2  ;;  %495 = vrot.lane.b32.xlu0 %v2823_v48, %s2523_s2 }
  0xd1   :  { %v2835_v52 = vpop.permute.xlu1 %217  ;;  %v2837_v53 = vpop.permute.xlu0 %215 }
  0xd3   :  { %513 = vrot.lane.b32.xlu1 %v2811_v44, %s2524_s27  ;;  %499 = vrot.lane.b32.xlu0 %v2833_v51, %s2523_s2 }
  0xd5   :  { %v2843_v54 = vpop.permute.xlu1 %221  ;;  %v2845_v55 = vpop.permute.xlu0 %219 }
  0xd6   :  { %5573 = vst [vmem:[#allocation18_spill] sm:$0xff] %v2843_v54  ;;  %5574 = vst [vmem:[#allocation19_spill] sm:$0xff] %v2845_v55 }
  0xd7   :  { %517 = vrot.lane.b32.xlu1 %v2823_v48, %s2524_s27  ;;  %515 = vrot.lane.b32.xlu0 %v2809_v43, %s2524_s27 }
  0xd9   :  { %v2851_v56 = vpop.permute.xlu1 %237  ;;  %v2853_v57 = vpop.permute.xlu0 %235 }
  0xda   :  { %5575 = vst [vmem:[#allocation20_spill] sm:$0xff] %v2851_v56  ;;  %5576 = vst [vmem:[#allocation21_spill] sm:$0xff] %v2853_v57 }
  0xdb   :  { %521 = vrot.lane.b32.xlu1 %v2833_v51, %s2524_s27  ;;  %519 = vrot.lane.b32.xlu0 %v2821_v47, %s2524_s27 }
  0xdd   :  { %v2859_v58 = vpop.permute.xlu1 %241  ;;  %v2861_v59 = vpop.permute.xlu0 %239 }
  0xde   :  { %5577 = vst [vmem:[#allocation22_spill] sm:$0xff] %v2859_v58  ;;  %5578 = vst [vmem:[#allocation23_spill] sm:$0xff] %v2861_v59 }
  0xdf   :  { %537 = vrot.lane.b32.xlu1 %v2809_v43, %s2525_s28  ;;  %535 = vrot.lane.b32.xlu0 %v2811_v44, %s2525_s28 }
  0xe1   :  { %v2867_v60 = vpop.permute.xlu1 %257  ;;  %v2869_v61 = vpop.permute.xlu0 %243 }
  0xe2   :  { %5579 = vst [vmem:[#allocation24_spill] sm:$0xff] %v2867_v60  ;;  %5580 = vst [vmem:[#allocation25_spill] sm:$0xff] %v2869_v61 }
  0xe3   :  { %541 = vrot.lane.b32.xlu1 %v2821_v47, %s2525_s28  ;;  %539 = vrot.lane.b32.xlu0 %v2823_v48, %s2525_s28 }
  0xe5   :  { %v2875_v62 = vpop.permute.xlu1 %261  ;;  %v2877_v63 = vpop.permute.xlu0 %259 }
  0xe6   :  { %5581 = vst [vmem:[#allocation26_spill] sm:$0xff] %v2875_v62  ;;  %5582 = vst [vmem:[#allocation27_spill] sm:$0xff] %v2877_v63 }
  0xe7   :  { %557 = vrot.lane.b32.xlu1 %v2811_v44, %s2526_s29  ;;  %543 = vrot.lane.b32.xlu0 %v2833_v51, %s2525_s28 }
  0xe9   :  { %v2883_v2 = vpop.permute.xlu1 %265  ;;  %v2885_v58 = vpop.permute.xlu0 %263 }
  0xea   :  { %5583 = vst [vmem:[#allocation28_spill] sm:$0xff] %v2883_v2  ;;  %5584 = vst [vmem:[#allocation29_spill] sm:$0xff] %v2885_v58 }
  0xeb   :  { %561 = vrot.lane.b32.xlu1 %v2823_v48, %s2526_s29  ;;  %559 = vrot.lane.b32.xlu0 %v2809_v43, %s2526_s29 }
  0xed   :  { %v2891_v61 = vpop.permute.xlu1 %293  ;;  %v2893_v62 = vpop.permute.xlu0 %291 }
  0xee   :  { %5585 = vst [vmem:[#allocation30_spill] sm:$0xff] %v2891_v61  ;;  %5586 = vst [vmem:[#allocation31_spill] sm:$0xff] %v2893_v62 }
  0xef   :  { %565 = vrot.lane.b32.xlu1 %v2833_v51, %s2526_s29  ;;  %563 = vrot.lane.b32.xlu0 %v2821_v47, %s2526_s29 }
  0xf1   :  { %v2899_v63 = vpop.permute.xlu1 %297  ;;  %v2901_v2 = vpop.permute.xlu0 %295 }
  0xf2   :  { %5587 = vst [vmem:[#allocation32_spill] sm:$0xff] %v2899_v63  ;;  %5588 = vst [vmem:[#allocation33_spill] sm:$0xff] %v2901_v2 }
  0xf5   :  { %v2903_v58 = vpop.permute.xlu1 %313  ;;  %v2905_v54 = vpop.permute.xlu0 %299 }
  0xf6   :  { %5589 = vst [vmem:[#allocation34_spill] sm:$0xff] %v2903_v58  ;;  %5590 = vst [vmem:[#allocation35_spill] sm:$0xff] %v2905_v54 }
  0xf9   :  { %v2907_v60 = vpop.permute.xlu1 %317  ;;  %v2909_v55 = vpop.permute.xlu0 %315 }
  0xfa   :  { %5591 = vst [vmem:[#allocation36_spill] sm:$0xff] %v2907_v60  ;;  %5592 = vst [vmem:[#allocation37_spill] sm:$0xff] %v2909_v55  ;;  %v284_v55 = vstv %s2341_s12  ;;  %s2359_s12 = sld [smem:[#allocation7 + $0x1c]] }
  0xfd   :  { %v2911_v61 = vpop.permute.xlu1 %321  ;;  %v2913_v62 = vpop.permute.xlu0 %319 }
  0xfe   :  { %5593 = vst [vmem:[#allocation38_spill] sm:$0xff] %v2911_v61  ;;  %5594 = vst [vmem:[#allocation39_spill] sm:$0xff] %v2913_v62  ;;  %v123_v61 = vstv %s2333_s5  ;;  %s2356_s5 = sld [smem:[#allocation7 + $0x19]] }
 0x101   :  { %v2915_v51 = vpop.permute.xlu1 %337  ;;  %v2917_v59 = vpop.permute.xlu0 %335 }
 0x102   :  { %5595 = vst [vmem:[#allocation40_spill] sm:$0xff] %v2915_v51  ;;  %5596 = vst [vmem:[#allocation41_spill] sm:$0xff] %v2917_v59 }
 0x105   :  { %v2919_v56 = vpop.permute.xlu1 %341  ;;  %v2921_v63 = vpop.permute.xlu0 %339 }
 0x106   :  { %5597 = vst [vmem:[#allocation42_spill] sm:$0xff] %v2919_v56  ;;  %5598 = vst [vmem:[#allocation43_spill] sm:$0xff] %v2921_v63 }
 0x109   :  { %v2923_v2 = vpop.permute.xlu1 %357  ;;  %v2925_v58 = vpop.permute.xlu0 %343 }
 0x10a   :  { %5599 = vst [vmem:[#allocation44_spill] sm:$0xff] %v2923_v2  ;;  %5600 = vst [vmem:[#allocation45_spill] sm:$0xff] %v2925_v58  ;;  %v101_v58 = vstv %s2332_s4  ;;  %s3195_s4 = sld [smem:[#allocation7 + $0x18]] }
 0x10d   :  { %v2927_v54 = vpop.permute.xlu1 %361  ;;  %v2929_v60 = vpop.permute.xlu0 %359 }
 0x10e   :  { %5601 = vst [vmem:[#allocation46_spill] sm:$0xff] %v2927_v54  ;;  %5602 = vst [vmem:[#allocation47_spill] sm:$0xff] %v2929_v60 }
 0x111   :  { %v2931_v62 = vpop.permute.xlu1 %365  ;;  %v2933_v51 = vpop.permute.xlu0 %363 }
 0x112   :  { %5603 = vst [vmem:[#allocation48_spill] sm:$0xff] %v2931_v62  ;;  %5604 = vst [vmem:[#allocation49_spill] sm:$0xff] %v2933_v51  ;;  %v84_v51 = vstv %s83_s30  ;;  %s3177_s30 = sld [smem:[#allocation7 + $0x17]] }
 0x113   :  { %v87_v56 = vmul.f32 %v84_v51, %v2560_v0  ;;  %v88_v59 = vmul.f32 %v84_v51, %v2568_v3  ;;  %v2974_v0 = vstv %s2335_s7  ;;  %v2982_v3 = vstv %s2935_s9  ;;  %s2366_s7 = sld [smem:[#allocation7 + $0x23]] }
 0x114   :  { %s2376_s9 = sld [smem:[#allocation7 + $0x2d]] }
 0x115   :  { %v2937_v63 = vpop.permute.xlu1 %393  ;;  %v2939_v2 = vpop.permute.xlu0 %391 }
 0x116   :  { %5605 = vst [vmem:[#allocation50_spill] sm:$0xff] %v2937_v63  ;;  %5606 = vst [vmem:[#allocation51_spill] sm:$0xff] %v2939_v2  ;;  %v86_v2 = vmul.f32 %v84_v51, %v2570_v4 }
 0x119   :  { %v2947_v60 = vpop.permute.xlu1 %397  ;;  %v2949_v62 = vpop.permute.xlu0 %395 }
 0x11a   :  { %5607 = vst [vmem:[#allocation52_spill] sm:$0xff] %v2947_v60  ;;  %5608 = vst [vmem:[#allocation53_spill] sm:$0xff] %v2949_v62  ;;  %v184_v60 = vstv %s2336_s8  ;;  %v85_v62 = vmul.f32 %v84_v51, %v2562_v1  ;;  %s2371_s8 = sld [smem:[#allocation7 + $0x28]] }
 0x11b   :  { %v2979_v1 = vmul.f32 %v184_v60, %v2615_v6  ;;  %v2985_v4 = vmul.f32 %v184_v60, %v2617_v7  ;;  %v2995_v57 = vmul.f32 %v184_v60, %v2625_v9  ;;  %v2998_v6 = vstv %s2941_s10  ;;  %s2357_s10 = sld [smem:[#allocation7 + $0x1a]] }
 0x11c   :  { %v3001_v45 = vmul.f32 %v184_v60, %v2631_v10  ;;  %v3007_v7 = vstv %s2945_s13  ;;  %v3019_v9 = vmul.f32 %v284_v55, %v2673_v13  ;;  %v3025_v10 = vstv %s2953_s15  ;;  %s3810_s13 = sld [smem:[#allocation7 + $0x1d]] }
 0x11d   :  { %v2959_v63 = vpop.permute.xlu1 %413  ;;  %v2961_v54 = vpop.permute.xlu0 %399  ;;  %5611 = vst [vmem:[#allocation56_spill] sm:$0xff] %v2979_v1  ;;  %v3004_v1 = vstv %s2943_s11  ;;  %s2358_s11 = sld [smem:[#allocation7 + $0x1b]] }
 0x11e   :  { %5609 = vst [vmem:[#allocation54_spill] sm:$0xff] %v2959_v63  ;;  %5610 = vst [vmem:[#allocation55_spill] sm:$0xff] %v2961_v54  ;;  %v89_v54 = vmul.f32 %v84_v51, %v2572_v5  ;;  %v2972_v63 = vstv %s2334_s6  ;;  %v2988_v5 = vmul.f32 %v184_v60, %v2623_v8  ;;  %v3010_v8 = vmul.f32 %v284_v55, %v2665_v11  ;;  %s2361_s6 = sld [smem:[#allocation7 + $0x1e]] }
 0x11f   :  { %5615 = vst [vmem:[#allocation60_spill] sm:$0xff] %v3001_v45  ;;  %5618 = vst [vmem:[#allocation63_spill] sm:$0xff] %v3019_v9  ;;  %v384_v60 = vstv %s2955_s16  ;;  %v104_v45 = vmul.f32 %v101_v58, %v2711_v16  ;;  %v102_v11 = vmul.f32 %v101_v58, %v2713_v17  ;;  %v3045_v9 = vstv %s2964_s20  ;;  %s3818_s15 = sld [smem:[#allocation7 + $0x20]] }
 0x120   :  { %5612 = vst [vmem:[#allocation57_spill] sm:$0xff] %v2988_v5  ;;  %5616 = vst [vmem:[#allocation61_spill] sm:$0xff] %v3010_v8  ;;  %v3022_v5 = vmul.f32 %v284_v55, %v2675_v14  ;;  %v3031_v8 = vmul.f32 %v284_v55, %v2681_v15  ;;  %v105_v14 = vmul.f32 %v101_v58, %v2723_v20  ;;  %v3054_v17 = vstv %s2969_s21  ;;  %s3820_s16 = sld [smem:[#allocation7 + $0x21]] }
 0x121   :  { %v2990_v51 = vpop.permute.xlu1 %417  ;;  %v2992_v50 = vpop.permute.xlu0 %415  ;;  %v3048_v16 = vmul.f32 %v384_v60, %v2719_v18  ;;  %v124_v15 = vmul.f32 %v123_v61, %v2735_v24  ;;  %v106_v20 = vmul.f32 %v101_v58, %v2737_v25  ;;  %v3069_v18 = vstv %s2976_s22  ;;  %s3824_s20 = sld [smem:[#allocation7 + $0x24]] }
 0x122   :  { %5613 = vst [vmem:[#allocation58_spill] sm:$0xff] %v2990_v51  ;;  %5614 = vst [vmem:[#allocation59_spill] sm:$0xff] %v2992_v50  ;;  %v3013_v51 = vstv %s2951_s14  ;;  %v3016_v50 = vmul.f32 %v284_v55, %v2667_v12  ;;  %v3057_v55 = vmul.f32 %v384_v60, %v2721_v19  ;;  %v109_v24 = vadd.f32 %v104_v45, %v87_v56  ;;  %s3812_s14 = sld [smem:[#allocation7 + $0x1f]] }
 0x123   :  { %5617 = vst [vmem:[#allocation62_spill] sm:$0xff] %v3013_v51  ;;  %5619 = vst [vmem:[#allocation64_spill] sm:$0xff] %v3022_v5  ;;  %v3034_v51 = vstv %s2957_s17  ;;  %v103_v5 = vmul.f32 %v101_v58, %v2725_v21  ;;  %v3066_v21 = vmul.f32 %v384_v60, %v2733_v23  ;;  %v126_v19 = vmul.f32 %v123_v61, %v2745_v27  ;;  %s3822_s17 = sld [smem:[#allocation7 + $0x22]] }
 0x124   :  { %5622 = vst [vmem:[#allocation67_spill] sm:$0xff] %v3048_v16  ;;  %5623 = vst [vmem:[#allocation68_spill] sm:$0xff] %v3057_v55  ;;  %v107_v16 = vadd.f32 %v102_v11, %v85_v62  ;;  %v125_v55 = vmul.f32 %v123_v61, %v2747_v28  ;;  %v110_v23 = vadd.f32 %v105_v14, %v88_v59  ;;  %v60_v28 = vlaneseq  ;;  %s3830_s21 = sld [smem:[#allocation7 + $0x25]] }
 0x125   :  { %v3036_v12 = vpop.permute.xlu1 %421  ;;  %v3038_v13 = vpop.permute.xlu0 %419  ;;  %v108_v25 = vadd.f32 %v103_v5, %v86_v2  ;;  %v127_v58 = vmul.f32 %v123_v61, %v2755_v30  ;;  %v128_v56 = vmul.f32 %v123_v61, %v2753_v29  ;;  %v147_v27 = vmul.f32 %v2972_v63, %v2761_v31  ;;  %s3835_s22 = sld [smem:[#allocation7 + $0x26]] }
 0x126   :  { %5620 = vst [vmem:[#allocation65_spill] sm:$0xff] %v3036_v12  ;;  %5621 = vst [vmem:[#allocation66_spill] sm:$0xff] %v3038_v13  ;;  %v3060_v12 = vmul.f32 %v384_v60, %v2731_v22  ;;  %v3072_v13 = vmul.f32 %v384_v60, %v2743_v26  ;;  %v146_v26 = vmul.f32 %v2972_v63, %v2763_v32  ;;  %v3097_v61 = vstv %s3040_s1  ;;  %s3846_s1 = sld [smem:[#allocation7 + $0x27]] }
 0x127   :  { %v129_v45 = vadd.f32 %v124_v15, %v107_v16  ;;  %v111_v62 = vadd.f32 %v106_v20, %v89_v54  ;;  %v149_v60 = vmul.f32 %v2972_v63, %v2769_v33  ;;  %v148_v59 = vmul.f32 %v2972_v63, %v2771_v34 }
 0x128   :  { %5624 = vst [vmem:[#allocation69_spill] sm:$0xff] %v3060_v12  ;;  %v168_v30 = vmul.f32 %v2974_v0, %v2777_v35  ;;  %v131_v32 = vadd.f32 %v126_v19, %v109_v24  ;;  %v130_v2 = vadd.f32 %v125_v55, %v108_v25  ;;  %v150_v29 = vmul.f32 %v2972_v63, %v2779_v36 }
 0x129   :  { %v3076_v22 = vpop.permute.xlu1 %437  ;;  %v3078_v12 = vpop.permute.xlu0 %435  ;;  %v132_v5 = vadd.f32 %v127_v58, %v110_v23  ;;  %v151_v33 = vadd.f32 %v146_v26, %v129_v45  ;;  %v170_v34 = vmul.f32 %v2974_v0, %v2785_v37  ;;  %v3106_v11 = vstv %s3050_s23  ;;  %s3857_s23 = sld [smem:[#allocation7 + $0x29]] }
 0x12a   :  { %v133_v35 = vadd.f32 %v128_v56, %v111_v62  ;;  %v152_v14 = vadd.f32 %v147_v27, %v130_v2  ;;  %v3109_v16 = vstv %s3062_s24  ;;  %v3111_v15 = vand.u32 127, %v60_v28  ;;  %s3899_s24 = sld [smem:[#allocation7 + $0x2a]] }
 0x12b   :  { %v154_v36 = vadd.f32 %v149_v60, %v132_v5  ;;  %v153_v63 = vadd.f32 %v148_v59, %v131_v32  ;;  %v3113_v55 = vadd.f32 %v168_v30, %v151_v33  ;;  %v169_v20 = vmul.f32 %v2974_v0, %v2787_v38  ;;  %v5632_v30 = vld [vmem:[#allocation15_spill] sm:$0xff]  ;;  %v5636_v33 = vld [vmem:[#allocation16_spill] sm:$0xff] }
 0x12c   :  { %5625 = vst [vmem:[#allocation70_spill] sm:$0xff] %v3111_v15  ;;  %v155_v24 = vadd.f32 %v150_v29, %v133_v35  ;;  %v3123_v37 = vmul.f32 %v3106_v11, %v2809_v43  ;;  %v3126_v25 = vstv %s3080_s25  ;;  %v3130_v58 = vmul.f32 %v3106_v11, %v2811_v44  ;;  %v5637_v35 = vld [vmem:[#allocation20_spill] sm:$0xff]  ;;  %s3938_s25 = sld [smem:[#allocation7 + $0x2b]] }
 0x12d   :  { %v3099_v31 = vpop.permute.xlu1 %441  ;;  %v3101_v54 = vpop.permute.xlu0 %439  ;;  %v3132_v26 = vadd.f32 %v170_v34, %v153_v63  ;;  %v172_v38 = vmul.f32 %v2974_v0, %v2793_v39  ;;  %v171_v45 = vmul.f32 %v2974_v0, %v2795_v40  ;;  %v202_v56 = vmul.f32 %v2982_v3, %v2803_v42 }
 0x12e   :  { %v203_v43 = vmul.f32 %v2982_v3, %v2801_v41  ;;  %v204_v27 = vmul.f32 %v2982_v3, %v2815_v46  ;;  %vm613_vm0 = vcmp.ge.s32.totalorder %v3111_v15, 4  ;;  %vm614_vm1 = vcmp.lt.s32.totalorder %v3111_v15, 24 }
 0x12f   :  { %v3148_v44 = vadd.f32 %v169_v20, %v152_v14  ;;  %v224_v39 = vmul.f32 %v2998_v6, %v2825_v49  ;;  %vm616_vm2 = vcmp.ge.s32.totalorder %v3111_v15, 40  ;;  %vm617_vm3 = vcmp.lt.s32.totalorder %v3111_v15, 60  ;;  %vm3185_vm4 = vmand %vm613_vm0, %vm614_vm1  ;;  %v5638_v14 = vld [vmem:[#allocation23_spill] sm:$0xff] }
 0x130   :  { %v226_v40 = vmul.f32 %v2998_v6, %v2835_v52  ;;  %v225_v41 = vmul.f32 %v2998_v6, %v2837_v53  ;;  %v3164_v0 = vmul.f32 %v3106_v11, %v2821_v47  ;;  %v3168_v49 = vmul.f32 %v3106_v11, %v2823_v48  ;;  %v5631_v48 = vld [vmem:[#allocation56_spill] sm:$0xff]  ;;  %vm3201_vm5 = vmand %vm616_vm2, %vm617_vm3 }
 0x131   :  { %v3117_v19 = vpop.permute.xlu1 %457  ;;  %v3119_v23 = vpop.permute.xlu0 %443  ;;  %v3172_v62 = vadd.f32 %v172_v38, %v155_v24  ;;  %v3174_v52 = vadd.f32 %v171_v45, %v154_v36  ;;  %v207_v53 = vadd.f32 %v202_v56, %v2985_v4  ;;  %v3179_v60 = vshrl.u32 %v60_v28, 7  ;;  %v5633_v4 = vld [vmem:[#allocation21_spill] sm:$0xff]  ;;  %v5639_v24 = vld [vmem:[#allocation19_spill] sm:$0xff]  ;;  %v5640_v45 = vld [vmem:[#allocation24_spill] sm:$0xff] }
 0x132   :  { %v208_v59 = vadd.f32 %v203_v43, %v5631_v48  ;;  %v205_v32 = vmul.f32 %v2982_v3, %v5632_v30  ;;  %v209_v2 = vadd.f32 %v204_v27, %v2995_v57  ;;  %v246_v29 = vmul.f32 %v3004_v1, %v5633_v4  ;;  %v5643_v30 = vld [vmem:[#allocation27_spill] sm:$0xff]  ;;  %vm619_vm7 = vmor %vm3185_vm4, %vm3201_vm5  ;;  %v5645_v4 = vld [vmem:[#allocation22_spill] sm:$0xff] }
 0x133   :  { %5626 = vst [vmem:[#allocation71_spill] sm:$0xff] %v3172_v62  ;;  %5627 = vst [vmem:[#allocation72_spill] sm:$0xff] %v3174_v52  ;;  %v229_v5 = vadd.f32 %v224_v39, %v207_v53  ;;  %v206_v34 = vmul.f32 %v2982_v3, %v5636_v33  ;;  %v247_v57 = vmul.f32 %v3004_v1, %v5637_v35  ;;  %v5641_v3 = vld [vmem:[#allocation18_spill] sm:$0xff]  ;;  %vm598_vm6 = vcmp.ge.s32.totalorder %v3179_v60, 4  ;;  %v5646_v35 = vld [vmem:[#allocation60_spill] sm:$0xff] }
 0x134   :  { %5628 = vst [vmem:[#allocation73_spill] sm:$0xff] %v3179_v60  ;;  %v248_v36 = vmul.f32 %v3004_v1, %v5638_v14  ;;  %v231_v63 = vadd.f32 %v226_v40, %v209_v2  ;;  %v230_v20 = vadd.f32 %v225_v41, %v208_v59  ;;  %v227_v38 = vmul.f32 %v2998_v6, %v5639_v24  ;;  %v5642_v53 = vld [vmem:[#allocation26_spill] sm:$0xff]  ;;  %v5644_v41 = vld [vmem:[#allocation57_spill] sm:$0xff]  ;;  %vm620_vm8 = vmand %vm598_vm6, %vm619_vm7 }
 0x135   :  { %v3158_v42 = vpop.permute.xlu1 %461  ;;  %v3160_v46 = vpop.permute.xlu0 %459  ;;  %v268_v56 = vmul.f32 %v3007_v7, %v5640_v45  ;;  %v228_v39 = vmul.f32 %v2998_v6, %v5641_v3  ;;  %v270_v48 = vmul.f32 %v3007_v7, %v5642_v53  ;;  %v269_v40 = vmul.f32 %v3007_v7, %v5643_v30  ;;  %v5647_v3 = vld [vmem:[#allocation17_spill] sm:$0xff]  ;;  %v5667_v60 = vld [vmem:[#allocation39_spill] sm:$0xff] }
 0x136   :  { %v210_v59 = vadd.f32 %v205_v32, %v5644_v41  ;;  %v251_v2 = vadd.f32 %v246_v29, %v229_v5  ;;  %v249_v6 = vmul.f32 %v3004_v1, %v5645_v4  ;;  %v3234_v33 = vstv %s3144_s26  ;;  %v5648_v52 = vld [vmem:[#allocation25_spill] sm:$0xff]  ;;  %s3950_s26 = sld [smem:[#allocation7 + $0x2c]] }
 0x137   :  { %v211_v14 = vadd.f32 %v206_v34, %v5646_v35  ;;  %v252_v24 = vadd.f32 %v247_v57, %v230_v20  ;;  %v253_v45 = vadd.f32 %v248_v36, %v231_v63  ;;  %v3239_v53 = vmul.f32 %v3106_v11, %v5647_v3  ;;  %v5653_v35 = vld [vmem:[#allocation31_spill] sm:$0xff] }
 0x138   :  { %v232_v30 = vadd.f32 %v227_v38, %v210_v59  ;;  %v273_v15 = vadd.f32 %v268_v56, %v251_v2  ;;  %v250_v32 = vmul.f32 %v3004_v1, %v5648_v52  ;;  %v626_v34 = vstv %s3170_s0  ;;  %v5649_v1 = vld [vmem:[#allocation28_spill] sm:$0xff]  ;;  %v5650_v38 = vld [vmem:[#allocation29_spill] sm:$0xff]  ;;  %v5651_v59 = vld [vmem:[#allocation30_spill] sm:$0xff]  ;;  %s3969_s0 = sld [smem:[#allocation7 + $0x2e]] }
 0x139   :  { %v3215_v43 = vpop.permute.xlu1 %465  ;;  %v3217_v27 = vpop.permute.xlu0 %463  ;;  %v233_v11 = vadd.f32 %v228_v39, %v211_v14  ;;  %v275_v57 = vadd.f32 %v270_v48, %v253_v45  ;;  %v274_v36 = vadd.f32 %v269_v40, %v252_v24  ;;  %v3256_v63 = vstv %s3177_s30  ;;  %v5652_v2 = vld [vmem:[#allocation62_spill] sm:$0xff]  ;;  %v5657_v24 = vld [vmem:[#allocation33_spill] sm:$0xff]  ;;  %s4012_s30 = sld [smem:[#allocation7 + $0x2f]] }
 0x13a   :  { %v254_v20 = vadd.f32 %v249_v6, %v232_v30  ;;  %v272_v52 = vmul.f32 %v3007_v7, %v5649_v1  ;;  %v271_v56 = vmul.f32 %v3007_v7, %v5650_v38  ;;  %v3263_v41 = vstv %s3195_s4  ;;  %v5656_v6 = vld [vmem:[#allocation32_spill] sm:$0xff]  ;;  %s4024_s4 = sld [smem:[#allocation8 + $0x1]] }
 0x13b   :  { %v303_v4 = vmul.f32 %v5652_v2, %v5651_v59  ;;  %v302_v3 = vmul.f32 %v5652_v2, %v5653_v35  ;;  %v3269_v39 = vsel %vm620_vm8, %v626_v34, 0.0  ;;  %v3276_v48 = vsel %vm619_vm7, %v626_v34, 0.0  ;;  %v5659_v34 = vld [vmem:[#allocation34_spill] sm:$0xff]  ;;  %v5663_v59 = vld [vmem:[#allocation36_spill] sm:$0xff] }
 0x13c   :  { %5654 = vst [vmem:[#allocation56_spill] sm:$0xff] %v3269_v39  ;;  %5655 = vst [vmem:[#allocation15_spill] sm:$0xff] %v3276_v48  ;;  %v3279_v40 = vadd.f32 %v273_v15, %v3113_v55  ;;  %v255_v7 = vadd.f32 %v250_v32, %v233_v11  ;;  %v305_v14 = vmul.f32 %v5652_v2, %v5656_v6  ;;  %v5660_v55 = vld [vmem:[#allocation35_spill] sm:$0xff]  ;;  %v5664_v6 = vld [vmem:[#allocation37_spill] sm:$0xff] }
 0x13d   :  { %v3243_v29 = vpop.permute.xlu1 %493  ;;  %v3245_v5 = vpop.permute.xlu0 %491  ;;  %v304_v45 = vmul.f32 %v5652_v2, %v5657_v24  ;;  %v3290_v47 = vadd.f32 %v275_v57, %v3132_v26  ;;  %v3293_v28 = vadd.f32 %v274_v36, %v3148_v44  ;;  %v324_v15 = vmul.f32 %v3025_v10, %v5659_v34  ;;  %v5665_v57 = vld [vmem:[#allocation61_spill] sm:$0xff]  ;;  %v5666_v36 = vld [vmem:[#allocation38_spill] sm:$0xff]  ;;  %v5671_v48 = vld [vmem:[#allocation51_spill] sm:$0xff] }
 0x13e   :  { %v306_v32 = vmul.f32 %v5652_v2, %v5660_v55  ;;  %v3299_v11 = vadd.f32 %v272_v52, %v255_v7  ;;  %v3301_v38 = vadd.f32 %v271_v56, %v254_v20  ;;  %v326_v35 = vmul.f32 %v3025_v10, %v5663_v59  ;;  %v5668_v52 = vld [vmem:[#allocation63_spill] sm:$0xff]  ;;  %v5669_v20 = vld [vmem:[#allocation64_spill] sm:$0xff] }
 0x13f   :  { %5658 = vst [vmem:[#allocation21_spill] sm:$0xff] %v3293_v28  ;;  %v325_v26 = vmul.f32 %v3025_v10, %v5664_v6  ;;  %v308_v24 = vadd.f32 %v303_v4, %v5665_v57  ;;  %v307_v44 = vadd.f32 %v302_v3, %v3016_v50  ;;  %v328_v34 = vmul.f32 %v3025_v10, %v5666_v36  ;;  %v5670_v55 = vld [vmem:[#allocation40_spill] sm:$0xff]  ;;  %v5672_v57 = vld [vmem:[#allocation41_spill] sm:$0xff] }
 0x140   :  { %5661 = vst [vmem:[#allocation16_spill] sm:$0xff] %v3299_v11  ;;  %5662 = vst [vmem:[#allocation20_spill] sm:$0xff] %v3301_v38  ;;  %v327_v2 = vmul.f32 %v3025_v10, %v5667_v60  ;;  %v310_v7 = vadd.f32 %v305_v14, %v5668_v52  ;;  %v309_v56 = vadd.f32 %v304_v45, %v5669_v20  ;;  %v5673_v60 = vld [vmem:[#allocation42_spill] sm:$0xff]  ;;  %v5674_v52 = vld [vmem:[#allocation43_spill] sm:$0xff] }
 0x141   :  { %v3285_v30 = vpop.permute.xlu1 %497  ;;  %v3287_v1 = vpop.permute.xlu0 %495  ;;  %v347_v59 = vmul.f32 %v3034_v51, %v5670_v55  ;;  %v402_v6 = vmul.f32 %v3054_v17, %v5671_v48  ;;  %v329_v50 = vadd.f32 %v324_v15, %v307_v44  ;;  %v311_v3 = vadd.f32 %v306_v32, %v3031_v8  ;;  %v5675_v55 = vld [vmem:[#allocation54_spill] sm:$0xff]  ;;  %v5676_v28 = vld [vmem:[#allocation44_spill] sm:$0xff]  ;;  %v5677_v8 = vld [vmem:[#allocation45_spill] sm:$0xff] }
 0x142   :  { %v346_v10 = vmul.f32 %v3034_v51, %v5672_v57  ;;  %v349_v14 = vmul.f32 %v3034_v51, %v5673_v60  ;;  %v331_v45 = vadd.f32 %v326_v35, %v309_v56  ;;  %v330_v36 = vadd.f32 %v325_v26, %v308_v24  ;;  %v5678_v57 = vld [vmem:[#allocation68_spill] sm:$0xff]  ;;  %v5679_v60 = vld [vmem:[#allocation53_spill] sm:$0xff] }
 0x143   :  { %v348_v20 = vmul.f32 %v3034_v51, %v5674_v52  ;;  %v424_v48 = vmul.f32 %v3069_v18, %v5675_v55  ;;  %v333_v11 = vadd.f32 %v328_v34, %v311_v3  ;;  %v332_v62 = vadd.f32 %v327_v2, %v310_v7  ;;  %v5680_v7 = vld [vmem:[#allocation46_spill] sm:$0xff] }
 0x144   :  { %v368_v15 = vmul.f32 %v3045_v9, %v5676_v28  ;;  %v350_v32 = vmul.f32 %v3034_v51, %v5677_v8  ;;  %v352_v44 = vadd.f32 %v347_v59, %v330_v36  ;;  %v407_v39 = vadd.f32 %v402_v6, %v5678_v57  ;;  %v5681_v3 = vld [vmem:[#allocation50_spill] sm:$0xff]  ;;  %v5683_v57 = vld [vmem:[#allocation47_spill] sm:$0xff] }
 0x145   :  { %v3319_v38 = vpop.permute.xlu1 %513  ;;  %v3321_v4 = vpop.permute.xlu0 %499  ;;  %v404_v35 = vmul.f32 %v3054_v17, %v5679_v60  ;;  %v446_v26 = vmul.f32 %v3097_v61, %v3078_v12  ;;  %v351_v34 = vadd.f32 %v346_v10, %v329_v50  ;;  %v354_v2 = vadd.f32 %v349_v14, %v332_v62  ;;  %v5682_v6 = vld [vmem:[#allocation58_spill] sm:$0xff]  ;;  %v5684_v62 = vld [vmem:[#allocation59_spill] sm:$0xff]  ;;  %v5685_v14 = vld [vmem:[#allocation52_spill] sm:$0xff] }
 0x146   :  { %v370_v28 = vmul.f32 %v3045_v9, %v5680_v7  ;;  %v403_v51 = vmul.f32 %v3054_v17, %v5681_v3  ;;  %v353_v59 = vadd.f32 %v348_v20, %v331_v45  ;;  %v429_v36 = vadd.f32 %v424_v48, %v407_v39 }
 0x147   :  { %v426_v52 = vmul.f32 %v3069_v18, %v5682_v6  ;;  %v468_v55 = vmul.f32 %v3109_v16, %v3117_v19  ;;  %v373_v12 = vadd.f32 %v368_v15, %v351_v34  ;;  %v355_v8 = vadd.f32 %v350_v32, %v333_v11  ;;  %v5686_v15 = vld [vmem:[#allocation67_spill] sm:$0xff] }
 0x148   :  { %v369_v50 = vmul.f32 %v3045_v9, %v5683_v57  ;;  %v425_v10 = vmul.f32 %v3069_v18, %v5684_v62  ;;  %v405_v60 = vmul.f32 %v3054_v17, %v5685_v14  ;;  %v409_v45 = vadd.f32 %v404_v35, %v3066_v21  ;;  %v5687_v32 = vld [vmem:[#allocation55_spill] sm:$0xff]  ;;  %v5688_v57 = vld [vmem:[#allocation66_spill] sm:$0xff] }
 0x149   :  { %v3341_v24 = vpop.permute.xlu1 %517  ;;  %v516_v56 = vpop.permute.xlu0 %515  ;;  %v451_v39 = vadd.f32 %v446_v26, %v429_v36  ;;  %v448_v20 = vmul.f32 %v3097_v61, %v3101_v54  ;;  %v375_v19 = vadd.f32 %v370_v28, %v353_v59  ;;  %v408_v11 = vadd.f32 %v403_v51, %v5686_v15  ;;  %v5689_v54 = vld [vmem:[#allocation48_spill] sm:$0xff]  ;;  %v5690_v59 = vld [vmem:[#allocation65_spill] sm:$0xff] }
 0x14a   :  { %v406_v34 = vmul.f32 %v3054_v17, %v5687_v32  ;;  %v447_v3 = vmul.f32 %v3097_v61, %v3076_v22  ;;  %v431_v6 = vadd.f32 %v426_v52, %v409_v45  ;;  %v427_v62 = vmul.f32 %v3069_v18, %v5688_v57  ;;  %v5691_v36 = vld [vmem:[#allocation49_spill] sm:$0xff] }
 0x14b   :  { %v473_v21 = vadd.f32 %v468_v55, %v451_v39  ;;  %v470_v35 = vmul.f32 %v3109_v16, %v3158_v42  ;;  %v372_v26 = vmul.f32 %v3045_v9, %v5689_v54  ;;  %v430_v28 = vadd.f32 %v425_v10, %v408_v11  ;;  %v5692_v52 = vld [vmem:[#allocation69_spill] sm:$0xff] }
 0x14c   :  { %v428_v51 = vmul.f32 %v3069_v18, %v5690_v59  ;;  %v469_v17 = vmul.f32 %v3109_v16, %v3160_v46  ;;  %v371_v22 = vmul.f32 %v3045_v9, %v5691_v36  ;;  %v410_v14 = vadd.f32 %v405_v60, %v5692_v52 }
 0x14d   :  { %v522_v48 = vpop.permute.xlu1 %521  ;;  %v520_v7 = vpop.permute.xlu0 %519  ;;  %v449_v55 = vmul.f32 %v3097_v61, %v3099_v31  ;;  %v453_v45 = vadd.f32 %v448_v20, %v431_v6  ;;  %v411_v15 = vadd.f32 %v406_v34, %v3072_v13  ;;  %v452_v10 = vadd.f32 %v447_v3, %v430_v28 }
 0x14e   :  { %v450_v18 = vmul.f32 %v3097_v61, %v3119_v23  ;;  %v502_v46 = vmul.f32 %v3126_v25, %v3245_v5  ;;  %v374_v11 = vadd.f32 %v369_v50, %v352_v44  ;;  %v432_v32 = vadd.f32 %v427_v62, %v410_v14 }
 0x14f   :  { %v583_v9 = vadd.f32 %v473_v21, %v373_v12  ;;  %v475_v57 = vadd.f32 %v470_v35, %v453_v45  ;;  %v377_v60 = vadd.f32 %v372_v26, %v355_v8  ;;  %v433_v54 = vadd.f32 %v428_v51, %v411_v15 }
 0x150   :  { %v474_v59 = vadd.f32 %v469_v17, %v452_v10  ;;  %v524_v31 = vmul.f32 %v3234_v33, %v3319_v38  ;;  %v376_v20 = vadd.f32 %v371_v22, %v354_v2  ;;  %v454_v6 = vadd.f32 %v449_v55, %v432_v32 }
 0x151   :  { %v538_v42 = vpop.permute.xlu1 %537  ;;  %v536_v39 = vpop.permute.xlu0 %535  ;;  %v472_v13 = vmul.f32 %v3109_v16, %v3215_v43  ;;  %v503_v61 = vmul.f32 %v3126_v25, %v3243_v29  ;;  %v455_v44 = vadd.f32 %v450_v18, %v433_v54  ;;  %v507_v12 = vadd.f32 %v502_v46, %v3130_v58  ;;  %v5694_v46 = vld [vmem:[#allocation21_spill] sm:$0xff]  ;;  %v5697_v54 = vld [vmem:[#allocation72_spill] sm:$0xff] }
 0x152   :  { %v504_v8 = vmul.f32 %v3126_v25, %v3287_v1  ;;  %v546_v50 = vmul.f32 %v3256_v63, %v536_v39  ;;  %v585_v34 = vadd.f32 %v475_v57, %v375_v19  ;;  %v471_v38 = vmul.f32 %v3109_v16, %v3217_v27 }
 0x153   :  { %v525_v2 = vmul.f32 %v3234_v33, %v516_v56  ;;  %v588_v43 = vadd.f32 %v583_v9, %v3279_v40  ;;  %v584_v3 = vadd.f32 %v474_v59, %v374_v11  ;;  %v505_v29 = vmul.f32 %v3126_v25, %v3285_v30  ;;  %v5696_v9 = vld [vmem:[#allocation16_spill] sm:$0xff] }
 0x154   :  { %v529_v62 = vadd.f32 %v524_v31, %v507_v12  ;;  %v526_v58 = vmul.f32 %v3234_v33, %v3341_v24  ;;  %v477_v21 = vadd.f32 %v472_v13, %v455_v44  ;;  %v508_v1 = vadd.f32 %v503_v61, %v3123_v37  ;;  %v5698_v59 = vld [vmem:[#allocation20_spill] sm:$0xff] }
 0x155   :  { %v542_v23 = vpop.permute.xlu1 %541  ;;  %v540_v5 = vpop.permute.xlu0 %539  ;;  %v506_v19 = vmul.f32 %v3126_v25, %v3321_v4  ;;  %v547_v16 = vmul.f32 %v3256_v63, %v538_v42  ;;  %v509_v40 = vadd.f32 %v504_v8, %v3168_v49  ;;  %v476_v28 = vadd.f32 %v471_v38, %v454_v6 }
 0x156   :  { %v551_v35 = vadd.f32 %v546_v50, %v529_v62  ;;  %v548_v26 = vmul.f32 %v3256_v63, %v540_v5  ;;  %v530_v51 = vadd.f32 %v525_v2, %v508_v1  ;;  %v528_v24 = vmul.f32 %v3234_v33, %v522_v48  ;;  %v5699_v50 = vld [vmem:[#allocation15_spill] sm:$0xff] }
 0x157   :  { %v527_v37 = vmul.f32 %v3234_v33, %v520_v7  ;;  %v510_v17 = vadd.f32 %v505_v29, %v3164_v0  ;;  %v531_v25 = vadd.f32 %v526_v58, %v509_v40  ;;  %v590_v36 = vadd.f32 %v585_v34, %v3290_v47  ;;  %v5693_v47 = vld [vmem:[#allocation56_spill] sm:$0xff] }
 0x158   :  { %v511_v22 = vadd.f32 %v506_v19, %v3239_v53  ;;  %v552_v49 = vadd.f32 %v547_v16, %v530_v51  ;;  %v549_v52 = vmul.f32 %v3256_v63, %v542_v23  ;;  %v587_v0 = vadd.f32 %v477_v21, %v377_v60 }
 0x159   :  { %v558_v27 = vpop.permute.xlu1 %557  ;;  %v544_v56 = vpop.permute.xlu0 %543  ;;  %v553_v42 = vadd.f32 %v548_v26, %v531_v25  ;;  %v586_v7 = vadd.f32 %v476_v28, %v376_v20  ;;  %v532_v10 = vadd.f32 %v527_v37, %v510_v17  ;;  %v589_v11 = vadd.f32 %v584_v3, %v5694_v46 }
 0x15a   :  { %v568_v30 = vmul.f32 %v3263_v41, %v558_v27  ;;  %v550_v14 = vmul.f32 %v3256_v63, %v544_v56  ;;  %v533_v15 = vadd.f32 %v528_v24, %v511_v22  ;;  %v5695_v63 = vld [vmem:[#allocation71_spill] sm:$0xff]  ;;  %v581_v31 = vadd.f32 %v5698_v59, %v5697_v54 }
 0x15b   :  { %v582_v57 = vadd.f32 %v5696_v9, %v5695_v63  ;;  %v554_v6 = vadd.f32 %v549_v52, %v532_v10 }
 0x15c   :  { %v573_v4 = vadd.f32 %v568_v30, %v551_v35  ;;  %v555_v13 = vadd.f32 %v550_v14, %v533_v15  ;;  %v591_v8 = vadd.f32 %v586_v7, %v581_v31 }
 0x15d   :  { %v562_v55 = vpop.permute.xlu1 %561  ;;  %v560_v45 = vpop.permute.xlu0 %559  ;;  %v592_v12 = vadd.f32 %v587_v0, %v582_v57 }
 0x15e   :  { %v593_v39 = vadd.f32 %v588_v43, %v573_v4  ;;  %v570_v48 = vmul.f32 %v3263_v41, %v562_v55  ;;  %v569_v33 = vmul.f32 %v3263_v41, %v560_v45 }
 0x160   :  { %v3420_v18 = vadd.f32 %v5693_v47, %v593_v39  ;;  %v575_v53 = vadd.f32 %v570_v48, %v553_v42  ;;  %v574_v32 = vadd.f32 %v569_v33, %v552_v49 }
 0x161   :  { %v566_v61 = vpop.permute.xlu1 %565  ;;  %v564_v60 = vpop.permute.xlu0 %563 }
 0x162   :  { %637 = vst [vmem:[#allocation2 + $0x4] sm:$0xff] %v3420_v18  ;;  %v595_v20 = vadd.f32 %v590_v36, %v575_v53  ;;  %v594_v23 = vadd.f32 %v589_v11, %v574_v32  ;;  %v572_v5 = vmul.f32 %v3263_v41, %v566_v61  ;;  %v571_v44 = vmul.f32 %v3263_v41, %v564_v60 }
 0x163   :  { %655 = vrot.lane.b32.xlu0 %v3420_v18, %s2523_s2 }
 0x164   :  { %v3433_v34 = vadd.f32 %v5699_v50, %v595_v20  ;;  %v3436_v38 = vadd.f32 %v5699_v50, %v594_v23  ;;  %v577_v2 = vadd.f32 %v572_v5, %v555_v13  ;;  %v576_v43 = vadd.f32 %v571_v44, %v554_v6 }
 0x166   :  { %639 = vst [vmem:[#allocation2 + $0x14] sm:$0xff] %v3433_v34  ;;  %638 = vst [vmem:[#allocation2 + $0xc] sm:$0xff] %v3436_v38  ;;  %v3440_v3 = vadd.f32 %v592_v12, %v577_v2  ;;  %v3442_v41 = vadd.f32 %v591_v8, %v576_v43  ;;  %657 = vrot.lane.b32.xlu1 %v3436_v38, %s2523_s2 }
 0x167   :  { %659 = vrot.lane.b32.xlu0 %v3433_v34, %s2523_s2 }
 0x168   :  { %641 = vst [vmem:[#allocation2 + $0x24] sm:$0xff] %v3440_v3  ;;  %640 = vst [vmem:[#allocation2 + $0x1c] sm:$0xff] %v3442_v41 }
 0x169   :  { %v3482_v29 = vld [vmem:[#allocation2 + $0x3] sm:$0xff] }
 0x16a   :  { %661 = vrot.lane.b32.xlu1 %v3442_v41, %s2523_s2  ;;  %v3532_v19 = vld [vmem:[#allocation2 + $0x2] sm:$0xff] }
 0x16b   :  { %663 = vrot.lane.b32.xlu0 %v3440_v3, %s2523_s2  ;;  %v3588_v28 = vld [vmem:[#allocation2 + $0x1] sm:$0xff] }
 0x16c   :  { %v3678_v11 = vld [vmem:[#allocation2] sm:$0xff] }
 0x16d   :  { %v3488_v62 = vld [vmem:[#allocation2 + $0xb] sm:$0xff]  ;;  %v3490_v58 = vld [vmem:[#allocation2 + $0x13] sm:$0xff] }
 0x16e   :  { %677 = vrot.lane.b32.xlu1 %v3420_v18, %s2524_s27  ;;  %v3538_v16 = vld [vmem:[#allocation2 + $0xa] sm:$0xff]  ;;  %v3540_v27 = vld [vmem:[#allocation2 + $0x12] sm:$0xff] }
 0x16f   :  { %679 = vrot.lane.b32.xlu0 %v3436_v38, %s2524_s27  ;;  %v3496_v21 = vld [vmem:[#allocation2 + $0x1b] sm:$0xff]  ;;  %v3498_v1 = vld [vmem:[#allocation2 + $0x23] sm:$0xff]  ;;  %v3600_v17 = vld [vmem:[#allocation2 + $0x11] sm:$0xff] }
 0x170   :  { %v3546_v56 = vld [vmem:[#allocation2 + $0x1a] sm:$0xff]  ;;  %v3548_v40 = vld [vmem:[#allocation2 + $0x22] sm:$0xff]  ;;  %v3690_v57 = vld [vmem:[#allocation2 + $0x10] sm:$0xff] }
 0x171   :  { %v3598_v37 = vld [vmem:[#allocation2 + $0x9] sm:$0xff]  ;;  %v3610_v36 = vld [vmem:[#allocation2 + $0x19] sm:$0xff]  ;;  %v3612_v22 = vld [vmem:[#allocation2 + $0x21] sm:$0xff] }
 0x172   :  { %681 = vrot.lane.b32.xlu1 %v3433_v34, %s2524_s27  ;;  %v3688_v9 = vld [vmem:[#allocation2 + $0x8] sm:$0xff]  ;;  %v3700_v31 = vld [vmem:[#allocation2 + $0x18] sm:$0xff]  ;;  %v3702_v6 = vld [vmem:[#allocation2 + $0x20] sm:$0xff] }
 0x173   :  { %683 = vrot.lane.b32.xlu0 %v3442_v41, %s2524_s27 }
 0x176   :  { %685 = vrot.lane.b32.xlu1 %v3440_v3, %s2524_s27 }
 0x177   :  { %699 = vrot.lane.b32.xlu0 %v3420_v18, %s2525_s28 }
 0x17a   :  { %701 = vrot.lane.b32.xlu1 %v3436_v38, %s2525_s28 }
 0x17b   :  { %703 = vrot.lane.b32.xlu0 %v3433_v34, %s2525_s28 }
 0x17e   :  { %705 = vrot.lane.b32.xlu1 %v3442_v41, %s2525_s28 }
 0x17f   :  { %707 = vrot.lane.b32.xlu0 %v3440_v3, %s2525_s28 }
 0x182   :  { %721 = vrot.lane.b32.xlu1 %v3420_v18, %s2526_s29 }
 0x183   :  { %723 = vrot.lane.b32.xlu0 %v3436_v38, %s2526_s29 }
 0x186   :  { %725 = vrot.lane.b32.xlu1 %v3433_v34, %s2526_s29 }
 0x187   :  { %727 = vrot.lane.b32.xlu0 %v3442_v41, %s2526_s29 }
 0x18a   :  { %729 = vrot.lane.b32.xlu1 %v3440_v3, %s2526_s29 }
 0x18b   :  { %755 = vrot.lane.b32.xlu0 %v3482_v29, %s2523_s2 }
 0x18e   :  { %757 = vrot.lane.b32.xlu1 %v3488_v62, %s2523_s2 }
 0x18f   :  { %759 = vrot.lane.b32.xlu0 %v3490_v58, %s2523_s2 }
 0x192   :  { %761 = vrot.lane.b32.xlu1 %v3496_v21, %s2523_s2 }
 0x193   :  { %763 = vrot.lane.b32.xlu0 %v3498_v1, %s2523_s2 }
 0x196   :  { %777 = vrot.lane.b32.xlu1 %v3482_v29, %s2524_s27 }
 0x197   :  { %779 = vrot.lane.b32.xlu0 %v3488_v62, %s2524_s27 }
 0x19a   :  { %781 = vrot.lane.b32.xlu1 %v3490_v58, %s2524_s27 }
 0x19b   :  { %783 = vrot.lane.b32.xlu0 %v3496_v21, %s2524_s27 }
 0x19e   :  { %785 = vrot.lane.b32.xlu1 %v3498_v1, %s2524_s27 }
 0x19f   :  { %799 = vrot.lane.b32.xlu0 %v3482_v29, %s2525_s28 }
 0x1a2   :  { %801 = vrot.lane.b32.xlu1 %v3488_v62, %s2525_s28 }
 0x1a3   :  { %803 = vrot.lane.b32.xlu0 %v3490_v58, %s2525_s28 }
 0x1a6   :  { %805 = vrot.lane.b32.xlu1 %v3496_v21, %s2525_s28 }
 0x1a7   :  { %807 = vrot.lane.b32.xlu0 %v3498_v1, %s2525_s28 }
 0x1aa   :  { %821 = vrot.lane.b32.xlu1 %v3482_v29, %s2526_s29 }
 0x1ab   :  { %823 = vrot.lane.b32.xlu0 %v3488_v62, %s2526_s29 }
 0x1ae   :  { %825 = vrot.lane.b32.xlu1 %v3490_v58, %s2526_s29 }
 0x1af   :  { %827 = vrot.lane.b32.xlu0 %v3496_v21, %s2526_s29 }
 0x1b2   :  { %829 = vrot.lane.b32.xlu1 %v3498_v1, %s2526_s29 }
 0x1b3   :  { %855 = vrot.lane.b32.xlu0 %v3532_v19, %s2523_s2 }
 0x1b6   :  { %857 = vrot.lane.b32.xlu1 %v3538_v16, %s2523_s2 }
 0x1b7   :  { %859 = vrot.lane.b32.xlu0 %v3540_v27, %s2523_s2 }
 0x1ba   :  { %861 = vrot.lane.b32.xlu1 %v3546_v56, %s2523_s2 }
 0x1bb   :  { %863 = vrot.lane.b32.xlu0 %v3548_v40, %s2523_s2 }
 0x1be   :  { %877 = vrot.lane.b32.xlu1 %v3532_v19, %s2524_s27 }
 0x1bf   :  { %879 = vrot.lane.b32.xlu0 %v3538_v16, %s2524_s27 }
 0x1c2   :  { %881 = vrot.lane.b32.xlu1 %v3540_v27, %s2524_s27 }
 0x1c3   :  { %883 = vrot.lane.b32.xlu0 %v3546_v56, %s2524_s27 }
 0x1c6   :  { %885 = vrot.lane.b32.xlu1 %v3548_v40, %s2524_s27 }
 0x1c7   :  { %899 = vrot.lane.b32.xlu0 %v3532_v19, %s2525_s28 }
 0x1ca   :  { %901 = vrot.lane.b32.xlu1 %v3538_v16, %s2525_s28 }
 0x1cb   :  { %903 = vrot.lane.b32.xlu0 %v3540_v27, %s2525_s28 }
 0x1ce   :  { %905 = vrot.lane.b32.xlu1 %v3546_v56, %s2525_s28 }
 0x1cf   :  { %907 = vrot.lane.b32.xlu0 %v3548_v40, %s2525_s28 }
 0x1d2   :  { %921 = vrot.lane.b32.xlu1 %v3532_v19, %s2526_s29 }
 0x1d3   :  { %923 = vrot.lane.b32.xlu0 %v3538_v16, %s2526_s29 }
 0x1d5   :  { %v3578_v35 = vpop.permute.xlu0 %655 }
 0x1d6   :  { %925 = vrot.lane.b32.xlu1 %v3540_v27, %s2526_s29 }
 0x1d7   :  { %927 = vrot.lane.b32.xlu0 %v3546_v56, %s2526_s29 }
 0x1d8   :  { %v3584_v26 = vpop.permute.xlu1 %657 }
 0x1d9   :  { %v3586_v30 = vpop.permute.xlu0 %659 }
 0x1da   :  { %929 = vrot.lane.b32.xlu1 %v3548_v40, %s2526_s29 }
 0x1db   :  { %955 = vrot.lane.b32.xlu0 %v3588_v28, %s2523_s2 }
 0x1dc   :  { %v3594_v51 = vpop.permute.xlu1 %661 }
 0x1dd   :  { %v3596_v24 = vpop.permute.xlu0 %663 }
 0x1de   :  { %957 = vrot.lane.b32.xlu1 %v3598_v37, %s2523_s2 }
 0x1df   :  { %959 = vrot.lane.b32.xlu0 %v3600_v17, %s2523_s2 }
 0x1e0   :  { %v3606_v25 = vpop.permute.xlu1 %677 }
 0x1e1   :  { %v3608_v4 = vpop.permute.xlu0 %679 }
 0x1e2   :  { %961 = vrot.lane.b32.xlu1 %v3610_v36, %s2523_s2 }
 0x1e3   :  { %963 = vrot.lane.b32.xlu0 %v3612_v22, %s2523_s2 }
 0x1e4   :  { %v3618_v49 = vpop.permute.xlu1 %681 }
 0x1e5   :  { %v3620_v52 = vpop.permute.xlu0 %683 }
 0x1e6   :  { %977 = vrot.lane.b32.xlu1 %v3588_v28, %s2524_s27 }
 0x1e7   :  { %979 = vrot.lane.b32.xlu0 %v3598_v37, %s2524_s27 }
 0x1e8   :  { %v3626_v14 = vpop.permute.xlu1 %685 }
 0x1e9   :  { %v3628_v55 = vpop.permute.xlu0 %699 }
 0x1ea   :  { %981 = vrot.lane.b32.xlu1 %v3600_v17, %s2524_s27 }
 0x1eb   :  { %983 = vrot.lane.b32.xlu0 %v3610_v36, %s2524_s27 }
 0x1ec   :  { %v3634_v45 = vpop.permute.xlu1 %701 }
 0x1ed   :  { %v3636_v42 = vpop.permute.xlu0 %703 }
 0x1ee   :  { %985 = vrot.lane.b32.xlu1 %v3612_v22, %s2524_s27 }
 0x1ef   :  { %999 = vrot.lane.b32.xlu0 %v3588_v28, %s2525_s28 }
 0x1f0   :  { %v3642_v39 = vpop.permute.xlu1 %705 }
 0x1f1   :  { %v3644_v48 = vpop.permute.xlu0 %707 }
 0x1f2   :  { %1001 = vrot.lane.b32.xlu1 %v3598_v37, %s2525_s28 }
 0x1f3   :  { %1003 = vrot.lane.b32.xlu0 %v3600_v17, %s2525_s28 }
 0x1f4   :  { %v3650_v33 = vpop.permute.xlu1 %721 }
 0x1f5   :  { %v3652_v0 = vpop.permute.xlu0 %723 }
 0x1f6   :  { %1005 = vrot.lane.b32.xlu1 %v3610_v36, %s2525_s28 }
 0x1f7   :  { %1007 = vrot.lane.b32.xlu0 %v3612_v22, %s2525_s28 }
 0x1f8   :  { %v3658_v7 = vpop.permute.xlu1 %725 }
 0x1f9   :  { %v3660_v15 = vpop.permute.xlu0 %727 }
 0x1fa   :  { %1021 = vrot.lane.b32.xlu1 %v3588_v28, %s2526_s29 }
 0x1fb   :  { %1023 = vrot.lane.b32.xlu0 %v3598_v37, %s2526_s29 }
 0x1fc   :  { %v3666_v10 = vpop.permute.xlu1 %729 }
 0x1fd   :  { %5700 = vst [vmem:[#allocation23_spill] sm:$0xff] %v3666_v10  ;;  %v3668_v47 = vpop.permute.xlu0 %755 }
 0x1fe   :  { %1025 = vrot.lane.b32.xlu1 %v3600_v17, %s2526_s29 }
 0x1ff   :  { %1027 = vrot.lane.b32.xlu0 %v3610_v36, %s2526_s29 }
 0x200   :  { %v3674_v53 = vpop.permute.xlu1 %757 }
 0x201   :  { %v3676_v46 = vpop.permute.xlu0 %759 }
 0x202   :  { %1029 = vrot.lane.b32.xlu1 %v3612_v22, %s2526_s29 }
 0x203   :  { %1055 = vrot.lane.b32.xlu0 %v3678_v11, %s2523_s2 }
 0x204   :  { %v3684_v32 = vpop.permute.xlu1 %761 }
 0x205   :  { %v3686_v63 = vpop.permute.xlu0 %763 }
 0x206   :  { %5701 = vst [vmem:[#allocation19_spill] sm:$0xff] %v3686_v63  ;;  %1057 = vrot.lane.b32.xlu1 %v3688_v9, %s2523_s2 }
 0x207   :  { %1059 = vrot.lane.b32.xlu0 %v3690_v57, %s2523_s2 }
 0x208   :  { %v3696_v54 = vpop.permute.xlu1 %777 }
 0x209   :  { %v3698_v59 = vpop.permute.xlu0 %779 }
 0x20a   :  { %1061 = vrot.lane.b32.xlu1 %v3700_v31, %s2523_s2 }
 0x20b   :  { %1063 = vrot.lane.b32.xlu0 %v3702_v6, %s2523_s2 }
 0x20c   :  { %v3708_v13 = vpop.permute.xlu1 %781 }
 0x20d   :  { %5702 = vst [vmem:[#allocation24_spill] sm:$0xff] %v3708_v13  ;;  %v3710_v61 = vpop.permute.xlu0 %783 }
 0x20e   :  { %5703 = vst [vmem:[#allocation18_spill] sm:$0xff] %v3710_v61  ;;  %1077 = vrot.lane.b32.xlu1 %v3678_v11, %s2524_s27  ;;  %v687_v61 = vstv %s2358_s11  ;;  %s2402_s11 = sld [smem:[#allocation7 + $0x46]] }
 0x20f   :  { %1079 = vrot.lane.b32.xlu0 %v3688_v9, %s2524_s27 }
 0x210   :  { %v3716_v60 = vpop.permute.xlu1 %785 }
 0x211   :  { %5704 = vst [vmem:[#allocation26_spill] sm:$0xff] %v3716_v60  ;;  %v3718_v20 = vpop.permute.xlu0 %799 }
 0x212   :  { %5705 = vst [vmem:[#allocation27_spill] sm:$0xff] %v3718_v20  ;;  %1081 = vrot.lane.b32.xlu1 %v3690_v57, %s2524_s27 }
 0x213   :  { %1083 = vrot.lane.b32.xlu0 %v3700_v31, %s2524_s27 }
 0x214   :  { %v3724_v23 = vpop.permute.xlu1 %801 }
 0x215   :  { %5706 = vst [vmem:[#allocation57_spill] sm:$0xff] %v3724_v23  ;;  %v3726_v5 = vpop.permute.xlu0 %803 }
 0x216   :  { %5707 = vst [vmem:[#allocation22_spill] sm:$0xff] %v3726_v5  ;;  %1085 = vrot.lane.b32.xlu1 %v3702_v6, %s2524_s27 }
 0x217   :  { %1099 = vrot.lane.b32.xlu0 %v3678_v11, %s2525_s28 }
 0x218   :  { %v3732_v44 = vpop.permute.xlu1 %805 }
 0x219   :  { %5708 = vst [vmem:[#allocation60_spill] sm:$0xff] %v3732_v44  ;;  %v3734_v12 = vpop.permute.xlu0 %807 }
 0x21a   :  { %5709 = vst [vmem:[#allocation17_spill] sm:$0xff] %v3734_v12  ;;  %1101 = vrot.lane.b32.xlu1 %v3688_v9, %s2525_s28 }
 0x21b   :  { %1103 = vrot.lane.b32.xlu0 %v3690_v57, %s2525_s28 }
 0x21c   :  { %v3740_v8 = vpop.permute.xlu1 %821 }
 0x21d   :  { %5710 = vst [vmem:[#allocation25_spill] sm:$0xff] %v3740_v8  ;;  %v3742_v50 = vpop.permute.xlu0 %823 }
 0x21e   :  { %5711 = vst [vmem:[#allocation28_spill] sm:$0xff] %v3742_v50  ;;  %1105 = vrot.lane.b32.xlu1 %v3700_v31, %s2525_s28 }
 0x21f   :  { %1107 = vrot.lane.b32.xlu0 %v3702_v6, %s2525_s28 }
 0x220   :  { %v3748_v2 = vpop.permute.xlu1 %825 }
 0x221   :  { %5712 = vst [vmem:[#allocation29_spill] sm:$0xff] %v3748_v2  ;;  %v3750_v43 = vpop.permute.xlu0 %827 }
 0x222   :  { %5713 = vst [vmem:[#allocation30_spill] sm:$0xff] %v3750_v43  ;;  %1121 = vrot.lane.b32.xlu1 %v3678_v11, %s2526_s29 }
 0x223   :  { %1123 = vrot.lane.b32.xlu0 %v3688_v9, %s2526_s29 }
 0x224   :  { %v3756_v12 = vpop.permute.xlu1 %829 }
 0x225   :  { %5714 = vst [vmem:[#allocation62_spill] sm:$0xff] %v3756_v12  ;;  %v3758_v60 = vpop.permute.xlu0 %855 }
 0x226   :  { %5715 = vst [vmem:[#allocation31_spill] sm:$0xff] %v3758_v60  ;;  %1125 = vrot.lane.b32.xlu1 %v3690_v57, %s2526_s29 }
 0x227   :  { %1127 = vrot.lane.b32.xlu0 %v3700_v31, %s2526_s29 }
 0x228   :  { %v3764_v50 = vpop.permute.xlu1 %857 }
 0x229   :  { %5716 = vst [vmem:[#allocation32_spill] sm:$0xff] %v3764_v50  ;;  %v3766_v2 = vpop.permute.xlu0 %859 }
 0x22a   :  { %5717 = vst [vmem:[#allocation33_spill] sm:$0xff] %v3766_v2  ;;  %1129 = vrot.lane.b32.xlu1 %v3702_v6, %s2526_s29 }
 0x22c   :  { %v3770_v43 = vpop.permute.xlu1 %861 }
 0x22d   :  { %5718 = vst [vmem:[#allocation34_spill] sm:$0xff] %v3770_v43  ;;  %v3772_v8 = vpop.permute.xlu0 %863 }
 0x22e   :  { %5719 = vst [vmem:[#allocation35_spill] sm:$0xff] %v3772_v8 }
 0x230   :  { %v3774_v12 = vpop.permute.xlu1 %877 }
 0x231   :  { %5720 = vst [vmem:[#allocation36_spill] sm:$0xff] %v3774_v12  ;;  %v3776_v60 = vpop.permute.xlu0 %879 }
 0x232   :  { %5721 = vst [vmem:[#allocation37_spill] sm:$0xff] %v3776_v60 }
 0x234   :  { %v3778_v44 = vpop.permute.xlu1 %881 }
 0x235   :  { %5722 = vst [vmem:[#allocation61_spill] sm:$0xff] %v3778_v44  ;;  %v3780_v5 = vpop.permute.xlu0 %883 }
 0x236   :  { %5723 = vst [vmem:[#allocation38_spill] sm:$0xff] %v3780_v5 }
 0x238   :  { %v3782_v23 = vpop.permute.xlu1 %885 }
 0x239   :  { %5724 = vst [vmem:[#allocation39_spill] sm:$0xff] %v3782_v23  ;;  %v3784_v50 = vpop.permute.xlu0 %899 }
 0x23a   :  { %5725 = vst [vmem:[#allocation63_spill] sm:$0xff] %v3784_v50 }
 0x23c   :  { %v3786_v2 = vpop.permute.xlu1 %901 }
 0x23d   :  { %5726 = vst [vmem:[#allocation64_spill] sm:$0xff] %v3786_v2  ;;  %v3788_v63 = vpop.permute.xlu0 %903 }
 0x23e   :  { %5727 = vst [vmem:[#allocation40_spill] sm:$0xff] %v3788_v63 }
 0x240   :  { %v3790_v20 = vpop.permute.xlu1 %905 }
 0x241   :  { %5728 = vst [vmem:[#allocation51_spill] sm:$0xff] %v3790_v20  ;;  %v3792_v43 = vpop.permute.xlu0 %907 }
 0x242   :  { %5729 = vst [vmem:[#allocation41_spill] sm:$0xff] %v3792_v43 }
 0x244   :  { %v3794_v8 = vpop.permute.xlu1 %921 }
 0x245   :  { %5730 = vst [vmem:[#allocation42_spill] sm:$0xff] %v3794_v8  ;;  %v3796_v12 = vpop.permute.xlu0 %923  ;;  %v848_v8 = vstv %s2366_s7  ;;  %s2382_s7 = sld [smem:[#allocation7 + $0x32]] }
 0x246   :  { %5731 = vst [vmem:[#allocation43_spill] sm:$0xff] %v3796_v12  ;;  %v748_v12 = vstv %s2361_s6  ;;  %s4053_s6 = sld [smem:[#allocation7 + $0x31]] }
 0x247   :  { %v3844_v10 = vmul.f32 %v748_v12, %v3482_v29 }
 0x248   :  { %v3798_v60 = vpop.permute.xlu1 %925 }
 0x249   :  { %5732 = vst [vmem:[#allocation54_spill] sm:$0xff] %v3798_v60  ;;  %v3800_v44 = vpop.permute.xlu0 %927 }
 0x24a   :  { %5733 = vst [vmem:[#allocation44_spill] sm:$0xff] %v3800_v44 }
 0x24c   :  { %v3802_v23 = vpop.permute.xlu1 %929 }
 0x24d   :  { %5734 = vst [vmem:[#allocation45_spill] sm:$0xff] %v3802_v23  ;;  %v3804_v50 = vpop.permute.xlu0 %955  ;;  %v648_v23 = vstv %s2356_s5  ;;  %s4033_s5 = sld [smem:[#allocation7 + $0x30]] }
 0x24e   :  { %5735 = vst [vmem:[#allocation68_spill] sm:$0xff] %v3804_v50  ;;  %v665_v50 = vstv %s2357_s10  ;;  %v649_v63 = vmul.f32 %v648_v23, %v3420_v18  ;;  %v650_v2 = vmul.f32 %v648_v23, %v3436_v38  ;;  %v651_v5 = vmul.f32 %v648_v23, %v3433_v34  ;;  %s2397_s10 = sld [smem:[#allocation7 + $0x41]] }
 0x24f   :  { %v652_v13 = vmul.f32 %v648_v23, %v3442_v41  ;;  %v3849_v18 = vmul.f32 %v748_v12, %v3488_v62  ;;  %v3852_v34 = vmul.f32 %v848_v8, %v3532_v19  ;;  %v3870_v62 = vmul.f32 %v848_v8, %v3538_v16 }
 0x250   :  { %v3806_v20 = vpop.permute.xlu1 %957  ;;  %v3873_v19 = vmul.f32 %v848_v8, %v3540_v27  ;;  %v3891_v16 = vmul.f32 %v848_v8, %v3548_v40 }
 0x251   :  { %5736 = vst [vmem:[#allocation53_spill] sm:$0xff] %v3806_v20  ;;  %v3808_v43 = vpop.permute.xlu0 %959 }
 0x252   :  { %5737 = vst [vmem:[#allocation46_spill] sm:$0xff] %v3808_v43 }
 0x254   :  { %v3814_v44 = vpop.permute.xlu1 %961 }
 0x255   :  { %5738 = vst [vmem:[#allocation50_spill] sm:$0xff] %v3814_v44  ;;  %v3816_v60 = vpop.permute.xlu0 %963  ;;  %v948_v44 = vstv %s2371_s8  ;;  %s2387_s8 = sld [smem:[#allocation7 + $0x37]] }
 0x256   :  { %5739 = vst [vmem:[#allocation58_spill] sm:$0xff] %v3816_v60  ;;  %v1048_v60 = vstv %s2376_s9  ;;  %v3855_v38 = vmul.f32 %v948_v44, %v3588_v28  ;;  %v3876_v28 = vmul.f32 %v948_v44, %v3598_v37  ;;  %v3894_v27 = vmul.f32 %v948_v44, %v3610_v36  ;;  %s2392_s9 = sld [smem:[#allocation7 + $0x3c]] }
 0x257   :  { %v3864_v29 = vmul.f32 %v1048_v60, %v3678_v11  ;;  %v3885_v11 = vmul.f32 %v848_v8, %v3546_v56  ;;  %v3905_v56 = vstv %s3810_s13  ;;  %v3915_v36 = vmul.f32 %v1048_v60, %v3700_v31  ;;  %s2384_s13 = sld [smem:[#allocation7 + $0x34]] }
 0x258   :  { %v3826_v43 = vpop.permute.xlu1 %977  ;;  %5745 = vst [vmem:[#allocation66_spill] sm:$0xff] %v3876_v28  ;;  %5747 = vst [vmem:[#allocation65_spill] sm:$0xff] %v3894_v27  ;;  %v3926_v8 = vstv %s3818_s15  ;;  %v3936_v31 = vstv %s3824_s20  ;;  %s4690_s15 = sld [smem:[#allocation7 + $0x36]] }
 0x259   :  { %5740 = vst [vmem:[#allocation47_spill] sm:$0xff] %v3826_v43  ;;  %v3828_v20 = vpop.permute.xlu0 %979  ;;  %v3839_v43 = vmul.f32 %v648_v23, %v3440_v3  ;;  %5744 = vst [vmem:[#allocation55_spill] sm:$0xff] %v3864_v29  ;;  %v3867_v23 = vmul.f32 %v748_v12, %v3490_v58  ;;  %v3888_v58 = vmul.f32 %v948_v44, %v3600_v17  ;;  %v3930_v29 = vstv %s3820_s16  ;;  %s4692_s16 = sld [smem:[#allocation7 + $0x38]] }
 0x25a   :  { %5741 = vst [vmem:[#allocation59_spill] sm:$0xff] %v3828_v20  ;;  %v3841_v20 = vstv %s2359_s12  ;;  %v3912_v17 = vmul.f32 %v1048_v60, %v3690_v57  ;;  %5753 = vst [vmem:[#allocation16_spill] sm:$0xff] %v3915_v36  ;;  %v3933_v57 = vstv %s3822_s17  ;;  %v689_v36 = vmul.f32 %v687_v61, %v3608_v4  ;;  %s2383_s12 = sld [smem:[#allocation7 + $0x33]] }
 0x25b   :  { %5746 = vst [vmem:[#allocation48_spill] sm:$0xff] %v3888_v58  ;;  %v690_v58 = vmul.f32 %v687_v61, %v3618_v49  ;;  %v711_v4 = vmul.f32 %v3841_v20, %v3634_v45  ;;  %v713_v49 = vmul.f32 %v3841_v20, %v3642_v39  ;;  %v714_v45 = vmul.f32 %v3841_v20, %v3644_v48  ;;  %s4694_s17 = sld [smem:[#allocation7 + $0x39]] }
 0x25c   :  { %v3859_v3 = vpop.permute.xlu1 %981  ;;  %5752 = vst [vmem:[#allocation71_spill] sm:$0xff] %v3912_v17  ;;  %v3956_v17 = vstv %s3857_s23  ;;  %v733_v39 = vmul.f32 %v3905_v56, %v3652_v0  ;;  %s4700_s20 = sld [smem:[#allocation7 + $0x3a]] }
 0x25d   :  { %5742 = vst [vmem:[#allocation52_spill] sm:$0xff] %v3859_v3  ;;  %v3861_v41 = vpop.permute.xlu0 %983  ;;  %v3879_v3 = vmul.f32 %v748_v12, %v3496_v21  ;;  %v3897_v21 = vmul.f32 %v948_v44, %v3612_v22  ;;  %v3918_v22 = vmul.f32 %v1048_v60, %v3702_v6  ;;  %v667_v44 = vmul.f32 %v665_v50, %v3584_v26  ;;  %s4725_s23 = sld [smem:[#allocation7 + $0x3f]] }
 0x25e   :  { %5743 = vst [vmem:[#allocation67_spill] sm:$0xff] %v3861_v41  ;;  %v3882_v41 = vmul.f32 %v748_v12, %v3498_v1  ;;  %v3902_v1 = vmul.f32 %v1048_v60, %v3688_v9  ;;  %v666_v9 = vmul.f32 %v665_v50, %v3578_v35  ;;  %v3923_v12 = vstv %s3812_s14  ;;  %s4688_s14 = sld [smem:[#allocation7 + $0x35]] }
 0x25f   :  { %5748 = vst [vmem:[#allocation49_spill] sm:$0xff] %v3897_v21  ;;  %5754 = vst [vmem:[#allocation72_spill] sm:$0xff] %v3918_v22  ;;  %v669_v6 = vmul.f32 %v665_v50, %v3594_v51  ;;  %v3942_v35 = vstv %s3830_s21  ;;  %v3945_v26 = vstv %s3835_s22  ;;  %v3948_v60 = vstv %s3846_s1  ;;  %s4702_s21 = sld [smem:[#allocation7 + $0x3b]] }
 0x260   :  { %5749 = vst [vmem:[#allocation69_spill] sm:$0xff] %v3902_v1  ;;  %v3907_v37 = vpop.permute.xlu1 %985  ;;  %v668_v1 = vmul.f32 %v665_v50, %v3586_v30  ;;  %v670_v30 = vmul.f32 %v665_v50, %v3596_v24  ;;  %v688_v22 = vmul.f32 %v687_v61, %v3606_v25  ;;  %v672_v27 = vadd.f32 %v667_v44, %v650_v2  ;;  %v5755_v44 = vld [vmem:[#allocation70_spill] sm:$0xff]  ;;  %s4704_s22 = sld [smem:[#allocation7 + $0x3d]] }
 0x261   :  { %5750 = vst [vmem:[#allocation56_spill] sm:$0xff] %v3907_v37  ;;  %v3909_v40 = vpop.permute.xlu0 %999  ;;  %v671_v37 = vadd.f32 %v666_v9, %v649_v63  ;;  %v692_v24 = vmul.f32 %v687_v61, %v3626_v14  ;;  %v710_v25 = vmul.f32 %v3841_v20, %v3628_v55  ;;  %v674_v50 = vadd.f32 %v669_v6, %v652_v13  ;;  %s4711_s1 = sld [smem:[#allocation7 + $0x3e]] }
 0x262   :  { %5751 = vst [vmem:[#allocation21_spill] sm:$0xff] %v3909_v40  ;;  %v691_v40 = vmul.f32 %v687_v61, %v3620_v52  ;;  %v673_v28 = vadd.f32 %v668_v1, %v651_v5  ;;  %v712_v63 = vmul.f32 %v3841_v20, %v3636_v42  ;;  %v3976_v52 = vstv %s3899_s24  ;;  %s4733_s24 = sld [smem:[#allocation7 + $0x40]] }
 0x263   :  { %v675_v14 = vadd.f32 %v670_v30, %v3839_v43  ;;  %v693_v61 = vadd.f32 %v688_v22, %v671_v37  ;;  %v694_v55 = vadd.f32 %v689_v36, %v672_v27  ;;  %v732_v1 = vmul.f32 %v3905_v56, %v3650_v33 }
 0x264   :  { %v3958_v21 = vpop.permute.xlu1 %1001  ;;  %v695_v2 = vadd.f32 %v690_v58, %v673_v28  ;;  %v696_v42 = vadd.f32 %v691_v40, %v674_v50  ;;  %v3990_v22 = vstv %s3938_s25  ;;  %v766_v48 = vmul.f32 %v3923_v12, %v3668_v47  ;;  %s4745_s25 = sld [smem:[#allocation7 + $0x42]] }
 0x265   :  { %v3960_v51 = vpop.permute.xlu0 %1003  ;;  %v697_v9 = vadd.f32 %v692_v24, %v675_v14  ;;  %v715_v43 = vadd.f32 %v710_v25, %v693_v61  ;;  %v716_v37 = vadd.f32 %v711_v4, %v694_v55  ;;  %v3995_v20 = vstv %s3950_s26  ;;  %v5756_v4 = vld [vmem:[#allocation23_spill] sm:$0xff]  ;;  %s4778_s26 = sld [smem:[#allocation7 + $0x43]] }
 0x266   :  { %v717_v27 = vadd.f32 %v712_v63, %v695_v2  ;;  %v718_v36 = vadd.f32 %v713_v49, %v696_v42  ;;  %v767_v33 = vmul.f32 %v3923_v12, %v3674_v53  ;;  %v768_v0 = vmul.f32 %v3923_v12, %v3676_v46  ;;  %v5757_v49 = vld [vmem:[#allocation24_spill] sm:$0xff]  ;;  %v5761_v14 = vld [vmem:[#allocation27_spill] sm:$0xff]  ;;  %v5763_v42 = vld [vmem:[#allocation57_spill] sm:$0xff] }
 0x267   :  { %v719_v28 = vadd.f32 %v714_v45, %v697_v9  ;;  %vm1172_vm9 = vcmp.lt.s32.totalorder %v5755_v44, 28  ;;  %v4006_v6 = vadd.f32 %v732_v1, %v715_v43  ;;  %v4008_v30 = vadd.f32 %v733_v39, %v716_v37  ;;  %v5764_v39 = vld [vmem:[#allocation22_spill] sm:$0xff] }
 0x268   :  { %v3981_v5 = vpop.permute.xlu1 %1005  ;;  %v769_v47 = vmul.f32 %v3923_v12, %v3684_v32  ;;  %vm1174_vm10 = vcmp.lt.s32.totalorder %v5755_v44, 64  ;;  %v734_v53 = vmul.f32 %v3905_v56, %v3658_v7  ;;  %v788_v46 = vmul.f32 %v3926_v8, %v3696_v54  ;;  %vm4039_vm11 = vmand %vm613_vm0, %vm1172_vm9  ;;  %v5797_v44 = vld [vmem:[#allocation41_spill] sm:$0xff] }
 0x269   :  { %v3983_v13 = vpop.permute.xlu0 %1007  ;;  %v789_v24 = vmul.f32 %v3926_v8, %v3698_v59  ;;  %v4022_v25 = vstv %s3969_s0  ;;  %v735_v32 = vmul.f32 %v3905_v56, %v3660_v15  ;;  %v736_v50 = vmul.f32 %v3905_v56, %v5756_v4  ;;  %v5760_v56 = vld [vmem:[#allocation18_spill] sm:$0xff]  ;;  %vm1175_vm12 = vmand %vm616_vm2, %vm1174_vm10  ;;  %s4786_s0 = sld [smem:[#allocation7 + $0x44]] }
 0x26a   :  { %v771_v63 = vadd.f32 %v766_v48, %v3844_v10  ;;  %v790_v7 = vmul.f32 %v3926_v8, %v5757_v49  ;;  %v772_v15 = vadd.f32 %v767_v33, %v3849_v18  ;;  %v773_v59 = vadd.f32 %v768_v0, %v3867_v23  ;;  %v5762_v23 = vld [vmem:[#allocation19_spill] sm:$0xff]  ;;  %v5765_v48 = vld [vmem:[#allocation60_spill] sm:$0xff]  ;;  %v5766_v0 = vld [vmem:[#allocation25_spill] sm:$0xff] }
 0x26b   :  { %v791_v10 = vmul.f32 %v3926_v8, %v5760_v56  ;;  %v810_v61 = vmul.f32 %v3930_v29, %v5761_v14  ;;  %v774_v18 = vadd.f32 %v769_v47, %v3879_v3  ;;  %v770_v2 = vmul.f32 %v3923_v12, %v5762_v23  ;;  %v5767_v56 = vld [vmem:[#allocation26_spill] sm:$0xff]  ;;  %v5768_v47 = vld [vmem:[#allocation28_spill] sm:$0xff]  ;;  %v5769_v14 = vld [vmem:[#allocation29_spill] sm:$0xff] }
 0x26c   :  { %v4001_v58 = vpop.permute.xlu1 %1021  ;;  %v811_v1 = vmul.f32 %v3930_v29, %v5763_v42  ;;  %v812_v9 = vmul.f32 %v3930_v29, %v5764_v39  ;;  %v793_v43 = vadd.f32 %v788_v46, %v771_v63  ;;  %v794_v37 = vadd.f32 %v789_v24, %v772_v15  ;;  %vm4078_vm13 = vmor %vm4039_vm11, %vm1175_vm12 }
 0x26d   :  { %v4003_v40 = vpop.permute.xlu0 %1023  ;;  %v813_v33 = vmul.f32 %v3930_v29, %v5765_v48  ;;  %v832_v4 = vmul.f32 %v3933_v57, %v5766_v0  ;;  %v795_v49 = vadd.f32 %v790_v7, %v773_v59  ;;  %v792_v3 = vmul.f32 %v3926_v8, %v5767_v56  ;;  %v5772_v7 = vld [vmem:[#allocation30_spill] sm:$0xff]  ;;  %v5773_v0 = vld [vmem:[#allocation17_spill] sm:$0xff]  ;;  %vm4095_vm14 = vmand %vm598_vm6, %vm4078_vm13 }
 0x26e   :  { %v833_v12 = vmul.f32 %v3933_v57, %v5768_v47  ;;  %v834_v23 = vmul.f32 %v3933_v57, %v5769_v14  ;;  %v739_v24 = vadd.f32 %v734_v53, %v717_v27  ;;  %v796_v63 = vadd.f32 %v791_v10, %v774_v18  ;;  %v5780_v47 = vld [vmem:[#allocation31_spill] sm:$0xff] }
 0x26f   :  { %v815_v15 = vadd.f32 %v810_v61, %v793_v43  ;;  %v835_v59 = vmul.f32 %v3933_v57, %v5772_v7  ;;  %v775_v39 = vadd.f32 %v770_v2, %v3882_v41  ;;  %v816_v48 = vadd.f32 %v811_v1, %v794_v37  ;;  %v5774_v61 = vld [vmem:[#allocation73_spill] sm:$0xff] }
 0x270   :  { %v4049_v55 = vpop.permute.xlu1 %1025  ;;  %v817_v54 = vadd.f32 %v812_v9, %v795_v49  ;;  %v814_v56 = vmul.f32 %v3930_v29, %v5773_v0  ;;  %v740_v27 = vadd.f32 %v735_v32, %v718_v36  ;;  %v818_v53 = vadd.f32 %v813_v33, %v796_v63 }
 0x271   :  { %v4051_v45 = vpop.permute.xlu0 %1027  ;;  %v837_v10 = vadd.f32 %v832_v4, %v815_v15  ;;  %v5775_v18 = vmov 0  ;;  %v4100_v41 = vstv %s4024_s4  ;;  %v4102_v2 = vadd.f32 %v736_v50, %v719_v28  ;;  %v5781_v28 = vld [vmem:[#allocation32_spill] sm:$0xff]  ;;  %s4858_s4 = sld [smem:[#allocation7 + $0x47]] }
 0x272   :  { %v5776_v18 = vsel %vm4095_vm14, 4294967295, %v5775_v18  ;;  %5778 = vst [vmem:[#allocation15_spill] sm:$0xff] %v4100_v41  ;;  %v797_v1 = vadd.f32 %v792_v3, %v775_v39  ;;  %v838_v9 = vadd.f32 %v833_v12, %v816_v48  ;;  %v839_v43 = vadd.f32 %v834_v23, %v817_v54  ;;  %v5782_v23 = vld [vmem:[#allocation33_spill] sm:$0xff]  ;;  %v5784_v48 = vld [vmem:[#allocation34_spill] sm:$0xff]  ;;  %v5785_v54 = vld [vmem:[#allocation35_spill] sm:$0xff] }
 0x273   :  { %5777 = vst [vmem:[#allocation20_spill] sm:$0xff] %v5776_v18  ;;  %5779 = vst [vmem:[#allocation23_spill] sm:$0xff] %v4102_v2  ;;  %v840_v37 = vadd.f32 %v835_v59, %v818_v53  ;;  %v4109_v32 = vstv %s4012_s30  ;;  %v4112_v33 = vstv %s4033_s5  ;;  %v4115_v4 = vstv %s4053_s6  ;;  %v5787_v53 = vld [vmem:[#allocation62_spill] sm:$0xff]  ;;  %v5794_v3 = vld [vmem:[#allocation64_spill] sm:$0xff]  ;;  %s4833_s30 = sld [smem:[#allocation7 + $0x45]] }
 0x274   :  { %v4084_v8 = vpop.permute.xlu1 %1029  ;;  %v819_v49 = vadd.f32 %v814_v56, %v797_v1  ;;  %v866_v14 = vmul.f32 %v3936_v31, %v5780_v47  ;;  %v867_v50 = vmul.f32 %v3936_v31, %v5781_v28  ;;  %v4125_v12 = vadd.f32 %v837_v10, %v4006_v6  ;;  %v5788_v1 = vld [vmem:[#allocation36_spill] sm:$0xff]  ;;  %v5789_v28 = vld [vmem:[#allocation37_spill] sm:$0xff]  ;;  %s4878_s5 = sld [smem:[#allocation7 + $0x48]] }
 0x275   :  { %v4086_v42 = vpop.permute.xlu0 %1055  ;;  %v868_v63 = vmul.f32 %v3936_v31, %v5782_v23  ;;  %v4132_v15 = vsel %vm4078_vm13, %v4100_v41, 0.0  ;;  %v4135_v7 = vadd.s32 24, %v5774_v61  ;;  %v4138_v59 = vadd.f32 %v838_v9, %v4008_v30  ;;  %v5803_v41 = vld [vmem:[#allocation47_spill] sm:$0xff]  ;;  %s4885_s6 = sld [smem:[#allocation8 + $0x2]] }
 0x276   :  { %5783 = vst [vmem:[#allocation24_spill] sm:$0xff] %v4132_v15  ;;  %v4140_v39 = vadd.f32 %v839_v43, %v739_v24  ;;  %v869_v6 = vmul.f32 %v3936_v31, %v5784_v48  ;;  %v870_v0 = vmul.f32 %v3936_v31, %v5785_v54  ;;  %v4146_v56 = vadd.f32 %v840_v37, %v740_v27  ;;  %v5790_v31 = vld [vmem:[#allocation61_spill] sm:$0xff]  ;;  %v5791_v37 = vld [vmem:[#allocation38_spill] sm:$0xff]  ;;  %v5792_v54 = vld [vmem:[#allocation39_spill] sm:$0xff] }
 0x277   :  { %v836_v10 = vmul.f32 %v3933_v57, %v5787_v53  ;;  %v888_v47 = vmul.f32 %v3942_v35, %v5788_v1  ;;  %v889_v30 = vmul.f32 %v3942_v35, %v5789_v28  ;;  %v871_v43 = vadd.f32 %v866_v14, %v3852_v34  ;;  %v5793_v1 = vld [vmem:[#allocation63_spill] sm:$0xff]  ;;  %v5795_v14 = vld [vmem:[#allocation40_spill] sm:$0xff] }
 0x278   :  { %v4104_v29 = vpop.permute.xlu1 %1057  ;;  %5786 = vst [vmem:[#allocation18_spill] sm:$0xff] %v4146_v56  ;;  %v872_v23 = vadd.f32 %v867_v50, %v3870_v62  ;;  %v890_v27 = vmul.f32 %v3942_v35, %v5790_v31  ;;  %v891_v57 = vmul.f32 %v3942_v35, %v5791_v37  ;;  %v873_v48 = vadd.f32 %v868_v63, %v3873_v19  ;;  %v5796_v31 = vld [vmem:[#allocation51_spill] sm:$0xff] }
 0x279   :  { %v4106_v36 = vpop.permute.xlu0 %1059  ;;  %v892_v53 = vmul.f32 %v3942_v35, %v5792_v54  ;;  %v910_v28 = vmul.f32 %v3945_v26, %v5793_v1  ;;  %v911_v61 = vmul.f32 %v3945_v26, %v5794_v3  ;;  %v874_v34 = vadd.f32 %v869_v6, %v3885_v11  ;;  %v5798_v54 = vld [vmem:[#allocation42_spill] sm:$0xff] }
 0x27a   :  { %v875_v62 = vadd.f32 %v870_v0, %v3891_v16  ;;  %v912_v50 = vmul.f32 %v3945_v26, %v5795_v14  ;;  %v913_v37 = vmul.f32 %v3945_v26, %v5796_v31  ;;  %v893_v19 = vadd.f32 %v888_v47, %v871_v43  ;;  %v5800_v0 = vld [vmem:[#allocation68_spill] sm:$0xff]  ;;  %v5801_v43 = vld [vmem:[#allocation53_spill] sm:$0xff] }
 0x27b   :  { %v894_v63 = vadd.f32 %v889_v30, %v872_v23  ;;  %v914_v35 = vmul.f32 %v3945_v26, %v5797_v44  ;;  %v932_v1 = vmul.f32 %v3948_v60, %v5798_v54  ;;  %v4185_v11 = vadd.f32 %v836_v10, %v819_v49  ;;  %v5802_v54 = vld [vmem:[#allocation46_spill] sm:$0xff] }
 0x27c   :  { %v4154_v9 = vpop.permute.xlu1 %1061  ;;  %v895_v16 = vadd.f32 %v890_v27, %v873_v48  ;;  %v896_v6 = vadd.f32 %v891_v57, %v874_v34  ;;  %v966_v14 = vmul.f32 %v3956_v17, %v5800_v0  ;;  %v897_v31 = vadd.f32 %v892_v53, %v875_v62  ;;  %v5804_v57 = vld [vmem:[#allocation43_spill] sm:$0xff]  ;;  %v5806_v62 = vld [vmem:[#allocation54_spill] sm:$0xff] }
 0x27d   :  { %v4156_v24 = vpop.permute.xlu0 %1063  ;;  %5799 = vst [vmem:[#allocation27_spill] sm:$0xff] %v4185_v11  ;;  %v915_v47 = vadd.f32 %v910_v28, %v893_v19  ;;  %v916_v30 = vadd.f32 %v911_v61, %v894_v63  ;;  %v967_v26 = vmul.f32 %v3956_v17, %v5801_v43  ;;  %v968_v15 = vmul.f32 %v3956_v17, %v5802_v54  ;;  %v5805_v34 = vld [vmem:[#allocation59_spill] sm:$0xff]  ;;  %v5807_v19 = vld [vmem:[#allocation50_spill] sm:$0xff]  ;;  %v5808_v63 = vld [vmem:[#allocation52_spill] sm:$0xff] }
 0x27e   :  { %v917_v44 = vadd.f32 %v912_v50, %v895_v16  ;;  %v918_v23 = vadd.f32 %v913_v37, %v896_v6  ;;  %v988_v49 = vmul.f32 %v3976_v52, %v5803_v41  ;;  %v919_v10 = vadd.f32 %v914_v35, %v897_v31  ;;  %v5810_v6 = vld [vmem:[#allocation66_spill] sm:$0xff]  ;;  %v5811_v31 = vld [vmem:[#allocation21_spill] sm:$0xff]  ;;  %v5812_v54 = vld [vmem:[#allocation48_spill] sm:$0xff] }
 0x27f   :  { %v937_v27 = vadd.f32 %v932_v1, %v915_v47  ;;  %v933_v48 = vmul.f32 %v3948_v60, %v5804_v57  ;;  %v989_v53 = vmul.f32 %v3976_v52, %v5805_v34  ;;  %v934_v50 = vmul.f32 %v3948_v60, %v5806_v62  ;;  %v5809_v1 = vld [vmem:[#allocation44_spill] sm:$0xff]  ;;  %v5814_v62 = vld [vmem:[#allocation67_spill] sm:$0xff]  ;;  %v5818_v11 = vld [vmem:[#allocation49_spill] sm:$0xff] }
 0x280   :  { %v4181_v2 = vpop.permute.xlu1 %1077  ;;  %v971_v37 = vadd.f32 %v966_v14, %v3855_v38  ;;  %v969_v41 = vmul.f32 %v3956_v17, %v5807_v19  ;;  %v990_v35 = vmul.f32 %v3976_v52, %v5808_v63  ;;  %v935_v16 = vmul.f32 %v3948_v60, %v5809_v1  ;;  %v5813_v38 = vld [vmem:[#allocation58_spill] sm:$0xff]  ;;  %v5830_v46 = vld [vmem:[#allocation24_spill] sm:$0xff] }
 0x281   :  { %v4183_v3 = vpop.permute.xlu0 %1079  ;;  %v972_v0 = vadd.f32 %v967_v26, %v5810_v6  ;;  %v1010_v47 = vmul.f32 %v3990_v22, %v5811_v31  ;;  %v1011_v43 = vmul.f32 %v3990_v22, %v3958_v21  ;;  %v973_v57 = vadd.f32 %v968_v15, %v5812_v54  ;;  %v5815_v31 = vld [vmem:[#allocation45_spill] sm:$0xff] }
 0x282   :  { %v970_v14 = vmul.f32 %v3956_v17, %v5813_v38  ;;  %v993_v34 = vadd.f32 %v988_v49, %v971_v37  ;;  %v991_v19 = vmul.f32 %v3976_v52, %v5814_v62  ;;  %v1012_v1 = vmul.f32 %v3990_v22, %v3960_v51  ;;  %v5816_v49 = vld [vmem:[#allocation65_spill] sm:$0xff] }
 0x283   :  { %v994_v63 = vadd.f32 %v989_v53, %v972_v0  ;;  %v1032_v26 = vmul.f32 %v3995_v20, %v4001_v58  ;;  %v1033_v6 = vmul.f32 %v3995_v20, %v4003_v40  ;;  %v936_v17 = vmul.f32 %v3948_v60, %v5815_v31  ;;  %v5817_v0 = vld [vmem:[#allocation56_spill] sm:$0xff] }
 0x284   :  { %v4199_v61 = vpop.permute.xlu1 %1081  ;;  %v974_v37 = vadd.f32 %v969_v41, %v5816_v49  ;;  %v995_v54 = vadd.f32 %v990_v35, %v973_v57  ;;  %v1013_v53 = vmul.f32 %v3990_v22, %v3981_v5  ;;  %v992_v51 = vmul.f32 %v3976_v52, %v5817_v0 }
 0x285   :  { %v4201_v28 = vpop.permute.xlu0 %1083  ;;  %v1015_v38 = vadd.f32 %v1010_v47, %v993_v34  ;;  %v1016_v58 = vadd.f32 %v1011_v43, %v994_v63  ;;  %v1034_v40 = vmul.f32 %v3995_v20, %v4049_v55  ;;  %v938_v62 = vadd.f32 %v933_v48, %v916_v30 }
 0x286   :  { %v975_v18 = vadd.f32 %v970_v14, %v5818_v11  ;;  %v996_v56 = vadd.f32 %v991_v19, %v974_v37  ;;  %v1035_v60 = vmul.f32 %v3995_v20, %v4051_v45  ;;  %v1017_v41 = vadd.f32 %v1012_v1, %v995_v54  ;;  %v5820_v19 = vld [vmem:[#allocation69_spill] sm:$0xff]  ;;  %v5822_v54 = vld [vmem:[#allocation16_spill] sm:$0xff] }
 0x287   :  { %v1014_v35 = vmul.f32 %v3990_v22, %v3983_v13  ;;  %v1037_v5 = vadd.f32 %v1032_v26, %v1015_v38  ;;  %v1038_v57 = vadd.f32 %v1033_v6, %v1016_v58  ;;  %v939_v47 = vadd.f32 %v934_v50, %v917_v44  ;;  %v5821_v6 = vld [vmem:[#allocation71_spill] sm:$0xff] }
 0x288   :  { %v4228_v21 = vpop.permute.xlu1 %1085  ;;  %v1018_v43 = vadd.f32 %v1013_v53, %v996_v56  ;;  %v1066_v55 = vmul.f32 %v4022_v25, %v4086_v42  ;;  %v1067_v11 = vmul.f32 %v4022_v25, %v4104_v29  ;;  %v940_v30 = vadd.f32 %v935_v16, %v918_v23 }
 0x289   :  { %v1100_v15 = vpop.permute.xlu0 %1099  ;;  %v941_v48 = vadd.f32 %v936_v17, %v919_v10  ;;  %v997_v14 = vadd.f32 %v992_v51, %v975_v18  ;;  %v1039_v45 = vadd.f32 %v1034_v40, %v1017_v41  ;;  %vm1165_vm15 = vcmp.lt.s32.totalorder %v4135_v7, 28  ;;  %v5819_v10 = vld [vmem:[#allocation55_spill] sm:$0xff] }
 0x28a   :  { %v1040_v34 = vadd.f32 %v1035_v60, %v1018_v43  ;;  %v1068_v13 = vmul.f32 %v4022_v25, %v4106_v36  ;;  %v1088_v22 = vmul.f32 %v4109_v32, %v4181_v2  ;;  %v1089_v56 = vmul.f32 %v4109_v32, %v4183_v3  ;;  %vm4286_vm1 = vmand %vm1165_vm15, %vm4078_vm13 }
 0x28b   :  { %v1019_v42 = vadd.f32 %v1014_v35, %v997_v14  ;;  %v1147_v44 = vadd.f32 %v1037_v5, %v937_v27  ;;  %v1148_v50 = vadd.f32 %v1038_v57, %v938_v62  ;;  %v1069_v29 = vmul.f32 %v4022_v25, %v4154_v9  ;;  %v5823_v57 = vld [vmem:[#allocation72_spill] sm:$0xff] }
 0x28c   :  { %v1102_v31 = vpop.permute.xlu1 %1101  ;;  %v1071_v16 = vadd.f32 %v1066_v55, %v5819_v10  ;;  %v1072_v63 = vadd.f32 %v1067_v11, %v5820_v19  ;;  %v1110_v36 = vmul.f32 %v4112_v33, %v1100_v15  ;;  %v1149_v2 = vadd.f32 %v1039_v45, %v939_v47 }
 0x28d   :  { %v1104_v52 = vpop.permute.xlu0 %1103  ;;  %v1111_v1 = vmul.f32 %v4112_v33, %v1102_v31  ;;  %v1036_v3 = vmul.f32 %v3995_v20, %v4084_v8  ;;  %v1090_v27 = vmul.f32 %v4109_v32, %v4199_v61  ;;  %v1091_v9 = vmul.f32 %v4109_v32, %v4201_v28 }
 0x28e   :  { %v1150_v26 = vadd.f32 %v1040_v34, %v940_v30  ;;  %v1073_v17 = vadd.f32 %v1068_v13, %v5821_v6  ;;  %v1093_v49 = vadd.f32 %v1088_v22, %v1071_v16  ;;  %v1094_v37 = vadd.f32 %v1089_v56, %v1072_v63  ;;  %v5826_v34 = vld [vmem:[#allocation18_spill] sm:$0xff]  ;;  %v5828_v56 = vld [vmem:[#allocation15_spill] sm:$0xff] }
 0x28f   :  { %v1074_v53 = vadd.f32 %v1069_v29, %v5822_v54  ;;  %v1070_v15 = vmul.f32 %v4022_v25, %v4156_v24  ;;  %v1112_v0 = vmul.f32 %v4112_v33, %v1104_v52  ;;  %v1041_v40 = vadd.f32 %v1036_v3, %v1019_v42 }
 0x290   :  { %v1106_v18 = vpop.permute.xlu1 %1105  ;;  %v1115_v61 = vadd.f32 %v1110_v36, %v1093_v49  ;;  %v1116_v38 = vadd.f32 %v1111_v1, %v1094_v37  ;;  %v1095_v62 = vadd.f32 %v1090_v27, %v1073_v17  ;;  %v1092_v41 = vmul.f32 %v4109_v32, %v4228_v21 }
 0x291   :  { %v1108_v23 = vpop.permute.xlu0 %1107  ;;  %v1113_v20 = vmul.f32 %v4112_v33, %v1106_v18  ;;  %v1096_v60 = vadd.f32 %v1091_v9, %v1074_v53  ;;  %v1152_v25 = vadd.f32 %v1147_v44, %v4125_v12  ;;  %v1153_v24 = vadd.f32 %v1148_v50, %v4138_v59  ;;  %v5831_v18 = vld [vmem:[#allocation23_spill] sm:$0xff] }
 0x292   :  { %v1075_v31 = vadd.f32 %v1070_v15, %v5823_v57  ;;  %v1117_v52 = vadd.f32 %v1112_v0, %v1095_v62  ;;  %v1114_v43 = vmul.f32 %v4112_v33, %v1108_v23  ;;  %v1151_v59 = vadd.f32 %v1041_v40, %v941_v48  ;;  %v5832_v23 = vld [vmem:[#allocation27_spill] sm:$0xff] }
 0x293   :  { %v1118_v47 = vadd.f32 %v1113_v20, %v1096_v60  ;;  %v1154_v33 = vadd.f32 %v1149_v2, %v4140_v39  ;;  %v1155_v13 = vadd.f32 %v1150_v26, %v5826_v34  ;;  %v5829_v42 = vsel %vm4095_vm14, %v5828_v56, 0.0 }
 0x294   :  { %v1122_v8 = vpop.permute.xlu1 %1121  ;;  %v1097_v21 = vadd.f32 %v1092_v41, %v1075_v31  ;;  %v1146_v10 = vadd.f32 %v5832_v23, %v5831_v18  ;;  %v1187_v39 = vsel %vm4286_vm1, %v5828_v56, 0.0 }
 0x295   :  { %v1124_v51 = vpop.permute.xlu0 %1123  ;;  %v1132_v28 = vmul.f32 %v4115_v4, %v1122_v8 }
 0x296   :  { %v1133_v58 = vmul.f32 %v4115_v4, %v1124_v51  ;;  %v1119_v48 = vadd.f32 %v1114_v43, %v1097_v21  ;;  %v1156_v27 = vadd.f32 %v1151_v59, %v1146_v10 }
 0x297   :  { %v1137_v35 = vadd.f32 %v1132_v28, %v1115_v61 }
 0x298   :  { %v1138_v5 = vadd.f32 %v1133_v58, %v1116_v38  ;;  %v1126_v55 = vpop.permute.xlu1 %1125 }
 0x299   :  { %v1128_v11 = vpop.permute.xlu0 %1127  ;;  %v1157_v30 = vadd.f32 %v1152_v25, %v1137_v35  ;;  %v1134_v45 = vmul.f32 %v4115_v4, %v1126_v55 }
 0x29a   :  { %v1158_v14 = vadd.f32 %v1153_v24, %v1138_v5  ;;  %v1135_v12 = vmul.f32 %v4115_v4, %v1128_v11 }
 0x29b   :  { %v4297_v44 = vadd.f32 %v5829_v42, %v1157_v30  ;;  %v1139_v50 = vadd.f32 %v1134_v45, %v1117_v52 }
 0x29c   :  { %v4300_v7 = vadd.f32 %v5830_v46, %v1158_v14  ;;  %v1140_v29 = vadd.f32 %v1135_v12, %v1118_v47  ;;  %v1130_v16 = vpop.permute.xlu1 %1129 }
 0x29d   :  { %1194 = vst [vmem:[#allocation2 + $0x4] sm:$0xff] %v4297_v44  ;;  %v1159_v19 = vadd.f32 %v1154_v33, %v1139_v50  ;;  %v1136_v36 = vmul.f32 %v4115_v4, %v1130_v16  ;;  %1212 = vrot.lane.b32.xlu0 %v4297_v44, %s2523_s2 }
 0x29e   :  { %1195 = vst [vmem:[#allocation2 + $0xc] sm:$0xff] %v4300_v7  ;;  %v1160_v63 = vadd.f32 %v1155_v13, %v1140_v29  ;;  %1214 = vrot.lane.b32.xlu1 %v4300_v7, %s2523_s2 }
 0x29f   :  { %v4315_v1 = vadd.f32 %v5830_v46, %v1159_v19  ;;  %v1141_v3 = vadd.f32 %v1136_v36, %v1119_v48 }
 0x2a0   :  { %v4317_v2 = vadd.f32 %v1187_v39, %v1160_v63 }
 0x2a1   :  { %1196 = vst [vmem:[#allocation2 + $0x14] sm:$0xff] %v4315_v1  ;;  %v4321_v9 = vadd.f32 %v1156_v27, %v1141_v3  ;;  %1216 = vrot.lane.b32.xlu0 %v4315_v1, %s2523_s2 }
 0x2a2   :  { %1197 = vst [vmem:[#allocation2 + $0x1c] sm:$0xff] %v4317_v2  ;;  %1218 = vrot.lane.b32.xlu1 %v4317_v2, %s2523_s2 }
 0x2a3   :  { %1198 = vst [vmem:[#allocation2 + $0x24] sm:$0xff] %v4321_v9 }
 0x2a4   :  { %v4362_v26 = vld [vmem:[#allocation2 + $0x3] sm:$0xff] }
 0x2a5   :  { %1220 = vrot.lane.b32.xlu0 %v4321_v9, %s2523_s2  ;;  %v4360_v4 = vld [vmem:[#allocation2 + $0xb] sm:$0xff]  ;;  %v4412_v54 = vld [vmem:[#allocation2 + $0x2] sm:$0xff] }
 0x2a6   :  { %1234 = vrot.lane.b32.xlu1 %v4297_v44, %s2524_s27  ;;  %v4410_v37 = vld [vmem:[#allocation2 + $0xa] sm:$0xff]  ;;  %v4470_v28 = vld [vmem:[#allocation2 + $0x1] sm:$0xff] }
 0x2a7   :  { %v4468_v38 = vld [vmem:[#allocation2 + $0x9] sm:$0xff]  ;;  %v4560_v34 = vld [vmem:[#allocation2] sm:$0xff] }
 0x2a8   :  { %v4370_v17 = vld [vmem:[#allocation2 + $0x13] sm:$0xff]  ;;  %v4558_v33 = vld [vmem:[#allocation2 + $0x8] sm:$0xff] }
 0x2a9   :  { %1236 = vrot.lane.b32.xlu0 %v4300_v7, %s2524_s27  ;;  %v4368_v6 = vld [vmem:[#allocation2 + $0x1b] sm:$0xff]  ;;  %v4420_v15 = vld [vmem:[#allocation2 + $0x12] sm:$0xff] }
 0x2aa   :  { %1238 = vrot.lane.b32.xlu1 %v4315_v1, %s2524_s27  ;;  %v4376_v49 = vld [vmem:[#allocation2 + $0x23] sm:$0xff]  ;;  %v4418_v53 = vld [vmem:[#allocation2 + $0x1a] sm:$0xff]  ;;  %v4482_v60 = vld [vmem:[#allocation2 + $0x11] sm:$0xff] }
 0x2ab   :  { %v4426_v0 = vld [vmem:[#allocation2 + $0x22] sm:$0xff]  ;;  %v4480_v62 = vld [vmem:[#allocation2 + $0x19] sm:$0xff]  ;;  %v4572_v42 = vld [vmem:[#allocation2 + $0x10] sm:$0xff] }
 0x2ac   :  { %v4492_v25 = vld [vmem:[#allocation2 + $0x21] sm:$0xff]  ;;  %v4570_v56 = vld [vmem:[#allocation2 + $0x18] sm:$0xff] }
 0x2ad   :  { %1240 = vrot.lane.b32.xlu0 %v4317_v2, %s2524_s27  ;;  %v4582_v29 = vld [vmem:[#allocation2 + $0x20] sm:$0xff] }
 0x2ae   :  { %1242 = vrot.lane.b32.xlu1 %v4321_v9, %s2524_s27 }
 0x2b1   :  { %1256 = vrot.lane.b32.xlu0 %v4297_v44, %s2525_s28 }
 0x2b2   :  { %1258 = vrot.lane.b32.xlu1 %v4300_v7, %s2525_s28 }
 0x2b5   :  { %1260 = vrot.lane.b32.xlu0 %v4315_v1, %s2525_s28 }
 0x2b6   :  { %1262 = vrot.lane.b32.xlu1 %v4317_v2, %s2525_s28 }
 0x2b9   :  { %1264 = vrot.lane.b32.xlu0 %v4321_v9, %s2525_s28 }
 0x2ba   :  { %1278 = vrot.lane.b32.xlu1 %v4297_v44, %s2526_s29 }
 0x2bd   :  { %1280 = vrot.lane.b32.xlu0 %v4300_v7, %s2526_s29 }
 0x2be   :  { %1282 = vrot.lane.b32.xlu1 %v4315_v1, %s2526_s29 }
 0x2c1   :  { %1284 = vrot.lane.b32.xlu0 %v4317_v2, %s2526_s29 }
 0x2c2   :  { %1286 = vrot.lane.b32.xlu1 %v4321_v9, %s2526_s29 }
 0x2c5   :  { %1312 = vrot.lane.b32.xlu0 %v4362_v26, %s2523_s2 }
 0x2c6   :  { %1314 = vrot.lane.b32.xlu1 %v4360_v4, %s2523_s2 }
 0x2c9   :  { %1316 = vrot.lane.b32.xlu0 %v4370_v17, %s2523_s2 }
 0x2ca   :  { %1318 = vrot.lane.b32.xlu1 %v4368_v6, %s2523_s2 }
 0x2cd   :  { %1320 = vrot.lane.b32.xlu0 %v4376_v49, %s2523_s2 }
 0x2ce   :  { %1334 = vrot.lane.b32.xlu1 %v4362_v26, %s2524_s27 }
 0x2d1   :  { %1336 = vrot.lane.b32.xlu0 %v4360_v4, %s2524_s27 }
 0x2d2   :  { %1338 = vrot.lane.b32.xlu1 %v4370_v17, %s2524_s27 }
 0x2d5   :  { %1340 = vrot.lane.b32.xlu0 %v4368_v6, %s2524_s27 }
 0x2d6   :  { %1342 = vrot.lane.b32.xlu1 %v4376_v49, %s2524_s27 }
 0x2d9   :  { %1356 = vrot.lane.b32.xlu0 %v4362_v26, %s2525_s28 }
 0x2da   :  { %1358 = vrot.lane.b32.xlu1 %v4360_v4, %s2525_s28 }
 0x2dd   :  { %1360 = vrot.lane.b32.xlu0 %v4370_v17, %s2525_s28 }
 0x2de   :  { %1362 = vrot.lane.b32.xlu1 %v4368_v6, %s2525_s28 }
 0x2e1   :  { %1364 = vrot.lane.b32.xlu0 %v4376_v49, %s2525_s28 }
 0x2e2   :  { %1378 = vrot.lane.b32.xlu1 %v4362_v26, %s2526_s29 }
 0x2e5   :  { %1380 = vrot.lane.b32.xlu0 %v4360_v4, %s2526_s29 }
 0x2e6   :  { %1382 = vrot.lane.b32.xlu1 %v4370_v17, %s2526_s29 }
 0x2e9   :  { %1384 = vrot.lane.b32.xlu0 %v4368_v6, %s2526_s29 }
 0x2ea   :  { %1386 = vrot.lane.b32.xlu1 %v4376_v49, %s2526_s29 }
 0x2ed   :  { %1412 = vrot.lane.b32.xlu0 %v4412_v54, %s2523_s2 }
 0x2ee   :  { %1414 = vrot.lane.b32.xlu1 %v4410_v37, %s2523_s2 }
 0x2f1   :  { %1416 = vrot.lane.b32.xlu0 %v4420_v15, %s2523_s2 }
 0x2f2   :  { %1418 = vrot.lane.b32.xlu1 %v4418_v53, %s2523_s2 }
 0x2f5   :  { %1420 = vrot.lane.b32.xlu0 %v4426_v0, %s2523_s2 }
 0x2f6   :  { %1434 = vrot.lane.b32.xlu1 %v4412_v54, %s2524_s27 }
 0x2f9   :  { %1436 = vrot.lane.b32.xlu0 %v4410_v37, %s2524_s27 }
 0x2fa   :  { %1438 = vrot.lane.b32.xlu1 %v4420_v15, %s2524_s27 }
 0x2fd   :  { %1440 = vrot.lane.b32.xlu0 %v4418_v53, %s2524_s27 }
 0x2fe   :  { %1442 = vrot.lane.b32.xlu1 %v4426_v0, %s2524_s27 }
 0x301   :  { %1456 = vrot.lane.b32.xlu0 %v4412_v54, %s2525_s28 }
 0x302   :  { %1458 = vrot.lane.b32.xlu1 %v4410_v37, %s2525_s28 }
 0x305   :  { %1460 = vrot.lane.b32.xlu0 %v4420_v15, %s2525_s28 }
 0x306   :  { %1462 = vrot.lane.b32.xlu1 %v4418_v53, %s2525_s28 }
 0x309   :  { %1464 = vrot.lane.b32.xlu0 %v4426_v0, %s2525_s28 }
 0x30a   :  { %1478 = vrot.lane.b32.xlu1 %v4412_v54, %s2526_s29 }
 0x30d   :  { %1480 = vrot.lane.b32.xlu0 %v4410_v37, %s2526_s29 }
 0x30e   :  { %1482 = vrot.lane.b32.xlu1 %v4420_v15, %s2526_s29 }
 0x30f   :  { %v4458_v8 = vpop.permute.xlu0 %1212 }
 0x310   :  { %v4456_v20 = vpop.permute.xlu1 %1214 }
 0x311   :  { %1484 = vrot.lane.b32.xlu0 %v4418_v53, %s2526_s29 }
 0x312   :  { %1486 = vrot.lane.b32.xlu1 %v4426_v0, %s2526_s29 }
 0x313   :  { %v4466_v61 = vpop.permute.xlu0 %1216 }
 0x314   :  { %v4464_v51 = vpop.permute.xlu1 %1218 }
 0x315   :  { %1512 = vrot.lane.b32.xlu0 %v4470_v28, %s2523_s2 }
 0x316   :  { %1514 = vrot.lane.b32.xlu1 %v4468_v38, %s2523_s2 }
 0x317   :  { %v4478_v40 = vpop.permute.xlu0 %1220 }
 0x318   :  { %v4476_v58 = vpop.permute.xlu1 %1234 }
 0x319   :  { %1516 = vrot.lane.b32.xlu0 %v4482_v60, %s2523_s2 }
 0x31a   :  { %1518 = vrot.lane.b32.xlu1 %v4480_v62, %s2523_s2 }
 0x31b   :  { %v4490_v35 = vpop.permute.xlu0 %1236 }
 0x31c   :  { %v4488_v41 = vpop.permute.xlu1 %1238 }
 0x31d   :  { %1520 = vrot.lane.b32.xlu0 %v4492_v25, %s2523_s2 }
 0x31e   :  { %1534 = vrot.lane.b32.xlu1 %v4470_v28, %s2524_s27 }
 0x31f   :  { %v4500_v5 = vpop.permute.xlu0 %1240 }
 0x320   :  { %v4498_v24 = vpop.permute.xlu1 %1242 }
 0x321   :  { %1536 = vrot.lane.b32.xlu0 %v4468_v38, %s2524_s27 }
 0x322   :  { %1538 = vrot.lane.b32.xlu1 %v4482_v60, %s2524_s27 }
 0x323   :  { %v4508_v31 = vpop.permute.xlu0 %1256 }
 0x324   :  { %v4506_v57 = vpop.permute.xlu1 %1258 }
 0x325   :  { %1540 = vrot.lane.b32.xlu0 %v4480_v62, %s2524_s27 }
 0x326   :  { %1542 = vrot.lane.b32.xlu1 %v4492_v25, %s2524_s27 }
 0x327   :  { %v4516_v47 = vpop.permute.xlu0 %1260 }
 0x328   :  { %v4514_v52 = vpop.permute.xlu1 %1262 }
 0x329   :  { %1556 = vrot.lane.b32.xlu0 %v4470_v28, %s2525_s28 }
 0x32a   :  { %1558 = vrot.lane.b32.xlu1 %v4468_v38, %s2525_s28 }
 0x32b   :  { %v4524_v55 = vpop.permute.xlu0 %1264 }
 0x32c   :  { %v4522_v43 = vpop.permute.xlu1 %1278 }
 0x32d   :  { %1560 = vrot.lane.b32.xlu0 %v4482_v60, %s2525_s28 }
 0x32e   :  { %1562 = vrot.lane.b32.xlu1 %v4480_v62, %s2525_s28 }
 0x32f   :  { %v4532_v30 = vpop.permute.xlu0 %1280 }
 0x330   :  { %v4530_v11 = vpop.permute.xlu1 %1282 }
 0x331   :  { %1564 = vrot.lane.b32.xlu0 %v4492_v25, %s2525_s28 }
 0x332   :  { %1578 = vrot.lane.b32.xlu1 %v4470_v28, %s2526_s29 }
 0x333   :  { %v4540_v45 = vpop.permute.xlu0 %1284 }
 0x334   :  { %v4538_v14 = vpop.permute.xlu1 %1286  ;;  %5833 = vst [vmem:[#allocation19_spill] sm:$0xff] %v4540_v45 }
 0x335   :  { %1580 = vrot.lane.b32.xlu0 %v4468_v38, %s2526_s29 }
 0x336   :  { %1582 = vrot.lane.b32.xlu1 %v4482_v60, %s2526_s29 }
 0x337   :  { %v4548_v12 = vpop.permute.xlu0 %1312 }
 0x338   :  { %v4546_v32 = vpop.permute.xlu1 %1314 }
 0x339   :  { %1584 = vrot.lane.b32.xlu0 %v4480_v62, %s2526_s29 }
 0x33a   :  { %1586 = vrot.lane.b32.xlu1 %v4492_v25, %s2526_s29 }
 0x33b   :  { %v4556_v21 = vpop.permute.xlu0 %1316 }
 0x33c   :  { %v4554_v59 = vpop.permute.xlu1 %1318 }
 0x33d   :  { %5834 = vst [vmem:[#allocation57_spill] sm:$0xff] %v4554_v59  ;;  %1612 = vrot.lane.b32.xlu0 %v4560_v34, %s2523_s2 }
 0x33e   :  { %1614 = vrot.lane.b32.xlu1 %v4558_v33, %s2523_s2 }
 0x33f   :  { %v4568_v22 = vpop.permute.xlu0 %1320 }
 0x340   :  { %v4566_v13 = vpop.permute.xlu1 %1334  ;;  %5835 = vst [vmem:[#allocation22_spill] sm:$0xff] %v4568_v22 }
 0x341   :  { %1616 = vrot.lane.b32.xlu0 %v4572_v42, %s2523_s2 }
 0x342   :  { %1618 = vrot.lane.b32.xlu1 %v4570_v56, %s2523_s2 }
 0x343   :  { %v4580_v50 = vpop.permute.xlu0 %1336 }
 0x344   :  { %v4578_v46 = vpop.permute.xlu1 %1338  ;;  %5836 = vst [vmem:[#allocation60_spill] sm:$0xff] %v4580_v50 }
 0x345   :  { %1620 = vrot.lane.b32.xlu0 %v4582_v29, %s2523_s2 }
 0x346   :  { %1634 = vrot.lane.b32.xlu1 %v4560_v34, %s2524_s27 }
 0x347   :  { %v4590_v23 = vpop.permute.xlu0 %1340 }
 0x348   :  { %v4588_v18 = vpop.permute.xlu1 %1342  ;;  %5838 = vst [vmem:[#allocation26_spill] sm:$0xff] %v4590_v23 }
 0x349   :  { %5837 = vst [vmem:[#allocation25_spill] sm:$0xff] %v4588_v18  ;;  %1636 = vrot.lane.b32.xlu0 %v4558_v33, %s2524_s27 }
 0x34a   :  { %1638 = vrot.lane.b32.xlu1 %v4572_v42, %s2524_s27 }
 0x34b   :  { %v4598_v48 = vpop.permute.xlu0 %1356 }
 0x34c   :  { %v4596_v10 = vpop.permute.xlu1 %1358  ;;  %5840 = vst [vmem:[#allocation29_spill] sm:$0xff] %v4598_v48 }
 0x34d   :  { %5839 = vst [vmem:[#allocation28_spill] sm:$0xff] %v4596_v10  ;;  %1640 = vrot.lane.b32.xlu0 %v4570_v56, %s2524_s27 }
 0x34e   :  { %1642 = vrot.lane.b32.xlu1 %v4582_v29, %s2524_s27 }
 0x34f   :  { %v4606_v16 = vpop.permute.xlu0 %1360 }
 0x350   :  { %v4604_v39 = vpop.permute.xlu1 %1362  ;;  %5842 = vst [vmem:[#allocation17_spill] sm:$0xff] %v4606_v16 }
 0x351   :  { %5841 = vst [vmem:[#allocation30_spill] sm:$0xff] %v4604_v39  ;;  %1656 = vrot.lane.b32.xlu0 %v4560_v34, %s2525_s28 }
 0x352   :  { %1658 = vrot.lane.b32.xlu1 %v4558_v33, %s2525_s28 }
 0x353   :  { %v4614_v63 = vpop.permute.xlu0 %1364 }
 0x354   :  { %v4612_v19 = vpop.permute.xlu1 %1378  ;;  %5844 = vst [vmem:[#allocation32_spill] sm:$0xff] %v4614_v63 }
 0x355   :  { %5843 = vst [vmem:[#allocation31_spill] sm:$0xff] %v4612_v19  ;;  %1660 = vrot.lane.b32.xlu0 %v4572_v42, %s2525_s28 }
 0x356   :  { %1662 = vrot.lane.b32.xlu1 %v4570_v56, %s2525_s28 }
 0x357   :  { %v4622_v3 = vpop.permute.xlu0 %1380 }
 0x358   :  { %v4620_v36 = vpop.permute.xlu1 %1382  ;;  %5846 = vst [vmem:[#allocation34_spill] sm:$0xff] %v4622_v3 }
 0x359   :  { %5845 = vst [vmem:[#allocation33_spill] sm:$0xff] %v4620_v36  ;;  %1664 = vrot.lane.b32.xlu0 %v4582_v29, %s2525_s28 }
 0x35a   :  { %1678 = vrot.lane.b32.xlu1 %v4560_v34, %s2526_s29 }
 0x35b   :  { %v4630_v39 = vpop.permute.xlu0 %1384 }
 0x35c   :  { %v4628_v27 = vpop.permute.xlu1 %1386  ;;  %5848 = vst [vmem:[#allocation62_spill] sm:$0xff] %v4630_v39 }
 0x35d   :  { %5847 = vst [vmem:[#allocation35_spill] sm:$0xff] %v4628_v27  ;;  %1680 = vrot.lane.b32.xlu0 %v4558_v33, %s2526_s29 }
 0x35e   :  { %1682 = vrot.lane.b32.xlu1 %v4572_v42, %s2526_s29 }
 0x35f   :  { %v4638_v36 = vpop.permute.xlu0 %1412 }
 0x360   :  { %v4636_v63 = vpop.permute.xlu1 %1414  ;;  %5850 = vst [vmem:[#allocation37_spill] sm:$0xff] %v4638_v36 }
 0x361   :  { %5849 = vst [vmem:[#allocation36_spill] sm:$0xff] %v4636_v63  ;;  %1684 = vrot.lane.b32.xlu0 %v4570_v56, %s2526_s29 }
 0x362   :  { %1686 = vrot.lane.b32.xlu1 %v4582_v29, %s2526_s29 }
 0x363   :  { %v4646_v27 = vpop.permute.xlu0 %1416 }
 0x364   :  { %v4644_v3 = vpop.permute.xlu1 %1418  ;;  %5852 = vst [vmem:[#allocation38_spill] sm:$0xff] %v4646_v27 }
 0x365   :  { %5851 = vst [vmem:[#allocation61_spill] sm:$0xff] %v4644_v3 }
 0x367   :  { %v4650_v23 = vpop.permute.xlu0 %1420 }
 0x368   :  { %v4648_v39 = vpop.permute.xlu1 %1434  ;;  %5854 = vst [vmem:[#allocation63_spill] sm:$0xff] %v4650_v23 }
 0x369   :  { %5853 = vst [vmem:[#allocation39_spill] sm:$0xff] %v4648_v39 }
 0x36b   :  { %v4654_v19 = vpop.permute.xlu0 %1436 }
 0x36c   :  { %v4652_v18 = vpop.permute.xlu1 %1438  ;;  %5856 = vst [vmem:[#allocation40_spill] sm:$0xff] %v4654_v19 }
 0x36d   :  { %5855 = vst [vmem:[#allocation64_spill] sm:$0xff] %v4652_v18 }
 0x36f   :  { %v4658_v36 = vpop.permute.xlu0 %1440 }
 0x370   :  { %v4656_v63 = vpop.permute.xlu1 %1442  ;;  %5858 = vst [vmem:[#allocation41_spill] sm:$0xff] %v4658_v36 }
 0x371   :  { %5857 = vst [vmem:[#allocation51_spill] sm:$0xff] %v4656_v63 }
 0x373   :  { %v4662_v10 = vpop.permute.xlu0 %1456 }
 0x374   :  { %v4660_v16 = vpop.permute.xlu1 %1458  ;;  %5860 = vst [vmem:[#allocation68_spill] sm:$0xff] %v4662_v10 }
 0x375   :  { %5859 = vst [vmem:[#allocation42_spill] sm:$0xff] %v4660_v16 }
 0x377   :  { %v4666_v3 = vpop.permute.xlu0 %1460 }
 0x378   :  { %v4664_v48 = vpop.permute.xlu1 %1462  ;;  %5862 = vst [vmem:[#allocation46_spill] sm:$0xff] %v4666_v3  ;;  %v1605_v3 = vstv %s2402_s11  ;;  %s2410_s11 = sld [smem:[#allocation7 + $0x4d]] }
 0x379   :  { %5861 = vst [vmem:[#allocation53_spill] sm:$0xff] %v4664_v48 }
 0x37b   :  { %v4670_v39 = vpop.permute.xlu0 %1464 }
 0x37c   :  { %v4668_v27 = vpop.permute.xlu1 %1478  ;;  %5864 = vst [vmem:[#allocation43_spill] sm:$0xff] %v4670_v39 }
 0x37d   :  { %5863 = vst [vmem:[#allocation47_spill] sm:$0xff] %v4668_v27  ;;  %v1505_v27 = vstv %s2397_s10  ;;  %s2409_s10 = sld [smem:[#allocation7 + $0x4c]] }
 0x37f   :  { %v4674_v18 = vpop.permute.xlu0 %1480 }
 0x380   :  { %v4672_v23 = vpop.permute.xlu1 %1482  ;;  %5866 = vst [vmem:[#allocation54_spill] sm:$0xff] %v4674_v18  ;;  %v1205_v18 = vstv %s2382_s7  ;;  %s4899_s7 = sld [smem:[#allocation7 + $0x49]] }
 0x381   :  { %5865 = vst [vmem:[#allocation59_spill] sm:$0xff] %v4672_v23  ;;  %v1206_v16 = vmul.f32 %v1205_v18, %v4297_v44  ;;  %v1208_v59 = vmul.f32 %v1205_v18, %v4315_v1  ;;  %v1210_v45 = vmul.f32 %v1205_v18, %v4321_v9  ;;  %v4736_v1 = vmul.f32 %v1505_v27, %v4468_v38 }
 0x382   :  { %v4739_v9 = vmul.f32 %v1505_v27, %v4470_v28 }
 0x383   :  { %v4678_v63 = vpop.permute.xlu0 %1484  ;;  %5876 = vst [vmem:[#allocation65_spill] sm:$0xff] %v4736_v1 }
 0x384   :  { %v4676_v19 = vpop.permute.xlu1 %1486  ;;  %5868 = vst [vmem:[#allocation52_spill] sm:$0xff] %v4678_v63 }
 0x385   :  { %5867 = vst [vmem:[#allocation50_spill] sm:$0xff] %v4676_v19 }
 0x387   :  { %v4682_v48 = vpop.permute.xlu0 %1512 }
 0x388   :  { %v4680_v10 = vpop.permute.xlu1 %1514  ;;  %5870 = vst [vmem:[#allocation66_spill] sm:$0xff] %v4682_v48  ;;  %v1207_v48 = vmul.f32 %v1205_v18, %v4300_v7 }
 0x389   :  { %5869 = vst [vmem:[#allocation44_spill] sm:$0xff] %v4680_v10  ;;  %v1305_v10 = vstv %s2387_s8  ;;  %s4928_s8 = sld [smem:[#allocation7 + $0x4a]] }
 0x38a   :  { %v4720_v50 = vmul.f32 %v1305_v10, %v4360_v4  ;;  %v4723_v44 = vmul.f32 %v1305_v10, %v4362_v26  ;;  %v1266_v4 = vstv %s4688_s14  ;;  %v4743_v26 = vmul.f32 %v1305_v10, %v4368_v6  ;;  %s2413_s14 = sld [smem:[#allocation7 + $0x50]] }
 0x38b   :  { %v4686_v23 = vpop.permute.xlu0 %1516  ;;  %v4763_v6 = vmul.f32 %v1505_v27, %v4480_v62  ;;  %v4784_v62 = vstv %s4690_s15  ;;  %s2414_s15 = sld [smem:[#allocation7 + $0x51]] }
 0x38c   :  { %v4684_v39 = vpop.permute.xlu1 %1518  ;;  %5872 = vst [vmem:[#allocation48_spill] sm:$0xff] %v4686_v23  ;;  %v1405_v23 = vstv %s2392_s9  ;;  %s2408_s9 = sld [smem:[#allocation7 + $0x4b]] }
 0x38d   :  { %5871 = vst [vmem:[#allocation21_spill] sm:$0xff] %v4684_v39  ;;  %v1222_v39 = vstv %s2383_s12  ;;  %v4728_v7 = vmul.f32 %v1405_v23, %v4410_v37  ;;  %v4748_v37 = vmul.f32 %v1605_v3, %v4558_v33  ;;  %v4757_v38 = vmul.f32 %v1405_v23, %v4418_v53  ;;  %5879 = vst [vmem:[#allocation55_spill] sm:$0xff] %v4763_v6  ;;  %s2411_s12 = sld [smem:[#allocation7 + $0x4e]] }
 0x38e   :  { %v4760_v28 = vmul.f32 %v1405_v23, %v4420_v15  ;;  %v4776_v53 = vmul.f32 %v1505_v27, %v4482_v60  ;;  %v4781_v15 = vmul.f32 %v1505_v27, %v4492_v25  ;;  %v1224_v60 = vmul.f32 %v1222_v39, %v4456_v20 }
 0x38f   :  { %v4698_v19 = vpop.permute.xlu0 %1520  ;;  %5877 = vst [vmem:[#allocation56_spill] sm:$0xff] %v4748_v37  ;;  %v1223_v25 = vmul.f32 %v1222_v39, %v4458_v8  ;;  %v4803_v27 = vstv %s4694_s17  ;;  %v4810_v37 = vstv %s4702_s21  ;;  %v1226_v8 = vmul.f32 %v1222_v39, %v4464_v51  ;;  %s2417_s17 = sld [smem:[#allocation7 + $0x54]] }
 0x390   :  { %v4696_v63 = vpop.permute.xlu1 %1534  ;;  %5874 = vst [vmem:[#allocation67_spill] sm:$0xff] %v4698_v19  ;;  %v1244_v19 = vstv %s2384_s13  ;;  %5882 = vst [vmem:[#allocation16_spill] sm:$0xff] %v4776_v53  ;;  %v4831_v6 = vstv %s4733_s24  ;;  %s2412_s13 = sld [smem:[#allocation7 + $0x4f]] }
 0x391   :  { %5873 = vst [vmem:[#allocation58_spill] sm:$0xff] %v4696_v63  ;;  %v4709_v63 = vmul.f32 %v1205_v18, %v4317_v2  ;;  %v4731_v2 = vmul.f32 %v1405_v23, %v4412_v54  ;;  %v4751_v54 = vmul.f32 %v1605_v3, %v4560_v34  ;;  %v4754_v18 = vmul.f32 %v1305_v10, %v4370_v17  ;;  %s2421_s21 = sld [smem:[#allocation7 + $0x58]] }
 0x392   :  { %v4770_v34 = vmul.f32 %v1305_v10, %v4376_v49  ;;  %v4773_v17 = vmul.f32 %v1405_v23, %v4426_v0  ;;  %5883 = vst [vmem:[#allocation72_spill] sm:$0xff] %v4781_v15  ;;  %v4789_v49 = vmul.f32 %v1605_v3, %v4570_v56  ;;  %v4792_v0 = vmul.f32 %v1605_v3, %v4572_v42  ;;  %s2426_s24 = sld [smem:[#allocation7 + $0x5d]] }
 0x393   :  { %v4715_v22 = vpop.permute.xlu0 %1536  ;;  %5878 = vst [vmem:[#allocation49_spill] sm:$0xff] %v4751_v54  ;;  %v4795_v23 = vmul.f32 %v1605_v3, %v4582_v29  ;;  %v4800_v10 = vstv %s4692_s16  ;;  %v1225_v56 = vmul.f32 %v1222_v39, %v4466_v61  ;;  %v4813_v42 = vstv %s4704_s22  ;;  %s2415_s16 = sld [smem:[#allocation7 + $0x52]] }
 0x394   :  { %v4713_v36 = vpop.permute.xlu1 %1538  ;;  %5875 = vst [vmem:[#allocation45_spill] sm:$0xff] %v4715_v22  ;;  %5884 = vst [vmem:[#allocation18_spill] sm:$0xff] %v4789_v49  ;;  %v4807_v49 = vstv %s4700_s20  ;;  %v1245_v3 = vmul.f32 %v1244_v19, %v4476_v58  ;;  %v1247_v61 = vmul.f32 %v1244_v19, %v4488_v41  ;;  %v1246_v54 = vmul.f32 %v1244_v19, %v4490_v35  ;;  %s2420_s20 = sld [smem:[#allocation7 + $0x57]] }
 0x395   :  { %5885 = vst [vmem:[#allocation20_spill] sm:$0xff] %v4792_v0  ;;  %5886 = vst [vmem:[#allocation15_spill] sm:$0xff] %v4795_v23  ;;  %v1227_v23 = vmul.f32 %v1222_v39, %v4478_v40  ;;  %v4823_v0 = vstv %s4711_s1  ;;  %v4828_v15 = vstv %s4725_s23  ;;  %v1249_v51 = vmul.f32 %v1244_v19, %v4498_v24  ;;  %s2424_s22 = sld [smem:[#allocation7 + $0x5b]] }
 0x396   :  { %v4837_v58 = vstv %s4745_s25  ;;  %v1230_v40 = vadd.f32 %v1225_v56, %v1208_v59  ;;  %v1248_v39 = vmul.f32 %v1244_v19, %v4500_v5  ;;  %v1268_v41 = vmul.f32 %v1266_v4, %v4506_v57  ;;  %s2423_s1 = sld [smem:[#allocation7 + $0x5a]] }
 0x397   :  { %v4767_v33 = vpop.permute.xlu0 %1540  ;;  %v1267_v35 = vmul.f32 %v1266_v4, %v4508_v31  ;;  %v1231_v22 = vadd.f32 %v1226_v8, %v4709_v63  ;;  %v1269_v59 = vmul.f32 %v1266_v4, %v4516_v47  ;;  %v4852_v56 = vstv %s4786_s0  ;;  %s2425_s23 = sld [smem:[#allocation7 + $0x5c]] }
 0x398   :  { %v4765_v1 = vpop.permute.xlu1 %1542  ;;  %5881 = vst [vmem:[#allocation71_spill] sm:$0xff] %v4767_v33  ;;  %v1228_v33 = vadd.f32 %v1223_v25, %v1206_v16  ;;  %v1232_v16 = vadd.f32 %v1227_v23, %v1210_v45  ;;  %v1252_v24 = vadd.f32 %v1247_v61, %v1230_v40  ;;  %v1270_v57 = vmul.f32 %v1266_v4, %v4514_v52  ;;  %s2427_s25 = sld [smem:[#allocation7 + $0x5e]] }
 0x399   :  { %5880 = vst [vmem:[#allocation69_spill] sm:$0xff] %v4765_v1  ;;  %v1229_v1 = vadd.f32 %v1224_v60, %v1207_v48  ;;  %v4848_v60 = vstv %s4778_s26  ;;  %v1289_v31 = vmul.f32 %v4784_v62, %v4522_v43  ;;  %v1271_v19 = vmul.f32 %v1266_v4, %v4524_v55  ;;  %v5888_v4 = vld [vmem:[#allocation70_spill] sm:$0xff]  ;;  %s2429_s26 = sld [smem:[#allocation7 + $0x60]] }
 0x39a   :  { %v1250_v48 = vadd.f32 %v1245_v3, %v1228_v33  ;;  %v1254_v5 = vadd.f32 %v1249_v51, %v1232_v16  ;;  %v1253_v45 = vadd.f32 %v1248_v39, %v1231_v22  ;;  %v1290_v52 = vmul.f32 %v4784_v62, %v4532_v30  ;;  %v5889_v51 = vld [vmem:[#allocation60_spill] sm:$0xff]  ;;  %s2428_s0 = sld [smem:[#allocation7 + $0x5f]] }
 0x39b   :  { %v4817_v20 = vpop.permute.xlu0 %1556  ;;  %v1251_v25 = vadd.f32 %v1246_v54, %v1229_v1  ;;  %v1291_v1 = vmul.f32 %v4784_v62, %v4530_v11  ;;  %v1324_v43 = vmul.f32 %v4800_v10, %v4546_v32  ;;  %v1323_v55 = vmul.f32 %v4800_v10, %v4548_v12 }
 0x39c   :  { %v4815_v29 = vpop.permute.xlu1 %1558  ;;  %v1272_v33 = vadd.f32 %v1267_v35, %v1250_v48  ;;  %vm1729_vm3 = vcmp.lt.s32.totalorder %v5888_v4, 32  ;;  %v1274_v22 = vadd.f32 %v1269_v59, %v1252_v24  ;;  %v1325_v23 = vmul.f32 %v4800_v10, %v4556_v21 }
 0x39d   :  { %5887 = vst [vmem:[#allocation24_spill] sm:$0xff] %v4815_v29  ;;  %v1273_v63 = vadd.f32 %v1268_v41, %v1251_v25  ;;  %v4876_v11 = vstv %s4833_s30  ;;  %vm1731_vm4 = vcmp.lt.s32.totalorder %v5888_v4, 68  ;;  %v1275_v8 = vadd.f32 %v1270_v57, %v1253_v45  ;;  %vm4905_vm5 = vmand %vm613_vm0, %vm1729_vm3  ;;  %v5895_v25 = vld [vmem:[#allocation57_spill] sm:$0xff]  ;;  %v5896_v57 = vld [vmem:[#allocation22_spill] sm:$0xff]  ;;  %s2430_s30 = sld [smem:[#allocation7 + $0x61]] }
 0x39e   :  { %v4881_v30 = vadd.f32 %v1289_v31, %v1272_v33  ;;  %v1276_v3 = vadd.f32 %v1271_v19, %v1254_v5  ;;  %v1293_v32 = vmul.f32 %v4784_v62, %v4538_v14  ;;  %v4887_v12 = vadd.f32 %v1291_v1, %v1274_v22  ;;  %vm4917_vm7 = vmand %vm616_vm2, %vm1731_vm4  ;;  %v5897_v31 = vld [vmem:[#allocation29_spill] sm:$0xff]  ;;  %v5898_v19 = vld [vmem:[#allocation28_spill] sm:$0xff] }
 0x39f   :  { %v4844_v53 = vpop.permute.xlu0 %1560  ;;  %v1345_v21 = vmul.f32 %v4803_v27, %v4566_v13  ;;  %v1347_v61 = vmul.f32 %v4803_v27, %v4578_v46  ;;  %v1346_v40 = vmul.f32 %v4803_v27, %v5889_v51  ;;  %v1295_v13 = vadd.f32 %v1290_v52, %v1273_v63  ;;  %v5892_v46 = vld [vmem:[#allocation19_spill] sm:$0xff]  ;;  %v5899_v63 = vld [vmem:[#allocation17_spill] sm:$0xff]  ;;  %vm1733_vm8 = vmor %vm4905_vm5, %vm4917_vm7 }
 0x3a0   :  { %v4842_v29 = vpop.permute.xlu1 %1562  ;;  %v1292_v35 = vmul.f32 %v4784_v62, %v5892_v46  ;;  %v1329_v48 = vadd.f32 %v1324_v43, %v4720_v50  ;;  %v1328_v16 = vadd.f32 %v1323_v55, %v4723_v44  ;;  %v1326_v59 = vmul.f32 %v4800_v10, %v5895_v25  ;;  %v5900_v55 = vld [vmem:[#allocation31_spill] sm:$0xff]  ;;  %v5902_v51 = vld [vmem:[#allocation26_spill] sm:$0xff]  ;;  %vm1734_vm9 = vmand %vm598_vm6, %vm1733_vm8 }
 0x3a1   :  { %v1330_v5 = vadd.f32 %v1325_v23, %v4754_v18  ;;  %v1327_v62 = vmul.f32 %v4800_v10, %v5896_v57  ;;  %v1367_v50 = vmul.f32 %v4807_v49, %v5897_v31  ;;  %v4930_v44 = vadd.f32 %v1293_v32, %v1276_v3  ;;  %v5901_v3 = vld [vmem:[#allocation25_spill] sm:$0xff]  ;;  %v5904_v46 = vld [vmem:[#allocation34_spill] sm:$0xff]  ;;  %v5926_v4 = vld [vmem:[#allocation47_spill] sm:$0xff] }
 0x3a2   :  { %v1368_v45 = vmul.f32 %v4807_v49, %v5898_v19  ;;  %v1369_v33 = vmul.f32 %v4807_v49, %v5899_v63  ;;  %v4937_v1 = vstv %s4858_s4  ;;  %v1350_v52 = vadd.f32 %v1345_v21, %v1328_v16  ;;  %v5905_v19 = vld [vmem:[#allocation30_spill] sm:$0xff]  ;;  %s2431_s4 = sld [smem:[#allocation7 + $0x62]] }
 0x3a3   :  { %v4864_v54 = vpop.permute.xlu0 %1564  ;;  %v1352_v18 = vadd.f32 %v1347_v61, %v1330_v5  ;;  %v1351_v43 = vadd.f32 %v1346_v40, %v1329_v48  ;;  %v1389_v10 = vmul.f32 %v4810_v37, %v5900_v55  ;;  %v1349_v32 = vmul.f32 %v4803_v27, %v5901_v3  ;;  %v5903_v61 = vld [vmem:[#allocation33_spill] sm:$0xff]  ;;  %v5908_v3 = vld [vmem:[#allocation35_spill] sm:$0xff] }
 0x3a4   :  { %v4862_v47 = vpop.permute.xlu1 %1578  ;;  %v1348_v21 = vmul.f32 %v4803_v27, %v5902_v51  ;;  %v1391_v40 = vmul.f32 %v4810_v37, %v5903_v61  ;;  %v1390_v48 = vmul.f32 %v4810_v37, %v5904_v46  ;;  %v4957_v16 = vadd.f32 %v1292_v35, %v1275_v8  ;;  %v5909_v61 = vld [vmem:[#allocation62_spill] sm:$0xff]  ;;  %v5911_v55 = vld [vmem:[#allocation37_spill] sm:$0xff] }
 0x3a5   :  { %v1331_v25 = vadd.f32 %v1326_v59, %v4743_v26  ;;  %v1332_v5 = vadd.f32 %v1327_v62, %v4770_v34  ;;  %v1372_v57 = vadd.f32 %v1367_v50, %v1350_v52  ;;  %v1373_v31 = vadd.f32 %v1368_v45, %v1351_v43  ;;  %v5907_v26 = vld [vmem:[#allocation32_spill] sm:$0xff] }
 0x3a6   :  { %v1370_v63 = vmul.f32 %v4807_v49, %v5905_v19  ;;  %v1374_v27 = vadd.f32 %v1369_v33, %v1352_v18  ;;  %v1740_v8 = vstv %s4885_s6  ;;  %v1371_v34 = vmul.f32 %v4807_v49, %v5907_v26  ;;  %v5910_v19 = vld [vmem:[#allocation36_spill] sm:$0xff]  ;;  %s5498_s6 = sld [smem:[#allocation8 + $0x3]] }
 0x3a7   :  { %v4897_v41 = vpop.permute.xlu0 %1580  ;;  %v1394_v35 = vadd.f32 %v1389_v10, %v1372_v57  ;;  %v4978_v50 = vstv %s4878_s5  ;;  %v4981_v45 = vstv %s4899_s7  ;;  %v1354_v33 = vadd.f32 %v1349_v32, %v1332_v5  ;;  %v5913_v5 = vld [vmem:[#allocation38_spill] sm:$0xff]  ;;  %s5494_s5 = sld [smem:[#allocation7 + $0x63]]  ;;  %s2527_s7 = smov [#allocation10]  }
 0x3a8   :  { %v4895_v39 = vpop.permute.xlu1 %1582  ;;  %v1353_v52 = vadd.f32 %v1348_v21, %v1331_v25  ;;  %v1396_v18 = vadd.f32 %v1391_v40, %v1374_v27  ;;  %v1395_v43 = vadd.f32 %v1390_v48, %v1373_v31  ;;  %v1393_v51 = vmul.f32 %v4810_v37, %v5908_v3  ;;  %v5912_v48 = vld [vmem:[#allocation61_spill] sm:$0xff] }
 0x3a9   :  { %v1392_v10 = vmul.f32 %v4810_v37, %v5909_v61  ;;  %v4988_v46 = vstv %s4928_s8  ;;  %v4990_v49 = vsel %vm1734_vm9, %v1740_v8, 0.0  ;;  %v1424_v26 = vmul.f32 %v4813_v42, %v5910_v19  ;;  %v5917_v61 = vld [vmem:[#allocation40_spill] sm:$0xff]  ;;  %s2318_s8 = sshll.u32 %s2527_s7, 4  ;;  %s2319_s8 = int_to_ptr.vmem [resolvable:$true] %s2318_s8 }
 0x3aa   :  { %v1375_v57 = vadd.f32 %v1370_v63, %v1353_v52  ;;  %v1423_v32 = vmul.f32 %v4813_v42, %v5911_v55  ;;  %v5001_v21 = vsel %vm1733_vm8, %v1740_v8, 0.0  ;;  %v5004_v37 = vadd.f32 %v1394_v35, %v4881_v30  ;;  %v5914_v55 = vld [vmem:[#allocation39_spill] sm:$0xff]  ;;  %v5916_v52 = vld [vmem:[#allocation64_spill] sm:$0xff]  ;;  %p2494_p2 = scmp.lt.s32.totalorder %s2319_s8, %s2319_s8 }
 0x3ab   :  { %v4943_v23 = vpop.permute.xlu0 %1584  ;;  %v1376_v40 = vadd.f32 %v1371_v34, %v1354_v33  ;;  %v1426_v25 = vmul.f32 %v4813_v42, %v5912_v48  ;;  %v1425_v31 = vmul.f32 %v4813_v42, %v5913_v5  ;;  %v5015_v14 = vadd.f32 %v1396_v18, %v4887_v12  ;;  %v5915_v8 = vld [vmem:[#allocation63_spill] sm:$0xff]  ;;  %v5919_v48 = vld [vmem:[#allocation41_spill] sm:$0xff]  ;;  %v5921_v5 = vld [vmem:[#allocation66_spill] sm:$0xff] }
 0x3ac   :  { %v4941_v22 = vpop.permute.xlu1 %1586  ;;  %v5017_v24 = vadd.f32 %v1395_v43, %v1295_v13  ;;  %v1445_v30 = vmul.f32 %v4823_v0, %v5914_v55  ;;  %v1427_v35 = vmul.f32 %v4813_v42, %v5915_v8  ;;  %v5025_v33 = vadd.f32 %v1392_v10, %v1375_v57  ;;  %v5918_v18 = vld [vmem:[#allocation51_spill] sm:$0xff]  ;;  %v5920_v57 = vld [vmem:[#allocation42_spill] sm:$0xff] }
 0x3ad   :  { %v5023_v34 = vadd.f32 %v1393_v51, %v1376_v40  ;;  %v1447_v3 = vmul.f32 %v4823_v0, %v5916_v52  ;;  %v1446_v19 = vmul.f32 %v4823_v0, %v5917_v61  ;;  %v1429_v12 = vadd.f32 %v1424_v26, %v4728_v7  ;;  %v5923_v52 = vld [vmem:[#allocation53_spill] sm:$0xff] }
 0x3ae   :  { %v1428_v13 = vadd.f32 %v1423_v32, %v4731_v2  ;;  %v1449_v43 = vmul.f32 %v4823_v0, %v5918_v18  ;;  %v1448_v42 = vmul.f32 %v4823_v0, %v5919_v48  ;;  %v1431_v51 = vadd.f32 %v1426_v25, %v4757_v38  ;;  %v5922_v32 = vld [vmem:[#allocation68_spill] sm:$0xff]  ;;  %v5925_v18 = vld [vmem:[#allocation58_spill] sm:$0xff] }
 0x3af   :  { %v4975_v62 = vpop.permute.xlu0 %1612  ;;  %v1430_v10 = vadd.f32 %v1425_v31, %v4760_v28  ;;  %v1468_v40 = vmul.f32 %v4828_v15, %v5920_v57  ;;  %v1523_v55 = vmul.f32 %v4837_v58, %v5921_v5  ;;  %v1432_v26 = vadd.f32 %v1427_v35, %v4773_v17  ;;  %v5924_v31 = vld [vmem:[#allocation46_spill] sm:$0xff]  ;;  %v5927_v17 = vld [vmem:[#allocation43_spill] sm:$0xff] }
 0x3b0   :  { %v4973_v59 = vpop.permute.xlu1 %1614  ;;  %v1450_v2 = vadd.f32 %v1445_v30, %v1428_v13  ;;  %v1467_v0 = vmul.f32 %v4828_v15, %v5922_v32  ;;  %v1470_v38 = vmul.f32 %v4828_v15, %v5923_v52  ;;  %v1451_v25 = vadd.f32 %v1446_v19, %v1429_v12  ;;  %v5928_v52 = vld [vmem:[#allocation48_spill] sm:$0xff] }
 0x3b1   :  { %v1452_v28 = vadd.f32 %v1447_v3, %v1430_v10  ;;  %v1469_v61 = vmul.f32 %v4828_v15, %v5924_v31  ;;  %v1545_v48 = vmul.f32 %v4848_v60, %v5925_v18  ;;  %v1454_v57 = vadd.f32 %v1449_v43, %v1432_v26  ;;  %v5930_v26 = vld [vmem:[#allocation44_spill] sm:$0xff]  ;;  %v5931_v18 = vld [vmem:[#allocation54_spill] sm:$0xff] }
 0x3b2   :  { %v1453_v5 = vadd.f32 %v1448_v42, %v1431_v51  ;;  %v1489_v30 = vmul.f32 %v4831_v6, %v5926_v4  ;;  %v1471_v35 = vmul.f32 %v4828_v15, %v5927_v17  ;;  %v1473_v13 = vadd.f32 %v1468_v40, %v1451_v25  ;;  %v5929_v51 = vld [vmem:[#allocation59_spill] sm:$0xff] }
 0x3b3   :  { %v5012_v27 = vpop.permute.xlu0 %1616  ;;  %v1528_v32 = vadd.f32 %v1523_v55, %v4739_v9  ;;  %v1525_v3 = vmul.f32 %v4837_v58, %v5928_v52  ;;  %v1567_v19 = vmul.f32 %v4852_v56, %v4817_v20  ;;  %v1472_v43 = vadd.f32 %v1467_v0, %v1450_v2  ;;  %v5932_v0 = vld [vmem:[#allocation45_spill] sm:$0xff]  ;;  %v5934_v52 = vld [vmem:[#allocation16_spill] sm:$0xff] }
 0x3b4   :  { %v5010_v63 = vpop.permute.xlu1 %1618  ;;  %v1475_v42 = vadd.f32 %v1470_v38, %v1453_v5  ;;  %v1491_v4 = vmul.f32 %v4831_v6, %v5929_v51  ;;  %v1524_v15 = vmul.f32 %v4837_v58, %v5930_v26  ;;  %v1474_v40 = vadd.f32 %v1469_v61, %v1452_v28  ;;  %v5933_v5 = vld [vmem:[#allocation21_spill] sm:$0xff]  ;;  %v5937_v51 = vld [vmem:[#allocation24_spill] sm:$0xff] }
 0x3b5   :  { %v1550_v25 = vadd.f32 %v1545_v48, %v1528_v32  ;;  %v1547_v9 = vmul.f32 %v4848_v60, %v4713_v36  ;;  %v1589_v55 = vmul.f32 %v4876_v11, %v4862_v47  ;;  %v1494_v20 = vadd.f32 %v1489_v30, %v1472_v43  ;;  %v5935_v30 = vld [vmem:[#allocation65_spill] sm:$0xff] }
 0x3b6   :  { %v1476_v31 = vadd.f32 %v1471_v35, %v1454_v57  ;;  %v1490_v2 = vmul.f32 %v4831_v6, %v5931_v18  ;;  %v1546_v38 = vmul.f32 %v4848_v60, %v5932_v0  ;;  %v1526_v17 = vmul.f32 %v4837_v58, %v5933_v5  ;;  %v5936_v35 = vld [vmem:[#allocation67_spill] sm:$0xff] }
 0x3b7   :  { %v5045_v7 = vpop.permute.xlu0 %1620  ;;  %v1530_v28 = vadd.f32 %v1525_v3, %v5934_v52  ;;  %v1572_v61 = vadd.f32 %v1567_v19, %v1550_v25  ;;  %v1569_v36 = vmul.f32 %v4852_v56, %v4844_v53  ;;  %v1496_v47 = vadd.f32 %v1491_v4, %v1474_v40  ;;  %v5938_v0 = vld [vmem:[#allocation71_spill] sm:$0xff]  ;;  %v5939_v53 = vld [vmem:[#allocation50_spill] sm:$0xff]  ;;  %v5940_v40 = vld [vmem:[#allocation69_spill] sm:$0xff] }
 0x3b8   :  { %v5043_v8 = vpop.permute.xlu1 %1634  ;;  %v1529_v57 = vadd.f32 %v1524_v15, %v5935_v30  ;;  %v1527_v43 = vmul.f32 %v4837_v58, %v5936_v35  ;;  %v1568_v26 = vmul.f32 %v4852_v56, %v5937_v51  ;;  %v1548_v5 = vmul.f32 %v4848_v60, %v5938_v0  ;;  %v5941_v52 = vld [vmem:[#allocation52_spill] sm:$0xff] }
 0x3b9   :  { %v1552_v18 = vadd.f32 %v1547_v9, %v1530_v28  ;;  %v1594_v3 = vadd.f32 %v1589_v55, %v1572_v61  ;;  %v1591_v19 = vmul.f32 %v4876_v11, %v4895_v39  ;;  %v1493_v25 = vmul.f32 %v4831_v6, %v5939_v53  ;;  %v5942_v28 = vld [vmem:[#allocation55_spill] sm:$0xff]  ;;  %v5943_v51 = vld [vmem:[#allocation72_spill] sm:$0xff] }
 0x3ba   :  { %v1551_v4 = vadd.f32 %v1546_v38, %v1529_v57  ;;  %v1549_v15 = vmul.f32 %v4848_v60, %v5940_v40  ;;  %v1590_v58 = vmul.f32 %v4876_v11, %v4897_v41  ;;  %v1492_v9 = vmul.f32 %v4831_v6, %v5941_v52 }
 0x3bb   :  { %v1637_v10 = vpop.permute.xlu0 %1636  ;;  %v1531_v30 = vadd.f32 %v1526_v17, %v5942_v28  ;;  %v1570_v55 = vmul.f32 %v4852_v56, %v4842_v29  ;;  %v1574_v61 = vadd.f32 %v1569_v36, %v1552_v18  ;;  %v1532_v0 = vadd.f32 %v1527_v43, %v5943_v51  ;;  %v5947_v51 = vld [vmem:[#allocation18_spill] sm:$0xff] }
 0x3bc   :  { %v5065_v12 = vpop.permute.xlu1 %1638  ;;  %v1573_v38 = vadd.f32 %v1568_v26, %v1551_v4  ;;  %v1571_v60 = vmul.f32 %v4852_v56, %v4864_v54  ;;  %v1623_v41 = vmul.f32 %v4937_v1, %v4975_v62  ;;  %v1495_v57 = vadd.f32 %v1490_v2, %v1473_v13  ;;  %v5944_v2 = vld [vmem:[#allocation49_spill] sm:$0xff] }
 0x3bd   :  { %v1553_v53 = vadd.f32 %v1548_v5, %v1531_v30  ;;  %v1704_v6 = vadd.f32 %v1594_v3, %v1494_v20  ;;  %v1596_v40 = vadd.f32 %v1591_v19, %v1574_v61  ;;  %v1498_v17 = vadd.f32 %v1493_v25, %v1476_v31 }
 0x3be   :  { %v1554_v52 = vadd.f32 %v1549_v15, %v1532_v0  ;;  %v1595_v28 = vadd.f32 %v1590_v58, %v1573_v38  ;;  %v1645_v29 = vmul.f32 %v4978_v50, %v5043_v8  ;;  %v1497_v36 = vadd.f32 %v1492_v9, %v1475_v42  ;;  %v5946_v58 = vld [vmem:[#allocation20_spill] sm:$0xff]  ;;  %v5948_v38 = vld [vmem:[#allocation15_spill] sm:$0xff] }
 0x3bf   :  { %v1641_v32 = vpop.permute.xlu0 %1640  ;;  %v1575_v18 = vadd.f32 %v1570_v55, %v1553_v53  ;;  %v1593_v43 = vmul.f32 %v4876_v11, %v4941_v22  ;;  %v1624_v56 = vmul.f32 %v4937_v1, %v4973_v59  ;;  %v1628_v20 = vadd.f32 %v1623_v41, %v5944_v2 }
 0x3c0   :  { %v1643_v48 = vpop.permute.xlu1 %1642  ;;  %v1576_v13 = vadd.f32 %v1571_v60, %v1554_v52  ;;  %v1625_v31 = vmul.f32 %v4937_v1, %v5012_v27  ;;  %v1706_v5 = vadd.f32 %v1596_v40, %v1496_v47  ;;  %v1592_v8 = vmul.f32 %v4876_v11, %v4943_v23  ;;  %v5945_v27 = vld [vmem:[#allocation56_spill] sm:$0xff] }
 0x3c1   :  { %v1646_v42 = vmul.f32 %v4978_v50, %v1637_v10  ;;  %v1709_v22 = vadd.f32 %v1704_v6, %v5004_v37  ;;  %v1705_v3 = vadd.f32 %v1595_v28, %v1495_v57  ;;  %v1626_v59 = vmul.f32 %v4937_v1, %v5010_v63 }
 0x3c2   :  { %v1650_v19 = vadd.f32 %v1645_v29, %v1628_v20  ;;  %v1647_v25 = vmul.f32 %v4978_v50, %v5065_v12  ;;  %v1598_v4 = vadd.f32 %v1593_v43, %v1576_v13  ;;  %v1629_v15 = vadd.f32 %v1624_v56, %v5945_v27 }
 0x3c3   :  { %v1657_v35 = vpop.permute.xlu0 %1656  ;;  %v1627_v47 = vmul.f32 %v4937_v1, %v5045_v7  ;;  %v1630_v37 = vadd.f32 %v1625_v31, %v5946_v58  ;;  %v1597_v55 = vadd.f32 %v1592_v8, %v1575_v18  ;;  %v1649_v12 = vmul.f32 %v4978_v50, %v1643_v48 }
 0x3c4   :  { %v1659_v39 = vpop.permute.xlu1 %1658  ;;  %v1667_v26 = vmul.f32 %v4981_v45, %v1657_v35  ;;  %v1651_v61 = vadd.f32 %v1646_v42, %v1629_v15  ;;  %v1648_v35 = vmul.f32 %v4978_v50, %v1641_v32  ;;  %v1631_v0 = vadd.f32 %v1626_v59, %v5947_v51 }
 0x3c5   :  { %v1668_v11 = vmul.f32 %v4981_v45, %v1659_v39  ;;  %v1652_v1 = vadd.f32 %v1647_v25, %v1630_v37  ;;  %v1711_v39 = vadd.f32 %v1706_v5, %v5015_v14  ;;  %v1632_v60 = vadd.f32 %v1627_v47, %v5948_v38 }
 0x3c6   :  { %v1672_v9 = vadd.f32 %v1667_v26, %v1650_v19  ;;  %v1708_v32 = vadd.f32 %v1598_v4, %v1498_v17  ;;  %v1707_v29 = vadd.f32 %v1597_v55, %v1497_v36  ;;  %v1653_v43 = vadd.f32 %v1648_v35, %v1631_v0 }
 0x3c7   :  { %v1661_v62 = vpop.permute.xlu0 %1660  ;;  %v1673_v41 = vadd.f32 %v1668_v11, %v1651_v61  ;;  %v1654_v18 = vadd.f32 %v1649_v12, %v1632_v60  ;;  %v1702_v13 = vadd.f32 %v5025_v33, %v4957_v16  ;;  %v1779_v58 = vstv %s2409_s10 }
 0x3c8   :  { %v1663_v54 = vpop.permute.xlu1 %1662  ;;  %v1669_v30 = vmul.f32 %v4981_v45, %v1661_v62 }
 0x3c9   :  { %v1670_v57 = vmul.f32 %v4981_v45, %v1663_v54  ;;  %v1710_v54 = vadd.f32 %v1705_v3, %v5017_v24 }
 0x3ca   :  { %v1674_v52 = vadd.f32 %v1669_v30, %v1652_v1 }
 0x3cb   :  { %v1665_v10 = vpop.permute.xlu0 %1664  ;;  %v1675_v2 = vadd.f32 %v1670_v57, %v1653_v43  ;;  %v1801_v57 = vstv %s2410_s11 }
 0x3cc   :  { %v1679_v23 = vpop.permute.xlu1 %1678  ;;  %v1671_v53 = vmul.f32 %v4981_v45, %v1665_v10  ;;  %v1703_v45 = vadd.f32 %v5023_v34, %v4930_v44  ;;  %v1712_v44 = vadd.f32 %v1707_v29, %v1702_v13  ;;  %v1762_v10 = vstv %s2408_s9  ;;  %s2489_s9 = scalar_lea.vmem %s2319_s8, 640 }
 0x3cd   :  { %v1689_v63 = vmul.f32 %v4988_v46, %v1679_v23  ;;  %p2490_p1 = scmp.ne.s32.totalorder %s2319_s8, %s2489_s9  ;;  %p2495_p3 = scmp.lt.s32.totalorder %s2489_s9, %s2489_s9 }
 0x3ce   :  { %v1676_v20 = vadd.f32 %v1671_v53, %v1654_v18  ;;  %v1713_v24 = vadd.f32 %v1708_v32, %v1703_v45 }
 0x3cf   :  { %v1694_v7 = vadd.f32 %v1689_v63, %v1672_v9  ;;  %v1681_v40 = vpop.permute.xlu0 %1680  ;;  %p2496_p4 = por %p2495_p3, %p2494_p2 }
 0x3d0   :  { %v1683_v6 = vpop.permute.xlu1 %1682  ;;  %v1690_v50 = vmul.f32 %v4988_v46, %v1681_v40 }
 0x3d1   :  { %v1714_v28 = vadd.f32 %v1709_v22, %v1694_v7  ;;  %v1691_v48 = vmul.f32 %v4988_v46, %v1683_v6  ;;  %p2497_p5 = pnand %p2496_p4, %p2490_p1 }
 0x3d2   :  { %v1695_v62 = vadd.f32 %v1690_v50, %v1673_v41 }
 0x3d3   :  { %v5144_v14 = vadd.f32 %v4990_v49, %v1714_v28  ;;  %v1696_v56 = vadd.f32 %v1691_v48, %v1674_v52  ;;  %v1685_v17 = vpop.permute.xlu0 %1684 }
 0x3d4   :  { %v1687_v31 = vpop.permute.xlu1 %1686  ;;  %v1715_v26 = vadd.f32 %v1710_v54, %v1695_v62  ;;  %v1692_v5 = vmul.f32 %v4988_v46, %v1685_v17 }
 0x3d5   :  { %1751 = vst [vmem:[#allocation2 + $0x4] sm:$0xff] %v5144_v14  ;;  %v1716_v36 = vadd.f32 %v1711_v39, %v1696_v56  ;;  %v1693_v49 = vmul.f32 %v4988_v46, %v1687_v31  ;;  %1769 = vrot.lane.b32.xlu0 %v5144_v14, %s2523_s2  ;;  %v1763_v53 = vmul.f32 %v1762_v10, %v5144_v14 }
 0x3d6   :  { %v5160_v16 = vadd.f32 %v5001_v21, %v1715_v26  ;;  %v1697_v8 = vadd.f32 %v1692_v5, %v1675_v2 }
 0x3d7   :  { %v5157_v34 = vadd.f32 %v5001_v21, %v1716_v36  ;;  %v1698_v33 = vadd.f32 %v1693_v49, %v1676_v20  ;;  %v1823_v20 = vstv %s2411_s12 }
 0x3d8   :  { %1752 = vst [vmem:[#allocation2 + $0xc] sm:$0xff] %v5160_v16  ;;  %v1717_v46 = vadd.f32 %v1712_v44, %v1697_v8  ;;  %1771 = vrot.lane.b32.xlu1 %v5160_v16, %s2523_s2  ;;  %v1764_v6 = vmul.f32 %v1762_v10, %v5160_v16 }
 0x3d9   :  { %1753 = vst [vmem:[#allocation2 + $0x14] sm:$0xff] %v5157_v34  ;;  %v5164_v42 = vadd.f32 %v1713_v24, %v1698_v33  ;;  %1773 = vrot.lane.b32.xlu0 %v5157_v34, %s2523_s2  ;;  %v1765_v30 = vmul.f32 %v1762_v10, %v5157_v34 }
 0x3da   :  { %v5172_v22 = vadd.f32 %v5001_v21, %v1717_v46 }
 0x3db   :  { %1755 = vst [vmem:[#allocation2 + $0x24] sm:$0xff] %v5164_v42  ;;  %v1767_v51 = vmul.f32 %v1762_v10, %v5164_v42 }
 0x3dc   :  { %1754 = vst [vmem:[#allocation2 + $0x1c] sm:$0xff] %v5172_v22  ;;  %1775 = vrot.lane.b32.xlu1 %v5172_v22, %s2523_s2  ;;  %v5207_v21 = vld [vmem:[#allocation2 + $0x3] sm:$0xff]  ;;  %v1766_v35 = vmul.f32 %v1762_v10, %v5172_v22 }
 0x3dd   :  { %1777 = vrot.lane.b32.xlu0 %v5164_v42, %s2523_s2  ;;  %v5257_v4 = vld [vmem:[#allocation2 + $0x2] sm:$0xff] }
 0x3de   :  { %v5308_v55 = vld [vmem:[#allocation2 + $0x1] sm:$0xff] }
 0x3df   :  { %v5213_v3 = vld [vmem:[#allocation2 + $0xb] sm:$0xff] }
 0x3e0   :  { %1791 = vrot.lane.b32.xlu1 %v5144_v14, %s2524_s27  ;;  %v5215_v59 = vld [vmem:[#allocation2 + $0x13] sm:$0xff]  ;;  %v5263_v27 = vld [vmem:[#allocation2 + $0xa] sm:$0xff] }
 0x3e1   :  { %1793 = vrot.lane.b32.xlu0 %v5160_v16, %s2524_s27  ;;  %v5265_v15 = vld [vmem:[#allocation2 + $0x12] sm:$0xff]  ;;  %v5316_v60 = vld [vmem:[#allocation2 + $0x9] sm:$0xff] }
 0x3e2   :  { %v5318_v41 = vld [vmem:[#allocation2 + $0x11] sm:$0xff] }
 0x3e3   :  { %v5221_v19 = vld [vmem:[#allocation2 + $0x1b] sm:$0xff]  ;;  %v5223_v25 = vld [vmem:[#allocation2 + $0x23] sm:$0xff] }
 0x3e4   :  { %1795 = vrot.lane.b32.xlu1 %v5157_v34, %s2524_s27  ;;  %v5271_v47 = vld [vmem:[#allocation2 + $0x1a] sm:$0xff]  ;;  %v5273_v11 = vld [vmem:[#allocation2 + $0x22] sm:$0xff] }
 0x3e5   :  { %1797 = vrot.lane.b32.xlu0 %v5172_v22, %s2524_s27  ;;  %v5326_v43 = vld [vmem:[#allocation2 + $0x19] sm:$0xff]  ;;  %v5328_v56 = vld [vmem:[#allocation2 + $0x21] sm:$0xff] }
 0x3e8   :  { %1799 = vrot.lane.b32.xlu1 %v5164_v42, %s2524_s27 }
 0x3e9   :  { %1813 = vrot.lane.b32.xlu0 %v5144_v14, %s2525_s28 }
 0x3ec   :  { %1815 = vrot.lane.b32.xlu1 %v5160_v16, %s2525_s28 }
 0x3ed   :  { %1817 = vrot.lane.b32.xlu0 %v5157_v34, %s2525_s28 }
 0x3f0   :  { %1819 = vrot.lane.b32.xlu1 %v5172_v22, %s2525_s28 }
 0x3f1   :  { %1821 = vrot.lane.b32.xlu0 %v5164_v42, %s2525_s28 }
 0x3f4   :  { %1835 = vrot.lane.b32.xlu1 %v5144_v14, %s2526_s29 }
 0x3f5   :  { %1837 = vrot.lane.b32.xlu0 %v5160_v16, %s2526_s29 }
 0x3f8   :  { %1839 = vrot.lane.b32.xlu1 %v5157_v34, %s2526_s29 }
 0x3f9   :  { %1841 = vrot.lane.b32.xlu0 %v5172_v22, %s2526_s29 }
 0x3fc   :  { %1843 = vrot.lane.b32.xlu1 %v5164_v42, %s2526_s29 }
 0x3fd   :  { %1869 = vrot.lane.b32.xlu0 %v5207_v21, %s2523_s2 }
 0x400   :  { %1871 = vrot.lane.b32.xlu1 %v5213_v3, %s2523_s2 }
 0x401   :  { %1873 = vrot.lane.b32.xlu0 %v5215_v59, %s2523_s2 }
 0x404   :  { %1875 = vrot.lane.b32.xlu1 %v5221_v19, %s2523_s2 }
 0x405   :  { %1877 = vrot.lane.b32.xlu0 %v5223_v25, %s2523_s2 }
 0x408   :  { %1891 = vrot.lane.b32.xlu1 %v5207_v21, %s2524_s27 }
 0x409   :  { %1893 = vrot.lane.b32.xlu0 %v5213_v3, %s2524_s27 }
 0x40c   :  { %1895 = vrot.lane.b32.xlu1 %v5215_v59, %s2524_s27 }
 0x40d   :  { %1897 = vrot.lane.b32.xlu0 %v5221_v19, %s2524_s27 }
 0x410   :  { %1899 = vrot.lane.b32.xlu1 %v5223_v25, %s2524_s27 }
 0x411   :  { %1913 = vrot.lane.b32.xlu0 %v5207_v21, %s2525_s28 }
 0x414   :  { %1915 = vrot.lane.b32.xlu1 %v5213_v3, %s2525_s28 }
 0x415   :  { %1917 = vrot.lane.b32.xlu0 %v5215_v59, %s2525_s28 }
 0x418   :  { %1919 = vrot.lane.b32.xlu1 %v5221_v19, %s2525_s28 }
 0x419   :  { %1921 = vrot.lane.b32.xlu0 %v5223_v25, %s2525_s28 }
 0x41c   :  { %1935 = vrot.lane.b32.xlu1 %v5207_v21, %s2526_s29 }
 0x41d   :  { %1937 = vrot.lane.b32.xlu0 %v5213_v3, %s2526_s29 }
 0x420   :  { %1939 = vrot.lane.b32.xlu1 %v5215_v59, %s2526_s29 }
 0x421   :  { %1941 = vrot.lane.b32.xlu0 %v5221_v19, %s2526_s29 }
 0x424   :  { %1943 = vrot.lane.b32.xlu1 %v5223_v25, %s2526_s29 }
 0x425   :  { %1969 = vrot.lane.b32.xlu0 %v5257_v4, %s2523_s2 }
 0x428   :  { %1971 = vrot.lane.b32.xlu1 %v5263_v27, %s2523_s2 }
 0x429   :  { %1973 = vrot.lane.b32.xlu0 %v5265_v15, %s2523_s2 }
 0x42c   :  { %1975 = vrot.lane.b32.xlu1 %v5271_v47, %s2523_s2 }
 0x42d   :  { %1977 = vrot.lane.b32.xlu0 %v5273_v11, %s2523_s2 }
 0x430   :  { %1991 = vrot.lane.b32.xlu1 %v5257_v4, %s2524_s27 }
 0x431   :  { %1993 = vrot.lane.b32.xlu0 %v5263_v27, %s2524_s27 }
 0x434   :  { %1995 = vrot.lane.b32.xlu1 %v5265_v15, %s2524_s27 }
 0x435   :  { %1997 = vrot.lane.b32.xlu0 %v5271_v47, %s2524_s27 }
 0x438   :  { %1999 = vrot.lane.b32.xlu1 %v5273_v11, %s2524_s27 }
 0x439   :  { %2013 = vrot.lane.b32.xlu0 %v5257_v4, %s2525_s28 }
 0x43c   :  { %2015 = vrot.lane.b32.xlu1 %v5263_v27, %s2525_s28 }
 0x43d   :  { %2017 = vrot.lane.b32.xlu0 %v5265_v15, %s2525_s28 }
 0x440   :  { %2019 = vrot.lane.b32.xlu1 %v5271_v47, %s2525_s28 }
 0x441   :  { %2021 = vrot.lane.b32.xlu0 %v5273_v11, %s2525_s28 }
 0x444   :  { %2035 = vrot.lane.b32.xlu1 %v5257_v4, %s2526_s29 }
 0x445   :  { %2037 = vrot.lane.b32.xlu0 %v5263_v27, %s2526_s29 }
 0x447   :  { %v1770_v23 = vpop.permute.xlu0 %1769 }
 0x448   :  { %2039 = vrot.lane.b32.xlu1 %v5265_v15, %s2526_s29  ;;  %v1780_v1 = vmul.f32 %v1779_v58, %v1770_v23 }
 0x449   :  { %2041 = vrot.lane.b32.xlu0 %v5271_v47, %s2526_s29 }
 0x44a   :  { %v1772_v37 = vpop.permute.xlu1 %1771  ;;  %v1785_v50 = vadd.f32 %v1780_v1, %v1763_v53  ;;  %v5360_v53 = vld [vmem:[#allocation2 + $0x8] sm:$0xff] }
 0x44b   :  { %v1774_v9 = vpop.permute.xlu0 %1773  ;;  %v1781_v7 = vmul.f32 %v1779_v58, %v1772_v37  ;;  %v1845_v37 = vstv %s2412_s13 }
 0x44c   :  { %v1782_v63 = vmul.f32 %v1779_v58, %v1774_v9  ;;  %2043 = vrot.lane.b32.xlu1 %v5273_v11, %s2526_s29 }
 0x44d   :  { %2069 = vrot.lane.b32.xlu0 %v5308_v55, %s2523_s2  ;;  %v1786_v32 = vadd.f32 %v1781_v7, %v1764_v6  ;;  %v1862_v6 = vstv %s2413_s14 }
 0x44e   :  { %v1787_v61 = vadd.f32 %v1782_v63, %v1765_v30  ;;  %v1776_v12 = vpop.permute.xlu1 %1775 }
 0x44f   :  { %v1778_v0 = vpop.permute.xlu0 %1777  ;;  %v1783_v39 = vmul.f32 %v1779_v58, %v1776_v12 }
 0x450   :  { %v1784_v38 = vmul.f32 %v1779_v58, %v1778_v0  ;;  %2071 = vrot.lane.b32.xlu1 %v5316_v60, %s2523_s2 }
 0x451   :  { %2073 = vrot.lane.b32.xlu0 %v5318_v41, %s2523_s2  ;;  %v1788_v40 = vadd.f32 %v1783_v39, %v1766_v35 }
 0x452   :  { %v1789_v52 = vadd.f32 %v1784_v38, %v1767_v51  ;;  %v1792_v28 = vpop.permute.xlu1 %1791 }
 0x453   :  { %v1794_v48 = vpop.permute.xlu0 %1793  ;;  %v1802_v29 = vmul.f32 %v1801_v57, %v1792_v28 }
 0x454   :  { %v1803_v18 = vmul.f32 %v1801_v57, %v1794_v48  ;;  %2075 = vrot.lane.b32.xlu1 %v5326_v43, %s2523_s2 }
 0x455   :  { %2077 = vrot.lane.b32.xlu0 %v5328_v56, %s2523_s2  ;;  %v1807_v14 = vadd.f32 %v1802_v29, %v1785_v50  ;;  %v1863_v29 = vmul.f32 %v1862_v6, %v5207_v21 }
 0x456   :  { %v1808_v54 = vadd.f32 %v1803_v18, %v1786_v32  ;;  %v1796_v62 = vpop.permute.xlu1 %1795 }
 0x457   :  { %v1798_v45 = vpop.permute.xlu0 %1797  ;;  %v1804_v13 = vmul.f32 %v1801_v57, %v1796_v62 }
 0x458   :  { %v1805_v2 = vmul.f32 %v1801_v57, %v1798_v45  ;;  %2091 = vrot.lane.b32.xlu1 %v5308_v55, %s2524_s27 }
 0x459   :  { %2093 = vrot.lane.b32.xlu0 %v5316_v60, %s2524_s27  ;;  %v1809_v31 = vadd.f32 %v1804_v13, %v1787_v61 }
 0x45a   :  { %v1810_v17 = vadd.f32 %v1805_v2, %v1788_v40  ;;  %v1800_v36 = vpop.permute.xlu1 %1799  ;;  %v1879_v40 = vstv %s2414_s15 }
 0x45b   :  { %v1814_v26 = vpop.permute.xlu0 %1813  ;;  %v1806_v49 = vmul.f32 %v1801_v57, %v1800_v36  ;;  %v5358_v57 = vld [vmem:[#allocation2] sm:$0xff] }
 0x45c   :  { %v1824_v5 = vmul.f32 %v1823_v20, %v1814_v26  ;;  %2095 = vrot.lane.b32.xlu1 %v5318_v41, %s2524_s27  ;;  %v5383_v36 = vld [vmem:[#allocation2 + $0x20] sm:$0xff] }
 0x45d   :  { %2097 = vrot.lane.b32.xlu0 %v5326_v43, %s2524_s27  ;;  %v1811_v24 = vadd.f32 %v1806_v49, %v1789_v52 }
 0x45e   :  { %v1829_v44 = vadd.f32 %v1824_v5, %v1807_v14  ;;  %v1816_v34 = vpop.permute.xlu1 %1815  ;;  %v5371_v14 = vld [vmem:[#allocation2 + $0x10] sm:$0xff] }
 0x45f   :  { %v1818_v16 = vpop.permute.xlu0 %1817  ;;  %v1825_v33 = vmul.f32 %v1823_v20, %v1816_v34 }
 0x460   :  { %v1826_v8 = vmul.f32 %v1823_v20, %v1818_v16  ;;  %2099 = vrot.lane.b32.xlu1 %v5328_v56, %s2524_s27 }
 0x461   :  { %2113 = vrot.lane.b32.xlu0 %v5308_v55, %s2525_s28  ;;  %v1830_v42 = vadd.f32 %v1825_v33, %v1808_v54  ;;  %v5373_v54 = vld [vmem:[#allocation2 + $0x18] sm:$0xff] }
 0x462   :  { %v1831_v46 = vadd.f32 %v1826_v8, %v1809_v31  ;;  %v1820_v22 = vpop.permute.xlu1 %1819  ;;  %v1865_v31 = vmul.f32 %v1862_v6, %v5215_v59  ;;  %v1901_v59 = vstv %s2415_s16 }
 0x463   :  { %v1822_v23 = vpop.permute.xlu0 %1821  ;;  %v1827_v10 = vmul.f32 %v1823_v20, %v1820_v22 }
 0x464   :  { %v1828_v58 = vmul.f32 %v1823_v20, %v1822_v23  ;;  %2115 = vrot.lane.b32.xlu1 %v5316_v60, %s2525_s28  ;;  %v1864_v20 = vmul.f32 %v1862_v6, %v5213_v3  ;;  %v1867_v3 = vmul.f32 %v1862_v6, %v5223_v25 }
 0x465   :  { %2117 = vrot.lane.b32.xlu0 %v5318_v41, %s2525_s28  ;;  %v1832_v9 = vadd.f32 %v1827_v10, %v1810_v17 }
 0x466   :  { %v1833_v30 = vadd.f32 %v1828_v58, %v1811_v24  ;;  %v1836_v63 = vpop.permute.xlu1 %1835 }
 0x467   :  { %v1838_v61 = vpop.permute.xlu0 %1837  ;;  %v1846_v12 = vmul.f32 %v1845_v37, %v1836_v63 }
 0x468   :  { %v1847_v35 = vmul.f32 %v1845_v37, %v1838_v61  ;;  %2119 = vrot.lane.b32.xlu1 %v5326_v43, %s2525_s28 }
 0x469   :  { %2121 = vrot.lane.b32.xlu0 %v5328_v56, %s2525_s28  ;;  %v5354_v51 = vadd.f32 %v1846_v12, %v1829_v44  ;;  %v1866_v44 = vmul.f32 %v1862_v6, %v5221_v19 }
 0x46a   :  { %v5356_v0 = vadd.f32 %v1847_v35, %v1830_v42  ;;  %v1840_v1 = vpop.permute.xlu1 %1839 }
 0x46b   :  { %v1842_v7 = vpop.permute.xlu0 %1841  ;;  %v1848_v39 = vmul.f32 %v1845_v37, %v1840_v1 }
 0x46c   :  { %v1849_v38 = vmul.f32 %v1845_v37, %v1842_v7  ;;  %2169 = vrot.lane.b32.xlu1 %v5358_v57, %s2523_s2 }
 0x46d   :  { %2171 = vrot.lane.b32.xlu0 %v5360_v53, %s2523_s2  ;;  %v5366_v52 = vadd.f32 %v1848_v39, %v1831_v46 }
 0x46e   :  { %v5368_v28 = vadd.f32 %v1849_v38, %v1832_v9  ;;  %v1844_v48 = vpop.permute.xlu1 %1843 }
 0x46f   :  { %v1870_v50 = vpop.permute.xlu0 %1869  ;;  %v1850_v32 = vmul.f32 %v1845_v37, %v1844_v48 }
 0x470   :  { %v1880_v18 = vmul.f32 %v1879_v40, %v1870_v50  ;;  %2173 = vrot.lane.b32.xlu1 %v5371_v14, %s2523_s2 }
 0x471   :  { %2175 = vrot.lane.b32.xlu0 %v5373_v54, %s2523_s2  ;;  %v5379_v62 = vadd.f32 %v1850_v32, %v1833_v30 }
 0x472   :  { %v1885_v45 = vadd.f32 %v1880_v18, %v1863_v29  ;;  %v1872_v13 = vpop.permute.xlu1 %1871 }
 0x473   :  { %v1874_v2 = vpop.permute.xlu0 %1873  ;;  %v1881_v21 = vmul.f32 %v1879_v40, %v1872_v13 }
 0x474   :  { %v1882_v17 = vmul.f32 %v1879_v40, %v1874_v2  ;;  %2177 = vrot.lane.b32.xlu1 %v5383_v36, %s2523_s2  ;;  %s2416_s2 = sld [smem:[#allocation7 + $0x53]] }
 0x475   :  { %2135 = vrot.lane.b32.xlu0 %v5308_v55, %s2526_s29  ;;  %v1886_v26 = vadd.f32 %v1881_v21, %v1864_v20  ;;  %v1945_v20 = vstv %s2417_s17 }
 0x476   :  { %v1887_v49 = vadd.f32 %v1882_v17, %v1865_v31  ;;  %v1876_v5 = vpop.permute.xlu1 %1875 }
 0x477   :  { %v1878_v24 = vpop.permute.xlu0 %1877  ;;  %v1883_v34 = vmul.f32 %v1879_v40, %v1876_v5 }
 0x478   :  { %v1884_v16 = vmul.f32 %v1879_v40, %v1878_v24  ;;  %2137 = vrot.lane.b32.xlu1 %v5316_v60, %s2526_s29 }
 0x479   :  { %2139 = vrot.lane.b32.xlu0 %v5318_v41, %s2526_s29  ;;  %v1888_v33 = vadd.f32 %v1883_v34, %v1866_v44 }
 0x47a   :  { %v1889_v8 = vadd.f32 %v1884_v16, %v1867_v3  ;;  %v1892_v42 = vpop.permute.xlu1 %1891  ;;  %v1923_v30 = vstv %s2416_s2 }
 0x47b   :  { %v1894_v46 = vpop.permute.xlu0 %1893  ;;  %v1902_v22 = vmul.f32 %v1901_v59, %v1892_v42 }
 0x47c   :  { %v1903_v23 = vmul.f32 %v1901_v59, %v1894_v46  ;;  %2141 = vrot.lane.b32.xlu1 %v5326_v43, %s2526_s29 }
 0x47d   :  { %2143 = vrot.lane.b32.xlu0 %v5328_v56, %s2526_s29  ;;  %v1907_v19 = vadd.f32 %v1902_v22, %v1885_v45 }
 0x47e   :  { %v1908_v25 = vadd.f32 %v1903_v23, %v1886_v26  ;;  %v1896_v10 = vpop.permute.xlu1 %1895 }
 0x47f   :  { %v1898_v58 = vpop.permute.xlu0 %1897  ;;  %v1904_v37 = vmul.f32 %v1901_v59, %v1896_v10 }
 0x480   :  { %v1905_v9 = vmul.f32 %v1901_v59, %v1898_v58  ;;  %2191 = vrot.lane.b32.xlu1 %v5358_v57, %s2524_s27 }
 0x481   :  { %2193 = vrot.lane.b32.xlu0 %v5360_v53, %s2524_s27  ;;  %v1909_v63 = vadd.f32 %v1904_v37, %v1887_v49 }
 0x482   :  { %v1910_v61 = vadd.f32 %v1905_v9, %v1888_v33  ;;  %v1900_v12 = vpop.permute.xlu1 %1899 }
 0x483   :  { %v1914_v35 = vpop.permute.xlu0 %1913  ;;  %v1906_v1 = vmul.f32 %v1901_v59, %v1900_v12 }
 0x484   :  { %v1924_v7 = vmul.f32 %v1923_v30, %v1914_v35  ;;  %2195 = vrot.lane.b32.xlu1 %v5371_v14, %s2524_s27  ;;  %v2001_v35 = vstv %s2420_s20 }
 0x485   :  { %2197 = vrot.lane.b32.xlu0 %v5373_v54, %s2524_s27  ;;  %v1911_v39 = vadd.f32 %v1906_v1, %v1889_v8 }
 0x486   :  { %v1929_v38 = vadd.f32 %v1924_v7, %v1907_v19  ;;  %v1916_v6 = vpop.permute.xlu1 %1915 }
 0x487   :  { %v1918_v40 = vpop.permute.xlu0 %1917  ;;  %v1925_v48 = vmul.f32 %v1923_v30, %v1916_v6 }
 0x488   :  { %v1926_v50 = vmul.f32 %v1923_v30, %v1918_v40  ;;  %2199 = vrot.lane.b32.xlu1 %v5383_v36, %s2524_s27  ;;  %s2419_s27 = sld [smem:[#allocation7 + $0x56]] }
 0x489   :  { %2213 = vrot.lane.b32.xlu0 %v5358_v57, %s2525_s28  ;;  %v1930_v32 = vadd.f32 %v1925_v48, %v1908_v25 }
 0x48a   :  { %v1931_v29 = vadd.f32 %v1926_v50, %v1909_v63  ;;  %v1920_v18 = vpop.permute.xlu1 %1919 }
 0x48b   :  { %v1922_v45 = vpop.permute.xlu0 %1921  ;;  %v1927_v13 = vmul.f32 %v1923_v30, %v1920_v18 }
 0x48c   :  { %v1928_v2 = vmul.f32 %v1923_v30, %v1922_v45  ;;  %2215 = vrot.lane.b32.xlu1 %v5360_v53, %s2525_s28 }
 0x48d   :  { %2217 = vrot.lane.b32.xlu0 %v5371_v14, %s2525_s28  ;;  %v1932_v21 = vadd.f32 %v1927_v13, %v1910_v61 }
 0x48e   :  { %v1933_v31 = vadd.f32 %v1928_v2, %v1911_v39  ;;  %v1936_v17 = vpop.permute.xlu1 %1935  ;;  %v1979_v9 = vstv %s2419_s27 }
 0x48f   :  { %v1938_v26 = vpop.permute.xlu0 %1937  ;;  %v1946_v49 = vmul.f32 %v1945_v20, %v1936_v17  ;;  %v2023_v17 = vstv %s2421_s21 }
 0x490   :  { %v1947_v5 = vmul.f32 %v1945_v20, %v1938_v26  ;;  %2219 = vrot.lane.b32.xlu1 %v5373_v54, %s2525_s28 }
 0x491   :  { %2221 = vrot.lane.b32.xlu0 %v5383_v36, %s2525_s28  ;;  %v1951_v24 = vadd.f32 %v1946_v49, %v1929_v38  ;;  %s2418_s28 = sld [smem:[#allocation7 + $0x55]] }
 0x492   :  { %v1952_v44 = vadd.f32 %v1947_v5, %v1930_v32  ;;  %v1940_v34 = vpop.permute.xlu1 %1939 }
 0x493   :  { %v1942_v3 = vpop.permute.xlu0 %1941  ;;  %v5420_v16 = vadd.f32 %v1951_v24, %v5354_v51  ;;  %v1948_v33 = vmul.f32 %v1945_v20, %v1940_v34 }
 0x494   :  { %v5423_v59 = vadd.f32 %v1952_v44, %v5356_v0  ;;  %v1949_v8 = vmul.f32 %v1945_v20, %v1942_v3  ;;  %2235 = vrot.lane.b32.xlu1 %v5358_v57, %s2526_s29 }
 0x495   :  { %2237 = vrot.lane.b32.xlu0 %v5360_v53, %s2526_s29  ;;  %v1953_v42 = vadd.f32 %v1948_v33, %v1931_v29 }
 0x496   :  { %v1954_v46 = vadd.f32 %v1949_v8, %v1932_v21  ;;  %v1944_v22 = vpop.permute.xlu1 %1943 }
 0x497   :  { %v1970_v23 = vpop.permute.xlu0 %1969  ;;  %v5430_v51 = vadd.f32 %v1953_v42, %v5366_v52  ;;  %v1950_v19 = vmul.f32 %v1945_v20, %v1944_v22  ;;  %v1962_v52 = vstv %s2418_s28 }
 0x498   :  { %v5433_v0 = vadd.f32 %v1954_v46, %v5368_v28  ;;  %2239 = vrot.lane.b32.xlu1 %v5371_v14, %s2526_s29  ;;  %v1980_v28 = vmul.f32 %v1979_v9, %v1970_v23  ;;  %v1963_v12 = vmul.f32 %v1962_v52, %v5257_v4  ;;  %v1964_v1 = vmul.f32 %v1962_v52, %v5263_v27 }
 0x499   :  { %2241 = vrot.lane.b32.xlu0 %v5373_v54, %s2526_s29  ;;  %v1955_v25 = vadd.f32 %v1950_v19, %v1933_v31  ;;  %v1965_v32 = vmul.f32 %v1962_v52, %v5265_v15  ;;  %v1966_v29 = vmul.f32 %v1962_v52, %v5271_v47  ;;  %v1967_v26 = vmul.f32 %v1962_v52, %v5273_v11 }
 0x49a   :  { %v1972_v10 = vpop.permute.xlu1 %1971  ;;  %v1985_v7 = vadd.f32 %v1980_v28, %v1963_v12 }
 0x49b   :  { %v1974_v58 = vpop.permute.xlu0 %1973  ;;  %v5440_v37 = vadd.f32 %v1955_v25, %v5379_v62  ;;  %v1981_v61 = vmul.f32 %v1979_v9, %v1972_v10 }
 0x49c   :  { %2243 = vrot.lane.b32.xlu1 %v5383_v36, %s2526_s29  ;;  %v1982_v39 = vmul.f32 %v1979_v9, %v1974_v58  ;;  %s2422_s29 = sld [smem:[#allocation7 + $0x59]] }
 0x49d   :  { %v1986_v6 = vadd.f32 %v1981_v61, %v1964_v1 }
 0x49e   :  { %v1976_v30 = vpop.permute.xlu1 %1975  ;;  %v1987_v13 = vadd.f32 %v1982_v39, %v1965_v32 }
 0x49f   :  { %v1978_v63 = vpop.permute.xlu0 %1977  ;;  %v1983_v40 = vmul.f32 %v1979_v9, %v1976_v30 }
 0x4a0   :  { %v1984_v21 = vmul.f32 %v1979_v9, %v1978_v63 }
 0x4a1   :  { %v1988_v20 = vadd.f32 %v1983_v40, %v1966_v29 }
 0x4a2   :  { %v1992_v38 = vpop.permute.xlu1 %1991  ;;  %v1989_v34 = vadd.f32 %v1984_v21, %v1967_v26  ;;  %v2045_v9 = vstv %s2422_s29 }
 0x4a3   :  { %v1994_v62 = vpop.permute.xlu0 %1993  ;;  %v2002_v48 = vmul.f32 %v2001_v35, %v1992_v38 }
 0x4a4   :  { %v2003_v50 = vmul.f32 %v2001_v35, %v1994_v62 }
 0x4a5   :  { %v2007_v18 = vadd.f32 %v2002_v48, %v1985_v7 }
 0x4a6   :  { %v2008_v45 = vadd.f32 %v2003_v50, %v1986_v6  ;;  %v1996_v4 = vpop.permute.xlu1 %1995 }
 0x4a7   :  { %v1998_v2 = vpop.permute.xlu0 %1997  ;;  %v2004_v27 = vmul.f32 %v2001_v35, %v1996_v4 }
 0x4a8   :  { %v2005_v31 = vmul.f32 %v2001_v35, %v1998_v2 }
 0x4a9   :  { %v2009_v49 = vadd.f32 %v2004_v27, %v1987_v13 }
 0x4aa   :  { %v2010_v5 = vadd.f32 %v2005_v31, %v1988_v20  ;;  %v2000_v24 = vpop.permute.xlu1 %1999 }
 0x4ab   :  { %v2014_v44 = vpop.permute.xlu0 %2013  ;;  %v2006_v15 = vmul.f32 %v2001_v35, %v2000_v24 }
 0x4ac   :  { %v2024_v3 = vmul.f32 %v2023_v17, %v2014_v44  ;;  %v2079_v44 = vstv %s2424_s22 }
 0x4ad   :  { %v2011_v47 = vadd.f32 %v2006_v15, %v1989_v34  ;;  %v2062_v34 = vstv %s2423_s1  ;;  %v2101_v15 = vstv %s2425_s23 }
 0x4ae   :  { %v2029_v33 = vadd.f32 %v2024_v3, %v2007_v18  ;;  %v2016_v8 = vpop.permute.xlu1 %2015 }
 0x4af   :  { %v2018_v42 = vpop.permute.xlu0 %2017  ;;  %v2025_v46 = vmul.f32 %v2023_v17, %v2016_v8  ;;  %v2123_v8 = vstv %s2426_s24 }
 0x4b0   :  { %v2026_v22 = vmul.f32 %v2023_v17, %v2018_v42  ;;  %v2063_v42 = vmul.f32 %v2062_v34, %v5308_v55  ;;  %v2066_v55 = vmul.f32 %v2062_v34, %v5326_v43 }
 0x4b1   :  { %v2030_v23 = vadd.f32 %v2025_v46, %v2008_v45 }
 0x4b2   :  { %v2031_v19 = vadd.f32 %v2026_v22, %v2009_v49  ;;  %v2020_v25 = vpop.permute.xlu1 %2019 }
 0x4b3   :  { %v2022_v10 = vpop.permute.xlu0 %2021  ;;  %v2027_v58 = vmul.f32 %v2023_v17, %v2020_v25 }
 0x4b4   :  { %v2028_v11 = vmul.f32 %v2023_v17, %v2022_v10 }
 0x4b5   :  { %v2032_v52 = vadd.f32 %v2027_v58, %v2010_v5 }
 0x4b6   :  { %v2033_v28 = vadd.f32 %v2028_v11, %v2011_v47  ;;  %v2036_v30 = vpop.permute.xlu1 %2035  ;;  %v2064_v11 = vmul.f32 %v2062_v34, %v5316_v60  ;;  %v2067_v60 = vmul.f32 %v2062_v34, %v5328_v56 }
 0x4b7   :  { %v2038_v63 = vpop.permute.xlu0 %2037  ;;  %v2046_v61 = vmul.f32 %v2045_v9, %v2036_v30 }
 0x4b8   :  { %v2047_v12 = vmul.f32 %v2045_v9, %v2038_v63 }
 0x4b9   :  { %v5449_v35 = vadd.f32 %v2046_v61, %v2029_v33 }
 0x4ba   :  { %v5451_v1 = vadd.f32 %v2047_v12, %v2030_v23  ;;  %v2040_v7 = vpop.permute.xlu1 %2039 }
 0x4bb   :  { %v2042_v39 = vpop.permute.xlu0 %2041  ;;  %v2048_v38 = vmul.f32 %v2045_v9, %v2040_v7 }
 0x4bc   :  { %v2049_v62 = vmul.f32 %v2045_v9, %v2042_v39 }
 0x4bd   :  { %v5453_v6 = vadd.f32 %v2048_v38, %v2031_v19 }
 0x4be   :  { %v5455_v40 = vadd.f32 %v2049_v62, %v2032_v52  ;;  %v2044_v48 = vpop.permute.xlu1 %2043  ;;  %v2145_v52 = vstv %s2427_s25 }
 0x4bf   :  { %v2070_v50 = vpop.permute.xlu0 %2069  ;;  %v2050_v32 = vmul.f32 %v2045_v9, %v2044_v48 }
 0x4c0   :  { %v2080_v33 = vmul.f32 %v2079_v44, %v2070_v50 }
 0x4c1   :  { %v5457_v29 = vadd.f32 %v2050_v32, %v2033_v28  ;;  %v2065_v28 = vmul.f32 %v2062_v34, %v5318_v41 }
 0x4c2   :  { %v2072_v18 = vpop.permute.xlu1 %2071  ;;  %v2085_v25 = vadd.f32 %v2080_v33, %v2063_v42 }
 0x4c3   :  { %v2074_v45 = vpop.permute.xlu0 %2073  ;;  %v2081_v22 = vmul.f32 %v2079_v44, %v2072_v18 }
 0x4c4   :  { %v2082_v10 = vmul.f32 %v2079_v44, %v2074_v45 }
 0x4c5   :  { %v2086_v12 = vadd.f32 %v2081_v22, %v2064_v11 }
 0x4c6   :  { %v2076_v13 = vpop.permute.xlu1 %2075  ;;  %v2087_v48 = vadd.f32 %v2082_v10, %v2065_v28 }
 0x4c7   :  { %v2078_v4 = vpop.permute.xlu0 %2077  ;;  %v2083_v30 = vmul.f32 %v2079_v44, %v2076_v13 }
 0x4c8   :  { %v2084_v7 = vmul.f32 %v2079_v44, %v2078_v4 }
 0x4c9   :  { %v2088_v13 = vadd.f32 %v2083_v30, %v2066_v55 }
 0x4ca   :  { %v2092_v2 = vpop.permute.xlu1 %2091 }
 0x4cb   :  { %v2094_v20 = vpop.permute.xlu0 %2093  ;;  %v2102_v46 = vmul.f32 %v2101_v15, %v2092_v2 }
 0x4cc   :  { %v2103_v9 = vmul.f32 %v2101_v15, %v2094_v20 }
 0x4cd   :  { %v2107_v63 = vadd.f32 %v2102_v46, %v2085_v25 }
 0x4ce   :  { %v2096_v21 = vpop.permute.xlu1 %2095  ;;  %v2108_v45 = vadd.f32 %v2103_v9, %v2086_v12 }
 0x4cf   :  { %v2098_v27 = vpop.permute.xlu0 %2097  ;;  %v2104_v61 = vmul.f32 %v2101_v15, %v2096_v21 }
 0x4d0   :  { %v2105_v2 = vmul.f32 %v2101_v15, %v2098_v27 }
 0x4d1   :  { %v2109_v20 = vadd.f32 %v2104_v61, %v2087_v48 }
 0x4d2   :  { %v2100_v31 = vpop.permute.xlu1 %2099  ;;  %v2110_v25 = vadd.f32 %v2105_v2, %v2088_v13 }
 0x4d3   :  { %v2114_v17 = vpop.permute.xlu0 %2113  ;;  %v2106_v41 = vmul.f32 %v2101_v15, %v2100_v31 }
 0x4d4   :  { %v2124_v58 = vmul.f32 %v2123_v8, %v2114_v17  ;;  %v2089_v17 = vadd.f32 %v2084_v7, %v2067_v60  ;;  %v2223_v60 = vstv %s2431_s4 }
 0x4d6   :  { %v2116_v26 = vpop.permute.xlu1 %2115  ;;  %v2129_v50 = vadd.f32 %v2124_v58, %v2107_v63  ;;  %v2111_v10 = vadd.f32 %v2106_v41, %v2089_v17 }
 0x4d7   :  { %v2118_v49 = vpop.permute.xlu0 %2117  ;;  %v2125_v39 = vmul.f32 %v2123_v8, %v2116_v26 }
 0x4d8   :  { %v2126_v32 = vmul.f32 %v2123_v8, %v2118_v49 }
 0x4d9   :  { %v2130_v33 = vadd.f32 %v2125_v39, %v2108_v45  ;;  %v2179_v39 = vstv %s2429_s26 }
 0x4da   :  { %v2120_v5 = vpop.permute.xlu1 %2119  ;;  %v2131_v42 = vadd.f32 %v2126_v32, %v2109_v20 }
 0x4db   :  { %v2122_v24 = vpop.permute.xlu0 %2121  ;;  %v2127_v43 = vmul.f32 %v2123_v8, %v2120_v5 }
 0x4dc   :  { %v2128_v4 = vmul.f32 %v2123_v8, %v2122_v24 }
 0x4dd   :  { %v2132_v31 = vadd.f32 %v2127_v43, %v2110_v25 }
 0x4de   :  { %v5459_v3 = vpop.permute.xlu1 %2169  ;;  %v2133_v15 = vadd.f32 %v2128_v4, %v2111_v10 }
 0x4df   :  { %v5461_v47 = vpop.permute.xlu0 %2171  ;;  %v2180_v48 = vmul.f32 %v2179_v39, %v5459_v3 }
 0x4e2   :  { %v5464_v23 = vpop.permute.xlu1 %2173 }
 0x4e3   :  { %v5466_v19 = vpop.permute.xlu0 %2175  ;;  %v2182_v2 = vmul.f32 %v2179_v39, %v5464_v23 }
 0x4e4   :  { %v2183_v20 = vmul.f32 %v2179_v39, %v5466_v19 }
 0x4e6   :  { %v5471_v38 = vpop.permute.xlu1 %2177 }
 0x4e7   :  { %v2136_v62 = vpop.permute.xlu0 %2135 }
 0x4e8   :  { %v2146_v18 = vmul.f32 %v2145_v52, %v2136_v62 }
 0x4ea   :  { %v2151_v21 = vadd.f32 %v2146_v18, %v2129_v50  ;;  %v2138_v26 = vpop.permute.xlu1 %2137  ;;  %v2181_v50 = vmul.f32 %v2179_v39, %v5461_v47 }
 0x4eb   :  { %v2140_v44 = vpop.permute.xlu0 %2139  ;;  %v2147_v22 = vmul.f32 %v2145_v52, %v2138_v26 }
 0x4ec   :  { %v2261_v46 = vadd.f32 %v2151_v21, %v5449_v35  ;;  %v2148_v49 = vmul.f32 %v2145_v52, %v2140_v44 }
 0x4ed   :  { %v2152_v56 = vadd.f32 %v2147_v22, %v2130_v33 }
 0x4ee   :  { %v2153_v34 = vadd.f32 %v2148_v49, %v2131_v42  ;;  %v5476_v27 = vadd.f32 %v2261_v46, %v5420_v16  ;;  %v2142_v58 = vpop.permute.xlu1 %2141  ;;  %v2297_v46 = vstv %s5498_s6  ;;  %v2184_v49 = vmul.f32 %v2179_v39, %v5471_v38 }
 0x4ef   :  { %v2144_v11 = vpop.permute.xlu0 %2143  ;;  %v2262_v5 = vadd.f32 %v2152_v56, %v5451_v1  ;;  %v2149_v8 = vmul.f32 %v2145_v52, %v2142_v58  ;;  %v5954_v56 = vld [vmem:[#allocation73_spill] sm:$0xff] }
 0x4f0   :  { %v2263_v24 = vadd.f32 %v2153_v34, %v5453_v6  ;;  %v2150_v9 = vmul.f32 %v2145_v52, %v2144_v11  ;;  %v65_v38 = vadd.s32 32, %v5954_v56 }
 0x4f1   :  { %v2154_v35 = vadd.f32 %v2149_v8, %v2132_v31  ;;  %v5481_v30 = vadd.f32 %v2262_v5, %v5423_v59 }
 0x4f2   :  { %v2155_v28 = vadd.f32 %v2150_v9, %v2133_v15  ;;  %v5484_v63 = vadd.f32 %v2263_v24, %v5430_v51  ;;  %v2192_v16 = vpop.permute.xlu1 %2191 }
 0x4f3   :  { %v2194_v61 = vpop.permute.xlu0 %2193  ;;  %v2264_v12 = vadd.f32 %v2154_v35, %v5455_v40  ;;  %v5949_v40 = vld [vmem:[#allocation70_spill] sm:$0xff] }
 0x4f4   :  { %v2265_v55 = vadd.f32 %v2155_v28, %v5457_v29  ;;  %vm2286_vm10 = vcmp.lt.s32.totalorder %v5949_v40, 36  ;;  %v2162_v29 = vstv %s2428_s0  ;;  %vm2288_vm11 = vcmp.lt.s32.totalorder %v5949_v40, 72 }
 0x4f5   :  { %v5489_v1 = vadd.f32 %v2264_v12, %v5433_v0  ;;  %v2201_v0 = vstv %s2430_s30  ;;  %vm5504_vm12 = vmand %vm613_vm0, %vm2286_vm10  ;;  %v2163_v18 = vmul.f32 %v2162_v29, %v5358_v57  ;;  %v2164_v45 = vmul.f32 %v2162_v29, %v5360_v53 }
 0x4f6   :  { %v5492_v6 = vadd.f32 %v2265_v55, %v5440_v37  ;;  %v2196_v59 = vpop.permute.xlu1 %2195  ;;  %vm2289_vm13 = vmand %vm616_vm2, %vm2288_vm11  ;;  %v2202_v3 = vmul.f32 %v2201_v0, %v2192_v16  ;;  %v2203_v41 = vmul.f32 %v2201_v0, %v2194_v61  ;;  %v2165_v47 = vmul.f32 %v2162_v29, %v5371_v14 }
 0x4f7   :  { %v2198_v52 = vpop.permute.xlu0 %2197  ;;  %v2166_v13 = vmul.f32 %v2162_v29, %v5373_v54  ;;  %v2185_v17 = vadd.f32 %v2180_v48, %v2163_v18  ;;  %v2186_v33 = vadd.f32 %v2181_v50, %v2164_v45  ;;  %vm5518_vm0 = vmor %vm5504_vm12, %vm2289_vm13  ;;  %v2167_v23 = vmul.f32 %v2162_v29, %v5383_v36 }
 0x4f8   :  { %v2204_v14 = vmul.f32 %v2201_v0, %v2196_v59  ;;  %v2205_v26 = vmul.f32 %v2201_v0, %v2198_v52  ;;  %v2245_v54 = vstv %s5494_s5  ;;  %v2187_v44 = vadd.f32 %v2182_v2, %v2165_v47  ;;  %vm5530_vm2 = vmand %vm598_vm6, %vm5518_vm0 }
 0x4f9   :  { %v2207_v42 = vadd.f32 %v2202_v3, %v2185_v17  ;;  %v2208_v19 = vadd.f32 %v2203_v41, %v2186_v33  ;;  %v2188_v22 = vadd.f32 %v2183_v20, %v2166_v13  ;;  %v2298_v35 = vsel %vm5530_vm2, %v2297_v46, 0.0 }
 0x4fa   :  { %v2200_v51 = vpop.permute.xlu1 %2199  ;;  %v2209_v24 = vadd.f32 %v2204_v14, %v2187_v44  ;;  %v2299_v16 = vsel %vm5518_vm0, %v2297_v46, 0.0  ;;  %v2189_v12 = vadd.f32 %v2184_v49, %v2167_v23  ;;  %vm2280_vm6 = vcmp.lt.s32.totalorder %v65_v38, 36 }
 0x4fb   :  { %v2214_v7 = vpop.permute.xlu0 %2213  ;;  %v2210_v8 = vadd.f32 %v2205_v26, %v2188_v22  ;;  %v2206_v9 = vmul.f32 %v2201_v0, %v2200_v51  ;;  %vm2295_vm14 = vmand %vm2280_vm6, %vm5518_vm0 }
 0x4fc   :  { %v2224_v43 = vmul.f32 %v2223_v60, %v2214_v7  ;;  %v2302_v47 = vsel %vm2295_vm14, %v2297_v46, 0.0 }
 0x4fe   :  { %v2216_v62 = vpop.permute.xlu1 %2215  ;;  %v2229_v15 = vadd.f32 %v2224_v43, %v2207_v42 }
 0x4ff   :  { %v2218_v37 = vpop.permute.xlu0 %2217  ;;  %v2225_v4 = vmul.f32 %v2223_v60, %v2216_v62  ;;  %v2211_v62 = vadd.f32 %v2206_v9, %v2189_v12 }
 0x500   :  { %v2226_v25 = vmul.f32 %v2223_v60, %v2218_v37 }
 0x501   :  { %v2230_v58 = vadd.f32 %v2225_v4, %v2208_v19 }
 0x502   :  { %v2220_v21 = vpop.permute.xlu1 %2219  ;;  %v2231_v55 = vadd.f32 %v2226_v25, %v2209_v24 }
 0x503   :  { %v2222_v57 = vpop.permute.xlu0 %2221  ;;  %v2227_v10 = vmul.f32 %v2223_v60, %v2220_v21 }
 0x504   :  { %v2228_v52 = vmul.f32 %v2223_v60, %v2222_v57 }
 0x505   :  { %v2232_v59 = vadd.f32 %v2227_v10, %v2210_v8 }
 0x506   :  { %v2236_v36 = vpop.permute.xlu1 %2235  ;;  %v2233_v45 = vadd.f32 %v2228_v52, %v2211_v62 }
 0x507   :  { %v2238_v31 = vpop.permute.xlu0 %2237  ;;  %v2246_v11 = vmul.f32 %v2245_v54, %v2236_v36 }
 0x508   :  { %v2247_v5 = vmul.f32 %v2245_v54, %v2238_v31 }
 0x509   :  { %v2251_v28 = vadd.f32 %v2246_v11, %v2229_v15 }
 0x50a   :  { %v2252_v61 = vadd.f32 %v2247_v5, %v2230_v58  ;;  %v2240_v7 = vpop.permute.xlu1 %2239 }
 0x50b   :  { %v2242_v39 = vpop.permute.xlu0 %2241  ;;  %v2271_v40 = vadd.f32 %v5476_v27, %v2251_v28  ;;  %v2248_v29 = vmul.f32 %v2245_v54, %v2240_v7 }
 0x50c   :  { %v2272_v51 = vadd.f32 %v5481_v30, %v2252_v61  ;;  %v2249_v0 = vmul.f32 %v2245_v54, %v2242_v39 }
 0x50d   :  { %v2303_v37 = vadd.f32 %v2298_v35, %v2271_v40  ;;  %v2253_v50 = vadd.f32 %v2248_v29, %v2231_v55 }
 0x50e   :  { %v2304_v48 = vadd.f32 %v2299_v16, %v2272_v51  ;;  %v2254_v32 = vadd.f32 %v2249_v0, %v2232_v59  ;;  %v2244_v18 = vpop.permute.xlu1 %2243 }
 0x50f   :  { %2308 = vst [vmem:[#allocation10] sm:$0xff] %v2303_v37  ;;  %v2273_v60 = vadd.f32 %v5484_v63, %v2253_v50  ;;  %v2250_v27 = vmul.f32 %v2245_v54, %v2244_v18 }
 0x510   :  { %2309 = vst [vmem:[#allocation10 + $0x8] sm:$0xff] %v2304_v48  ;;  %v2274_v2 = vadd.f32 %v5489_v1, %v2254_v32 }
 0x511   :  { %v2305_v30 = vadd.f32 %v2299_v16, %v2273_v60  ;;  %v2255_v41 = vadd.f32 %v2250_v27, %v2233_v45 }
 0x512   :  { %v2306_v3 = vadd.f32 %v2299_v16, %v2274_v2 }
 0x513   :  { %2310 = vst [vmem:[#allocation10 + $0x10] sm:$0xff] %v2305_v30  ;;  %v2275_v13 = vadd.f32 %v5492_v6, %v2255_v41 }
 0x514   :  { %2311 = vst [vmem:[#allocation10 + $0x18] sm:$0xff] %v2306_v3 }
 0x515   :  { %v2307_v20 = vadd.f32 %v2302_v47, %v2275_v13 }
 0x517   :  { %2312 = vst [vmem:[#allocation10 + $0x20] sm:$0xff] %v2307_v20 }
 0x518   :  { %2500 = shalt.err (!%p2497_p5)
}
 0x519   :  { %2324 = dma.vmem_to_hbm [thread:$0]  %s2319_s8, 640, %s5555_s3, [#allocation5], %s2518_s18, %s2518_s18, %s2519_s19  }
 0x51a   :  { %2515 = dma.done.wait [#allocation5], 640  }
 0x51b   :  { %2516 = vsyncadd [#allocation5], 4294966656 }
 0x51c   :  { %2328 = vsyncpa [#allocation4], 1 }
 0x51d   :  { %2329 = vsyncpa [#allocation5], 1 }
 0x51e   :  { %2330 = vsyncpa [#allocation6], 1 }
 0x51f   :  { %2331 = vsyncpa [#allocation9], 1 }

</bundles_post_ra>
